<compile_context>
chip_gen: v7x
topology: tpu7x:2x2x1
jax: 0.10.0
libtpu: 0.0.40
codegen_flags: <defaults>
</compile_context>

<pallas_src>
import functools

import jax
import jax.numpy as jnp
from jax.experimental import pallas as pl
from jax.experimental.pallas import tpu as pltpu


# ----------------------------------------------------------------------------
# Fused bidirectional-LSTM layer kernel (optionally fused mean-pool + FC head).
# All sequence tensors are time-major and flattened: [T*B, D] (row t*B + b).
# ----------------------------------------------------------------------------
def _make_bilstm_kernel(T, B, H, n_in, fuse_head):
    G = 4 * H  # per-direction gate width (PyTorch gate order: i, f, g, o)

    def kernel(*refs):
        x_refs = refs[:n_in]                       # n_in x [T*B, D_i]
        wih_refs = refs[n_in:2 * n_in]             # n_in x [D_i, 8H] (fwd|bwd)
        i = 2 * n_in
        whh_f_ref, whh_b_ref, b_ref = refs[i:i + 3]
        i += 3
        if fuse_head:
            wfc_f_ref, wfc_b_ref, bfc_ref = refs[i:i + 3]
            i += 3
            logits_ref = refs[i]
            i += 1
        else:
            out_f_ref, out_b_ref = refs[i:i + 2]
            i += 2
        gates_scr = refs[i]                        # VMEM [T*B, 8H] fp32

        # ---- Hoisted input projection: one wide MXU matmul per input
        # component, both directions at once; bias folded in exactly once.
        g = jnp.dot(x_refs[0][...], wih_refs[0][...],
                    preferred_element_type=jnp.float32)
        for xr, wr in zip(x_refs[1:], wih_refs[1:]):
            g = g + jnp.dot(xr[...], wr[...], preferred_element_type=jnp.float32)
        gates_scr[...] = g + b_ref[...]

        whh_f = whh_f_ref[...]
        whh_b = whh_b_ref[...]

        def cell(gates, c):
            i_g = jax.nn.sigmoid(gates[:, 0 * H:1 * H])
            f_g = jax.nn.sigmoid(gates[:, 1 * H:2 * H])
            g_g = jnp.tanh(gates[:, 2 * H:3 * H])
            o_g = jax.nn.sigmoid(gates[:, 3 * H:4 * H])
            c_new = f_g * c + i_g * g_g
            h_new = o_g * jnp.tanh(c_new)
            return h_new, c_new

        def body(t, carry):
            if fuse_head:
                h_f, c_f, h_b, c_b, s_f, s_b = carry
            else:
                h_f, c_f, h_b, c_b = carry
            rt = T - 1 - t
            # fwd reads position t, bwd reads position T-1-t of the SAME
            # precomputed gates slab (no reversed copy anywhere).
            gin_f = gates_scr[pl.ds(t * B, B), 0:G]
            gin_b = gates_scr[pl.ds(rt * B, B), G:2 * G]
            h_f, c_f = cell(
                gin_f + jnp.dot(h_f, whh_f, preferred_element_type=jnp.float32),
                c_f)
            h_b, c_b = cell(
                gin_b + jnp.dot(h_b, whh_b, preferred_element_type=jnp.float32),
                c_b)
            if fuse_head:
                # Running sums for the fused mean-pool (+ FC at the end).
                return h_f, c_f, h_b, c_b, s_f + h_f, s_b + h_b
            out_f_ref[pl.ds(t * B, B), :] = h_f.astype(out_f_ref.dtype)
            out_b_ref[pl.ds(rt * B, B), :] = h_b.astype(out_b_ref.dtype)
            return h_f, c_f, h_b, c_b

        z = jnp.zeros((B, H), jnp.float32)
        init = (z, z, z, z, z, z) if fuse_head else (z, z, z, z)
        # T is small & static -> fully unroll the recurrence for the scheduler.
        carry = jax.lax.fori_loop(0, T, body, init, unroll=True)

        if fuse_head:
            s_f, s_b = carry[4], carry[5]
            inv_t = jnp.float32(1.0 / T)
            logits = (
                jnp.dot(s_f * inv_t, wfc_f_ref[...],
                        preferred_element_type=jnp.float32)
                + jnp.dot(s_b * inv_t, wfc_b_ref[...],
                          preferred_element_type=jnp.float32)
                + bfc_ref[...])
            logits_ref[...] = logits.astype(logits_ref.dtype)

    return kernel


def _full_spec(shape):
    # No grid: the whole (2-D) array is one VMEM-resident block.
    return pl.BlockSpec(shape, lambda: (0, 0))


def bilstm_layer(xs, p, *, T, B, head=None, out_dtype=jnp.float32):
    """Fused bidirectional LSTM layer.

    xs   : list of time-major flattened inputs, each [T*B, D_i] (their
           concatenation along features is the PyTorch layer input).
    p    : dict with 'wih' (list of [D_i, 8H], fwd|bwd columns), 'whh_f',
           'whh_b' ([H, 4H]) and 'b' ([1, 8H], b_ih + b_hh, fwd|bwd).
    head : optional (wfc_f [H, O], wfc_b [H, O], bfc [1, O]) -> fused
           mean-pool-over-time + Linear; returns logits [B, O].
    Returns (out_f [T*B, H], out_b [T*B, H]) or logits [B, O].
    """
    H = p["whh_f"].shape[0]
    n_in = len(xs)
    fuse_head = head is not None
    kernel = _make_bilstm_kernel(T, B, H, n_in, fuse_head)

    operands = list(xs) + list(p["wih"]) + [p["whh_f"], p["whh_b"], p["b"]]
    if fuse_head:
        operands += list(head)

    in_specs = [_full_spec(a.shape) for a in operands]

    if fuse_head:
        O = head[0].shape[1]
        out_shape = jax.ShapeDtypeStruct((B, O), out_dtype)
        out_specs = _full_spec((B, O))
    else:
        out_shape = (jax.ShapeDtypeStruct((T * B, H), out_dtype),
                     jax.ShapeDtypeStruct((T * B, H), out_dtype))
        out_specs = (_full_spec((T * B, H)), _full_spec((T * B, H)))

    return pl.pallas_call(
        kernel,
        out_shape=out_shape,
        in_specs=in_specs,
        out_specs=out_specs,
        scratch_shapes=[pltpu.VMEM((T * B, 8 * H), jnp.float32)],
    )(*operands)


# ----------------------------------------------------------------------------
# Parameter init (deterministic, synthetic; matches nn.LSTM layout/scales).
# ----------------------------------------------------------------------------
def _init_bilstm(key, d_components, h):
    """One bidirectional LSTM layer whose input is the feature-concat of
    `d_components`-sized pieces.  W_ih is initialized as the full matrix and
    then split into per-component row blocks so that
    sum_i x_i @ W_ih_i == concat(x_i) @ W_ih   (exactly the PyTorch math)."""
    d_in = sum(d_components)
    kf, kb = jax.random.split(key)

    def one_dir(k):
        k1, k2, k3, k4 = jax.random.split(k, 4)
        s = 1.0 / jnp.sqrt(h)
        w_ih = jax.random.uniform(k1, (4 * h, d_in), jnp.float32, -s, s)
        w_hh = jax.random.uniform(k2, (4 * h, h), jnp.float32, -s, s)
        b_ih = jax.random.uniform(k3, (4 * h,), jnp.float32, -s, s)
        b_hh = jax.random.uniform(k4, (4 * h,), jnp.float32, -s, s)
        return w_ih.T, w_hh.T, b_ih + b_hh        # [d_in,4h], [h,4h], [4h]

    wih_f, whh_f, b_f = one_dir(kf)
    wih_b, whh_b, b_b = one_dir(kb)

    wih = []
    off = 0
    for d in d_components:
        # Pack fwd and bwd side by side: [D_i, 8h] (cols 0:4h fwd, 4h:8h bwd).
        wih.append(jnp.concatenate([wih_f[off:off + d], wih_b[off:off + d]],
                                   axis=1))
        off += d

    return {
        "wih": wih,
        "whh_f": whh_f,
        "whh_b": whh_b,
        "b": jnp.concatenate([b_f, b_b])[None, :],   # [1, 8h]
    }


def init_params(key, vocab_size, emb_dim, pad_idx, h1, h2, h3, out_size):
    keys = jax.random.split(key, 6)
    emb = jax.random.normal(keys[0], (vocab_size, emb_dim), jnp.float32)
    emb = emb.at[pad_idx].set(0.0)                 # padding_idx row is zero

    # Input-component orders mirror the PyTorch concatenations:
    #   layer1: [embedded]
    #   layer2: residual_1 = [out1_f, out1_b, embedded]
    #   layer3: residual_2 = [out1_f, out1_b, out2_f, out2_b, embedded]
    lstm1 = _init_bilstm(keys[1], (emb_dim,), h1)
    lstm2 = _init_bilstm(keys[2], (h1, h1, emb_dim), h2)
    lstm3 = _init_bilstm(keys[3], (h1, h1, h2, h2, emb_dim), h3)

    fc_in = 2 * h2  # as written in the reference module (requires h2 == h3)
    fs = 1.0 / jnp.sqrt(fc_in)
    fc_w = jax.random.uniform(keys[4], (out_size, fc_in), jnp.float32, -fs, fs)
    fc_b = jax.random.uniform(keys[5], (out_size,), jnp.float32, -fs, fs)
    fc_w_t = fc_w.T                                # [fc_in, out_size]
    return {
        "embedding": emb,
        "lstm1": lstm1, "lstm2": lstm2, "lstm3": lstm3,
        "fc_wf": fc_w_t[:h3],                      # multiplies mean fwd states
        "fc_wb": fc_w_t[h3:],                      # multiplies mean bwd states
        "fc_b": fc_b[None, :],                     # [1, out_size]
    }


# ----------------------------------------------------------------------------
# Full forward (eval mode: start/middle/final dropouts are identity).
# ----------------------------------------------------------------------------
def dc_lstm_forward(text, params):
    B, T = text.shape
    # Embedding gather + permute(1,0,2) left as plain-JAX glue; flattened to
    # the time-major [T*B, E] layout the kernels use.
    emb = params["embedding"][text]                        # [B, T, E]
    x = jnp.transpose(emb, (1, 0, 2)).reshape(T * B, -1)   # [T*B, E]

    out1_f, out1_b = bilstm_layer([x], params["lstm1"], T=T, B=B)
    out2_f, out2_b = bilstm_layer([out1_f, out1_b, x], params["lstm2"],
                                  T=T, B=B)
    # Layer 3 fuses permute + avg_pool1d(full length) + squeeze + Linear.
    logits = bilstm_layer(
        [out1_f, out1_b, out2_f, out2_b, x], params["lstm3"], T=T, B=B,
        head=(params["fc_wf"], params["fc_wb"], params["fc_b"]))
    return logits                                          # [B, out_size]


if __name__ == "__main__":
    # Small, module-consistent hyperparameters.
    VOCAB, EMB, PAD = 50, 32, 0
    H1 = H2 = H3 = 16          # H2 == H3 so the reference FC in_features match
    OUT = 3
    B, T = 2, 8

    key = jax.random.PRNGKey(0)
    pkey, tkey = jax.random.split(key)
    params = init_params(pkey, VOCAB, EMB, PAD, H1, H2, H3, OUT)
    text = jax.random.randint(tkey, (B, T), 0, VOCAB, dtype=jnp.int32)

    fwd = jax.jit(dc_lstm_forward)
    logits = fwd(text, params)
    jax.block_until_ready(logits)
    assert logits.shape == (B, OUT)
    print("KERNEL_OK")
</pallas_src>

<mosaic_0001>
module attributes {stable_mosaic.version = 11 : i64} {
  func.func @kernel(%arg0: memref<16x16xf32, #tpu.memory_space<vmem>>, %arg1: memref<16x16xf32, #tpu.memory_space<vmem>>, %arg2: memref<16x16xf32, #tpu.memory_space<vmem>>, %arg3: memref<16x16xf32, #tpu.memory_space<vmem>>, %arg4: memref<16x32xf32, #tpu.memory_space<vmem>>, %arg5: memref<16x128xf32, #tpu.memory_space<vmem>>, %arg6: memref<16x128xf32, #tpu.memory_space<vmem>>, %arg7: memref<16x128xf32, #tpu.memory_space<vmem>>, %arg8: memref<16x128xf32, #tpu.memory_space<vmem>>, %arg9: memref<32x128xf32, #tpu.memory_space<vmem>>, %arg10: memref<16x64xf32, #tpu.memory_space<vmem>>, %arg11: memref<16x64xf32, #tpu.memory_space<vmem>>, %arg12: memref<1x128xf32, #tpu.memory_space<vmem>>, %arg13: memref<16x3xf32, #tpu.memory_space<vmem>>, %arg14: memref<16x3xf32, #tpu.memory_space<vmem>>, %arg15: memref<1x3xf32, #tpu.memory_space<vmem>>, %arg16: memref<2x3xf32, #tpu.memory_space<vmem>>, %arg17: memref<16x128xf32, #tpu.memory_space<vmem>>) attributes {dimension_semantics = [], scalar_prefetch = 0 : i64, scratch_operands = 1 : i64, tpu.core_type = #tpu.core_type<tc>} {
    %c0 = arith.constant 0 : index
    %c0_0 = arith.constant 0 : index
    %0 = vector.load %arg0[%c0, %c0_0] : memref<16x16xf32, #tpu.memory_space<vmem>>, vector<16x16xf32>
    %c0_1 = arith.constant 0 : index
    %c0_2 = arith.constant 0 : index
    %1 = vector.load %arg5[%c0_1, %c0_2] : memref<16x128xf32, #tpu.memory_space<vmem>>, vector<16x128xf32>
    %cst = arith.constant dense<0.000000e+00> : vector<16x128xf32>
    %2 = tpu.matmul %0, %1, %cst {dimension_numbers = #tpu.dot_dimension_numbers<[1], [0], [0], [1], [0, 0, 1, 1], [], []>} : vector<16x16xf32>, vector<16x128xf32>, vector<16x128xf32> -> vector<16x128xf32>
    %c0_3 = arith.constant 0 : index
    %c0_4 = arith.constant 0 : index
    %3 = vector.load %arg1[%c0_3, %c0_4] : memref<16x16xf32, #tpu.memory_space<vmem>>, vector<16x16xf32>
    %c0_5 = arith.constant 0 : index
    %c0_6 = arith.constant 0 : index
    %4 = vector.load %arg6[%c0_5, %c0_6] : memref<16x128xf32, #tpu.memory_space<vmem>>, vector<16x128xf32>
    %cst_7 = arith.constant dense<0.000000e+00> : vector<16x128xf32>
    %5 = tpu.matmul %3, %4, %cst_7 {dimension_numbers = #tpu.dot_dimension_numbers<[1], [0], [0], [1], [0, 0, 1, 1], [], []>} : vector<16x16xf32>, vector<16x128xf32>, vector<16x128xf32> -> vector<16x128xf32>
    %6 = arith.addf %2, %5 : vector<16x128xf32>
    %c0_8 = arith.constant 0 : index
    %c0_9 = arith.constant 0 : index
    %7 = vector.load %arg2[%c0_8, %c0_9] : memref<16x16xf32, #tpu.memory_space<vmem>>, vector<16x16xf32>
    %c0_10 = arith.constant 0 : index
    %c0_11 = arith.constant 0 : index
    %8 = vector.load %arg7[%c0_10, %c0_11] : memref<16x128xf32, #tpu.memory_space<vmem>>, vector<16x128xf32>
    %cst_12 = arith.constant dense<0.000000e+00> : vector<16x128xf32>
    %9 = tpu.matmul %7, %8, %cst_12 {dimension_numbers = #tpu.dot_dimension_numbers<[1], [0], [0], [1], [0, 0, 1, 1], [], []>} : vector<16x16xf32>, vector<16x128xf32>, vector<16x128xf32> -> vector<16x128xf32>
    %10 = arith.addf %6, %9 : vector<16x128xf32>
    %c0_13 = arith.constant 0 : index
    %c0_14 = arith.constant 0 : index
    %11 = vector.load %arg3[%c0_13, %c0_14] : memref<16x16xf32, #tpu.memory_space<vmem>>, vector<16x16xf32>
    %c0_15 = arith.constant 0 : index
    %c0_16 = arith.constant 0 : index
    %12 = vector.load %arg8[%c0_15, %c0_16] : memref<16x128xf32, #tpu.memory_space<vmem>>, vector<16x128xf32>
    %cst_17 = arith.constant dense<0.000000e+00> : vector<16x128xf32>
    %13 = tpu.matmul %11, %12, %cst_17 {dimension_numbers = #tpu.dot_dimension_numbers<[1], [0], [0], [1], [0, 0, 1, 1], [], []>} : vector<16x16xf32>, vector<16x128xf32>, vector<16x128xf32> -> vector<16x128xf32>
    %14 = arith.addf %10, %13 : vector<16x128xf32>
    %c0_18 = arith.constant 0 : index
    %c0_19 = arith.constant 0 : index
    %15 = vector.load %arg4[%c0_18, %c0_19] : memref<16x32xf32, #tpu.memory_space<vmem>>, vector<16x32xf32>
    %c0_20 = arith.constant 0 : index
    %c0_21 = arith.constant 0 : index
    %16 = vector.load %arg9[%c0_20, %c0_21] : memref<32x128xf32, #tpu.memory_space<vmem>>, vector<32x128xf32>
    %cst_22 = arith.constant dense<0.000000e+00> : vector<16x128xf32>
    %17 = tpu.matmul %15, %16, %cst_22 {dimension_numbers = #tpu.dot_dimension_numbers<[1], [0], [0], [1], [0, 0, 1, 1], [], []>} : vector<16x32xf32>, vector<32x128xf32>, vector<16x128xf32> -> vector<16x128xf32>
    %18 = arith.addf %14, %17 : vector<16x128xf32>
    %c0_23 = arith.constant 0 : index
    %c0_24 = arith.constant 0 : index
    %19 = vector.load %arg12[%c0_23, %c0_24] : memref<1x128xf32, #tpu.memory_space<vmem>>, vector<1x128xf32>
    %20 = vector.broadcast %19 : vector<1x128xf32> to vector<16x128xf32>
    %21 = arith.addf %18, %20 : vector<16x128xf32>
    %c0_25 = arith.constant 0 : index
    %c0_26 = arith.constant 0 : index
    %22 = vector.load %arg17[%c0_25, %c0_26] : memref<16x128xf32, #tpu.memory_space<vmem>>, vector<16x128xf32>
    tpu.vector_store %arg17[%c0_25, %c0_26], %21 {strides = array<i32>} : memref<16x128xf32, #tpu.memory_space<vmem>>, vector<16x128xf32>,
    %c0_27 = arith.constant 0 : index
    %c0_28 = arith.constant 0 : index
    %23 = vector.load %arg10[%c0_27, %c0_28] : memref<16x64xf32, #tpu.memory_space<vmem>>, vector<16x64xf32>
    %c0_29 = arith.constant 0 : index
    %c0_30 = arith.constant 0 : index
    %24 = vector.load %arg11[%c0_29, %c0_30] : memref<16x64xf32, #tpu.memory_space<vmem>>, vector<16x64xf32>
    %cst_31 = arith.constant 0.000000e+00 : f32
    %25 = vector.broadcast %cst_31 : f32 to vector<2x16xf32>
    %c0_i32 = arith.constant 0 : i32
    %c7_i32 = arith.constant 7 : i32
    %26 = arith.subi %c7_i32, %c0_i32 : i32
    %c2_i32 = arith.constant 2 : i32
    %27 = arith.muli %c0_i32, %c2_i32 : i32
    %28 = arith.index_cast %27 : i32 to index
    %c0_32 = arith.constant 0 : index
    %29 = vector.load %arg17[%28, %c0_32] : memref<16x128xf32, #tpu.memory_space<vmem>>, vector<2x64xf32>
    %c2_i32_33 = arith.constant 2 : i32
    %30 = arith.muli %26, %c2_i32_33 : i32
    %31 = arith.index_cast %30 : i32 to index
    %c64 = arith.constant 64 : index
    %32 = vector.load %arg17[%31, %c64] : memref<16x128xf32, #tpu.memory_space<vmem>>, vector<2x64xf32>
    %cst_34 = arith.constant dense<0.000000e+00> : vector<2x64xf32>
    %33 = tpu.matmul %25, %23, %cst_34 {dimension_numbers = #tpu.dot_dimension_numbers<[1], [0], [0], [1], [0, 0, 1, 1], [], []>} : vector<2x16xf32>, vector<16x64xf32>, vector<2x64xf32> -> vector<2x64xf32>
    %34 = arith.addf %29, %33 : vector<2x64xf32>
    %35 = vector.extract_strided_slice %34 {offsets = [0, 0], sizes = [2, 16], strides = [1, 1]} : vector<2x64xf32> to vector<2x16xf32>
    %36 = arith.negf %35 : vector<2x16xf32>
    %37 = math.exp %36 : vector<2x16xf32>
    %cst_35 = arith.constant 1.000000e+00 : f32
    %38 = vector.broadcast %cst_35 : f32 to vector<2x16xf32>
    %39 = arith.addf %38, %37 : vector<2x16xf32>
    %40 = arith.divf %38, %39 : vector<2x16xf32>
    %41 = vector.extract_strided_slice %34 {offsets = [0, 16], sizes = [2, 16], strides = [1, 1]} : vector<2x64xf32> to vector<2x16xf32>
    %42 = arith.negf %41 : vector<2x16xf32>
    %43 = math.exp %42 : vector<2x16xf32>
    %cst_36 = arith.constant 1.000000e+00 : f32
    %44 = vector.broadcast %cst_36 : f32 to vector<2x16xf32>
    %45 = arith.addf %44, %43 : vector<2x16xf32>
    %46 = arith.divf %44, %45 : vector<2x16xf32>
    %47 = vector.extract_strided_slice %34 {offsets = [0, 32], sizes = [2, 16], strides = [1, 1]} : vector<2x64xf32> to vector<2x16xf32>
    %48 = math.tanh %47 : vector<2x16xf32>
    %49 = vector.extract_strided_slice %34 {offsets = [0, 48], sizes = [2, 16], strides = [1, 1]} : vector<2x64xf32> to vector<2x16xf32>
    %50 = arith.negf %49 : vector<2x16xf32>
    %51 = math.exp %50 : vector<2x16xf32>
    %cst_37 = arith.constant 1.000000e+00 : f32
    %52 = vector.broadcast %cst_37 : f32 to vector<2x16xf32>
    %53 = arith.addf %52, %51 : vector<2x16xf32>
    %54 = arith.divf %52, %53 : vector<2x16xf32>
    %55 = arith.mulf %46, %25 : vector<2x16xf32>
    %56 = arith.mulf %40, %48 : vector<2x16xf32>
    %57 = arith.addf %55, %56 : vector<2x16xf32>
    %58 = math.tanh %57 : vector<2x16xf32>
    %59 = arith.mulf %54, %58 : vector<2x16xf32>
    %cst_38 = arith.constant dense<0.000000e+00> : vector<2x64xf32>
    %60 = tpu.matmul %25, %24, %cst_38 {dimension_numbers = #tpu.dot_dimension_numbers<[1], [0], [0], [1], [0, 0, 1, 1], [], []>} : vector<2x16xf32>, vector<16x64xf32>, vector<2x64xf32> -> vector<2x64xf32>
    %61 = arith.addf %32, %60 : vector<2x64xf32>
    %62 = vector.extract_strided_slice %61 {offsets = [0, 0], sizes = [2, 16], strides = [1, 1]} : vector<2x64xf32> to vector<2x16xf32>
    %63 = arith.negf %62 : vector<2x16xf32>
    %64 = math.exp %63 : vector<2x16xf32>
    %cst_39 = arith.constant 1.000000e+00 : f32
    %65 = vector.broadcast %cst_39 : f32 to vector<2x16xf32>
    %66 = arith.addf %65, %64 : vector<2x16xf32>
    %67 = arith.divf %65, %66 : vector<2x16xf32>
    %68 = vector.extract_strided_slice %61 {offsets = [0, 16], sizes = [2, 16], strides = [1, 1]} : vector<2x64xf32> to vector<2x16xf32>
    %69 = arith.negf %68 : vector<2x16xf32>
    %70 = math.exp %69 : vector<2x16xf32>
    %cst_40 = arith.constant 1.000000e+00 : f32
    %71 = vector.broadcast %cst_40 : f32 to vector<2x16xf32>
    %72 = arith.addf %71, %70 : vector<2x16xf32>
    %73 = arith.divf %71, %72 : vector<2x16xf32>
    %74 = vector.extract_strided_slice %61 {offsets = [0, 32], sizes = [2, 16], strides = [1, 1]} : vector<2x64xf32> to vector<2x16xf32>
    %75 = math.tanh %74 : vector<2x16xf32>
    %76 = vector.extract_strided_slice %61 {offsets = [0, 48], sizes = [2, 16], strides = [1, 1]} : vector<2x64xf32> to vector<2x16xf32>
    %77 = arith.negf %76 : vector<2x16xf32>
    %78 = math.exp %77 : vector<2x16xf32>
    %cst_41 = arith.constant 1.000000e+00 : f32
    %79 = vector.broadcast %cst_41 : f32 to vector<2x16xf32>
    %80 = arith.addf %79, %78 : vector<2x16xf32>
    %81 = arith.divf %79, %80 : vector<2x16xf32>
    %82 = arith.mulf %73, %25 : vector<2x16xf32>
    %83 = arith.mulf %67, %75 : vector<2x16xf32>
    %84 = arith.addf %82, %83 : vector<2x16xf32>
    %85 = math.tanh %84 : vector<2x16xf32>
    %86 = arith.mulf %81, %85 : vector<2x16xf32>
    %87 = arith.addf %25, %59 : vector<2x16xf32>
    %88 = arith.addf %25, %86 : vector<2x16xf32>
    %c1_i32 = arith.constant 1 : i32
    %c7_i32_42 = arith.constant 7 : i32
    %89 = arith.subi %c7_i32_42, %c1_i32 : i32
    %c2_i32_43 = arith.constant 2 : i32
    %90 = arith.muli %c1_i32, %c2_i32_43 : i32
    %91 = arith.index_cast %90 : i32 to index
    %c0_44 = arith.constant 0 : index
    %92 = vector.load %arg17[%91, %c0_44] : memref<16x128xf32, #tpu.memory_space<vmem>>, vector<2x64xf32>
    %c2_i32_45 = arith.constant 2 : i32
    %93 = arith.muli %89, %c2_i32_45 : i32
    %94 = arith.index_cast %93 : i32 to index
    %c64_46 = arith.constant 64 : index
    %95 = vector.load %arg17[%94, %c64_46] : memref<16x128xf32, #tpu.memory_space<vmem>>, vector<2x64xf32>
    %cst_47 = arith.constant dense<0.000000e+00> : vector<2x64xf32>
    %96 = tpu.matmul %59, %23, %cst_47 {dimension_numbers = #tpu.dot_dimension_numbers<[1], [0], [0], [1], [0, 0, 1, 1], [], []>} : vector<2x16xf32>, vector<16x64xf32>, vector<2x64xf32> -> vector<2x64xf32>
    %97 = arith.addf %92, %96 : vector<2x64xf32>
    %98 = vector.extract_strided_slice %97 {offsets = [0, 0], sizes = [2, 16], strides = [1, 1]} : vector<2x64xf32> to vector<2x16xf32>
    %99 = arith.negf %98 : vector<2x16xf32>
    %100 = math.exp %99 : vector<2x16xf32>
    %cst_48 = arith.constant 1.000000e+00 : f32
    %101 = vector.broadcast %cst_48 : f32 to vector<2x16xf32>
    %102 = arith.addf %101, %100 : vector<2x16xf32>
    %103 = arith.divf %101, %102 : vector<2x16xf32>
    %104 = vector.extract_strided_slice %97 {offsets = [0, 16], sizes = [2, 16], strides = [1, 1]} : vector<2x64xf32> to vector<2x16xf32>
    %105 = arith.negf %104 : vector<2x16xf32>
    %106 = math.exp %105 : vector<2x16xf32>
    %cst_49 = arith.constant 1.000000e+00 : f32
    %107 = vector.broadcast %cst_49 : f32 to vector<2x16xf32>
    %108 = arith.addf %107, %106 : vector<2x16xf32>
    %109 = arith.divf %107, %108 : vector<2x16xf32>
    %110 = vector.extract_strided_slice %97 {offsets = [0, 32], sizes = [2, 16], strides = [1, 1]} : vector<2x64xf32> to vector<2x16xf32>
    %111 = math.tanh %110 : vector<2x16xf32>
    %112 = vector.extract_strided_slice %97 {offsets = [0, 48], sizes = [2, 16], strides = [1, 1]} : vector<2x64xf32> to vector<2x16xf32>
    %113 = arith.negf %112 : vector<2x16xf32>
    %114 = math.exp %113 : vector<2x16xf32>
    %cst_50 = arith.constant 1.000000e+00 : f32
    %115 = vector.broadcast %cst_50 : f32 to vector<2x16xf32>
    %116 = arith.addf %115, %114 : vector<2x16xf32>
    %117 = arith.divf %115, %116 : vector<2x16xf32>
    %118 = arith.mulf %109, %57 : vector<2x16xf32>
    %119 = arith.mulf %103, %111 : vector<2x16xf32>
    %120 = arith.addf %118, %119 : vector<2x16xf32>
    %121 = math.tanh %120 : vector<2x16xf32>
    %122 = arith.mulf %117, %121 : vector<2x16xf32>
    %cst_51 = arith.constant dense<0.000000e+00> : vector<2x64xf32>
    %123 = tpu.matmul %86, %24, %cst_51 {dimension_numbers = #tpu.dot_dimension_numbers<[1], [0], [0], [1], [0, 0, 1, 1], [], []>} : vector<2x16xf32>, vector<16x64xf32>, vector<2x64xf32> -> vector<2x64xf32>
    %124 = arith.addf %95, %123 : vector<2x64xf32>
    %125 = vector.extract_strided_slice %124 {offsets = [0, 0], sizes = [2, 16], strides = [1, 1]} : vector<2x64xf32> to vector<2x16xf32>
    %126 = arith.negf %125 : vector<2x16xf32>
    %127 = math.exp %126 : vector<2x16xf32>
    %cst_52 = arith.constant 1.000000e+00 : f32
    %128 = vector.broadcast %cst_52 : f32 to vector<2x16xf32>
    %129 = arith.addf %128, %127 : vector<2x16xf32>
    %130 = arith.divf %128, %129 : vector<2x16xf32>
    %131 = vector.extract_strided_slice %124 {offsets = [0, 16], sizes = [2, 16], strides = [1, 1]} : vector<2x64xf32> to vector<2x16xf32>
    %132 = arith.negf %131 : vector<2x16xf32>
    %133 = math.exp %132 : vector<2x16xf32>
    %cst_53 = arith.constant 1.000000e+00 : f32
    %134 = vector.broadcast %cst_53 : f32 to vector<2x16xf32>
    %135 = arith.addf %134, %133 : vector<2x16xf32>
    %136 = arith.divf %134, %135 : vector<2x16xf32>
    %137 = vector.extract_strided_slice %124 {offsets = [0, 32], sizes = [2, 16], strides = [1, 1]} : vector<2x64xf32> to vector<2x16xf32>
    %138 = math.tanh %137 : vector<2x16xf32>
    %139 = vector.extract_strided_slice %124 {offsets = [0, 48], sizes = [2, 16], strides = [1, 1]} : vector<2x64xf32> to vector<2x16xf32>
    %140 = arith.negf %139 : vector<2x16xf32>
    %141 = math.exp %140 : vector<2x16xf32>
    %cst_54 = arith.constant 1.000000e+00 : f32
    %142 = vector.broadcast %cst_54 : f32 to vector<2x16xf32>
    %143 = arith.addf %142, %141 : vector<2x16xf32>
    %144 = arith.divf %142, %143 : vector<2x16xf32>
    %145 = arith.mulf %136, %84 : vector<2x16xf32>
    %146 = arith.mulf %130, %138 : vector<2x16xf32>
    %147 = arith.addf %145, %146 : vector<2x16xf32>
    %148 = math.tanh %147 : vector<2x16xf32>
    %149 = arith.mulf %144, %148 : vector<2x16xf32>
    %150 = arith.addf %87, %122 : vector<2x16xf32>
    %151 = arith.addf %88, %149 : vector<2x16xf32>
    %c2_i32_55 = arith.constant 2 : i32
    %c7_i32_56 = arith.constant 7 : i32
    %152 = arith.subi %c7_i32_56, %c2_i32_55 : i32
    %c2_i32_57 = arith.constant 2 : i32
    %153 = arith.muli %c2_i32_55, %c2_i32_57 : i32
    %154 = arith.index_cast %153 : i32 to index
    %c0_58 = arith.constant 0 : index
    %155 = vector.load %arg17[%154, %c0_58] : memref<16x128xf32, #tpu.memory_space<vmem>>, vector<2x64xf32>
    %c2_i32_59 = arith.constant 2 : i32
    %156 = arith.muli %152, %c2_i32_59 : i32
    %157 = arith.index_cast %156 : i32 to index
    %c64_60 = arith.constant 64 : index
    %158 = vector.load %arg17[%157, %c64_60] : memref<16x128xf32, #tpu.memory_space<vmem>>, vector<2x64xf32>
    %cst_61 = arith.constant dense<0.000000e+00> : vector<2x64xf32>
    %159 = tpu.matmul %122, %23, %cst_61 {dimension_numbers = #tpu.dot_dimension_numbers<[1], [0], [0], [1], [0, 0, 1, 1], [], []>} : vector<2x16xf32>, vector<16x64xf32>, vector<2x64xf32> -> vector<2x64xf32>
    %160 = arith.addf %155, %159 : vector<2x64xf32>
    %161 = vector.extract_strided_slice %160 {offsets = [0, 0], sizes = [2, 16], strides = [1, 1]} : vector<2x64xf32> to vector<2x16xf32>
    %162 = arith.negf %161 : vector<2x16xf32>
    %163 = math.exp %162 : vector<2x16xf32>
    %cst_62 = arith.constant 1.000000e+00 : f32
    %164 = vector.broadcast %cst_62 : f32 to vector<2x16xf32>
    %165 = arith.addf %164, %163 : vector<2x16xf32>
    %166 = arith.divf %164, %165 : vector<2x16xf32>
    %167 = vector.extract_strided_slice %160 {offsets = [0, 16], sizes = [2, 16], strides = [1, 1]} : vector<2x64xf32> to vector<2x16xf32>
    %168 = arith.negf %167 : vector<2x16xf32>
    %169 = math.exp %168 : vector<2x16xf32>
    %cst_63 = arith.constant 1.000000e+00 : f32
    %170 = vector.broadcast %cst_63 : f32 to vector<2x16xf32>
    %171 = arith.addf %170, %169 : vector<2x16xf32>
    %172 = arith.divf %170, %171 : vector<2x16xf32>
    %173 = vector.extract_strided_slice %160 {offsets = [0, 32], sizes = [2, 16], strides = [1, 1]} : vector<2x64xf32> to vector<2x16xf32>
    %174 = math.tanh %173 : vector<2x16xf32>
    %175 = vector.extract_strided_slice %160 {offsets = [0, 48], sizes = [2, 16], strides = [1, 1]} : vector<2x64xf32> to vector<2x16xf32>
    %176 = arith.negf %175 : vector<2x16xf32>
    %177 = math.exp %176 : vector<2x16xf32>
    %cst_64 = arith.constant 1.000000e+00 : f32
    %178 = vector.broadcast %cst_64 : f32 to vector<2x16xf32>
    %179 = arith.addf %178, %177 : vector<2x16xf32>
    %180 = arith.divf %178, %179 : vector<2x16xf32>
    %181 = arith.mulf %172, %120 : vector<2x16xf32>
    %182 = arith.mulf %166, %174 : vector<2x16xf32>
    %183 = arith.addf %181, %182 : vector<2x16xf32>
    %184 = math.tanh %183 : vector<2x16xf32>
    %185 = arith.mulf %180, %184 : vector<2x16xf32>
    %cst_65 = arith.constant dense<0.000000e+00> : vector<2x64xf32>
    %186 = tpu.matmul %149, %24, %cst_65 {dimension_numbers = #tpu.dot_dimension_numbers<[1], [0], [0], [1], [0, 0, 1, 1], [], []>} : vector<2x16xf32>, vector<16x64xf32>, vector<2x64xf32> -> vector<2x64xf32>
    %187 = arith.addf %158, %186 : vector<2x64xf32>
    %188 = vector.extract_strided_slice %187 {offsets = [0, 0], sizes = [2, 16], strides = [1, 1]} : vector<2x64xf32> to vector<2x16xf32>
    %189 = arith.negf %188 : vector<2x16xf32>
    %190 = math.exp %189 : vector<2x16xf32>
    %cst_66 = arith.constant 1.000000e+00 : f32
    %191 = vector.broadcast %cst_66 : f32 to vector<2x16xf32>
    %192 = arith.addf %191, %190 : vector<2x16xf32>
    %193 = arith.divf %191, %192 : vector<2x16xf32>
    %194 = vector.extract_strided_slice %187 {offsets = [0, 16], sizes = [2, 16], strides = [1, 1]} : vector<2x64xf32> to vector<2x16xf32>
    %195 = arith.negf %194 : vector<2x16xf32>
    %196 = math.exp %195 : vector<2x16xf32>
    %cst_67 = arith.constant 1.000000e+00 : f32
    %197 = vector.broadcast %cst_67 : f32 to vector<2x16xf32>
    %198 = arith.addf %197, %196 : vector<2x16xf32>
    %199 = arith.divf %197, %198 : vector<2x16xf32>
    %200 = vector.extract_strided_slice %187 {offsets = [0, 32], sizes = [2, 16], strides = [1, 1]} : vector<2x64xf32> to vector<2x16xf32>
    %201 = math.tanh %200 : vector<2x16xf32>
    %202 = vector.extract_strided_slice %187 {offsets = [0, 48], sizes = [2, 16], strides = [1, 1]} : vector<2x64xf32> to vector<2x16xf32>
    %203 = arith.negf %202 : vector<2x16xf32>
    %204 = math.exp %203 : vector<2x16xf32>
    %cst_68 = arith.constant 1.000000e+00 : f32
    %205 = vector.broadcast %cst_68 : f32 to vector<2x16xf32>
    %206 = arith.addf %205, %204 : vector<2x16xf32>
    %207 = arith.divf %205, %206 : vector<2x16xf32>
    %208 = arith.mulf %199, %147 : vector<2x16xf32>
    %209 = arith.mulf %193, %201 : vector<2x16xf32>
    %210 = arith.addf %208, %209 : vector<2x16xf32>
    %211 = math.tanh %210 : vector<2x16xf32>
    %212 = arith.mulf %207, %211 : vector<2x16xf32>
    %213 = arith.addf %150, %185 : vector<2x16xf32>
    %214 = arith.addf %151, %212 : vector<2x16xf32>
    %c3_i32 = arith.constant 3 : i32
    %c7_i32_69 = arith.constant 7 : i32
    %215 = arith.subi %c7_i32_69, %c3_i32 : i32
    %c2_i32_70 = arith.constant 2 : i32
    %216 = arith.muli %c3_i32, %c2_i32_70 : i32
    %217 = arith.index_cast %216 : i32 to index
    %c0_71 = arith.constant 0 : index
    %218 = vector.load %arg17[%217, %c0_71] : memref<16x128xf32, #tpu.memory_space<vmem>>, vector<2x64xf32>
    %c2_i32_72 = arith.constant 2 : i32
    %219 = arith.muli %215, %c2_i32_72 : i32
    %220 = arith.index_cast %219 : i32 to index
    %c64_73 = arith.constant 64 : index
    %221 = vector.load %arg17[%220, %c64_73] : memref<16x128xf32, #tpu.memory_space<vmem>>, vector<2x64xf32>
    %cst_74 = arith.constant dense<0.000000e+00> : vector<2x64xf32>
    %222 = tpu.matmul %185, %23, %cst_74 {dimension_numbers = #tpu.dot_dimension_numbers<[1], [0], [0], [1], [0, 0, 1, 1], [], []>} : vector<2x16xf32>, vector<16x64xf32>, vector<2x64xf32> -> vector<2x64xf32>
    %223 = arith.addf %218, %222 : vector<2x64xf32>
    %224 = vector.extract_strided_slice %223 {offsets = [0, 0], sizes = [2, 16], strides = [1, 1]} : vector<2x64xf32> to vector<2x16xf32>
    %225 = arith.negf %224 : vector<2x16xf32>
    %226 = math.exp %225 : vector<2x16xf32>
    %cst_75 = arith.constant 1.000000e+00 : f32
    %227 = vector.broadcast %cst_75 : f32 to vector<2x16xf32>
    %228 = arith.addf %227, %226 : vector<2x16xf32>
    %229 = arith.divf %227, %228 : vector<2x16xf32>
    %230 = vector.extract_strided_slice %223 {offsets = [0, 16], sizes = [2, 16], strides = [1, 1]} : vector<2x64xf32> to vector<2x16xf32>
    %231 = arith.negf %230 : vector<2x16xf32>
    %232 = math.exp %231 : vector<2x16xf32>
    %cst_76 = arith.constant 1.000000e+00 : f32
    %233 = vector.broadcast %cst_76 : f32 to vector<2x16xf32>
    %234 = arith.addf %233, %232 : vector<2x16xf32>
    %235 = arith.divf %233, %234 : vector<2x16xf32>
    %236 = vector.extract_strided_slice %223 {offsets = [0, 32], sizes = [2, 16], strides = [1, 1]} : vector<2x64xf32> to vector<2x16xf32>
    %237 = math.tanh %236 : vector<2x16xf32>
    %238 = vector.extract_strided_slice %223 {offsets = [0, 48], sizes = [2, 16], strides = [1, 1]} : vector<2x64xf32> to vector<2x16xf32>
    %239 = arith.negf %238 : vector<2x16xf32>
    %240 = math.exp %239 : vector<2x16xf32>
    %cst_77 = arith.constant 1.000000e+00 : f32
    %241 = vector.broadcast %cst_77 : f32 to vector<2x16xf32>
    %242 = arith.addf %241, %240 : vector<2x16xf32>
    %243 = arith.divf %241, %242 : vector<2x16xf32>
    %244 = arith.mulf %235, %183 : vector<2x16xf32>
    %245 = arith.mulf %229, %237 : vector<2x16xf32>
    %246 = arith.addf %244, %245 : vector<2x16xf32>
    %247 = math.tanh %246 : vector<2x16xf32>
    %248 = arith.mulf %243, %247 : vector<2x16xf32>
    %cst_78 = arith.constant dense<0.000000e+00> : vector<2x64xf32>
    %249 = tpu.matmul %212, %24, %cst_78 {dimension_numbers = #tpu.dot_dimension_numbers<[1], [0], [0], [1], [0, 0, 1, 1], [], []>} : vector<2x16xf32>, vector<16x64xf32>, vector<2x64xf32> -> vector<2x64xf32>
    %250 = arith.addf %221, %249 : vector<2x64xf32>
    %251 = vector.extract_strided_slice %250 {offsets = [0, 0], sizes = [2, 16], strides = [1, 1]} : vector<2x64xf32> to vector<2x16xf32>
    %252 = arith.negf %251 : vector<2x16xf32>
    %253 = math.exp %252 : vector<2x16xf32>
    %cst_79 = arith.constant 1.000000e+00 : f32
    %254 = vector.broadcast %cst_79 : f32 to vector<2x16xf32>
    %255 = arith.addf %254, %253 : vector<2x16xf32>
    %256 = arith.divf %254, %255 : vector<2x16xf32>
    %257 = vector.extract_strided_slice %250 {offsets = [0, 16], sizes = [2, 16], strides = [1, 1]} : vector<2x64xf32> to vector<2x16xf32>
    %258 = arith.negf %257 : vector<2x16xf32>
    %259 = math.exp %258 : vector<2x16xf32>
    %cst_80 = arith.constant 1.000000e+00 : f32
    %260 = vector.broadcast %cst_80 : f32 to vector<2x16xf32>
    %261 = arith.addf %260, %259 : vector<2x16xf32>
    %262 = arith.divf %260, %261 : vector<2x16xf32>
    %263 = vector.extract_strided_slice %250 {offsets = [0, 32], sizes = [2, 16], strides = [1, 1]} : vector<2x64xf32> to vector<2x16xf32>
    %264 = math.tanh %263 : vector<2x16xf32>
    %265 = vector.extract_strided_slice %250 {offsets = [0, 48], sizes = [2, 16], strides = [1, 1]} : vector<2x64xf32> to vector<2x16xf32>
    %266 = arith.negf %265 : vector<2x16xf32>
    %267 = math.exp %266 : vector<2x16xf32>
    %cst_81 = arith.constant 1.000000e+00 : f32
    %268 = vector.broadcast %cst_81 : f32 to vector<2x16xf32>
    %269 = arith.addf %268, %267 : vector<2x16xf32>
    %270 = arith.divf %268, %269 : vector<2x16xf32>
    %271 = arith.mulf %262, %210 : vector<2x16xf32>
    %272 = arith.mulf %256, %264 : vector<2x16xf32>
    %273 = arith.addf %271, %272 : vector<2x16xf32>
    %274 = math.tanh %273 : vector<2x16xf32>
    %275 = arith.mulf %270, %274 : vector<2x16xf32>
    %276 = arith.addf %213, %248 : vector<2x16xf32>
    %277 = arith.addf %214, %275 : vector<2x16xf32>
    %c4_i32 = arith.constant 4 : i32
    %c7_i32_82 = arith.constant 7 : i32
    %278 = arith.subi %c7_i32_82, %c4_i32 : i32
    %c2_i32_83 = arith.constant 2 : i32
    %279 = arith.muli %c4_i32, %c2_i32_83 : i32
    %280 = arith.index_cast %279 : i32 to index
    %c0_84 = arith.constant 0 : index
    %281 = vector.load %arg17[%280, %c0_84] : memref<16x128xf32, #tpu.memory_space<vmem>>, vector<2x64xf32>
    %c2_i32_85 = arith.constant 2 : i32
    %282 = arith.muli %278, %c2_i32_85 : i32
    %283 = arith.index_cast %282 : i32 to index
    %c64_86 = arith.constant 64 : index
    %284 = vector.load %arg17[%283, %c64_86] : memref<16x128xf32, #tpu.memory_space<vmem>>, vector<2x64xf32>
    %cst_87 = arith.constant dense<0.000000e+00> : vector<2x64xf32>
    %285 = tpu.matmul %248, %23, %cst_87 {dimension_numbers = #tpu.dot_dimension_numbers<[1], [0], [0], [1], [0, 0, 1, 1], [], []>} : vector<2x16xf32>, vector<16x64xf32>, vector<2x64xf32> -> vector<2x64xf32>
    %286 = arith.addf %281, %285 : vector<2x64xf32>
    %287 = vector.extract_strided_slice %286 {offsets = [0, 0], sizes = [2, 16], strides = [1, 1]} : vector<2x64xf32> to vector<2x16xf32>
    %288 = arith.negf %287 : vector<2x16xf32>
    %289 = math.exp %288 : vector<2x16xf32>
    %cst_88 = arith.constant 1.000000e+00 : f32
    %290 = vector.broadcast %cst_88 : f32 to vector<2x16xf32>
    %291 = arith.addf %290, %289 : vector<2x16xf32>
    %292 = arith.divf %290, %291 : vector<2x16xf32>
    %293 = vector.extract_strided_slice %286 {offsets = [0, 16], sizes = [2, 16], strides = [1, 1]} : vector<2x64xf32> to vector<2x16xf32>
    %294 = arith.negf %293 : vector<2x16xf32>
    %295 = math.exp %294 : vector<2x16xf32>
    %cst_89 = arith.constant 1.000000e+00 : f32
    %296 = vector.broadcast %cst_89 : f32 to vector<2x16xf32>
    %297 = arith.addf %296, %295 : vector<2x16xf32>
    %298 = arith.divf %296, %297 : vector<2x16xf32>
    %299 = vector.extract_strided_slice %286 {offsets = [0, 32], sizes = [2, 16], strides = [1, 1]} : vector<2x64xf32> to vector<2x16xf32>
    %300 = math.tanh %299 : vector<2x16xf32>
    %301 = vector.extract_strided_slice %286 {offsets = [0, 48], sizes = [2, 16], strides = [1, 1]} : vector<2x64xf32> to vector<2x16xf32>
    %302 = arith.negf %301 : vector<2x16xf32>
    %303 = math.exp %302 : vector<2x16xf32>
    %cst_90 = arith.constant 1.000000e+00 : f32
    %304 = vector.broadcast %cst_90 : f32 to vector<2x16xf32>
    %305 = arith.addf %304, %303 : vector<2x16xf32>
    %306 = arith.divf %304, %305 : vector<2x16xf32>
    %307 = arith.mulf %298, %246 : vector<2x16xf32>
    %308 = arith.mulf %292, %300 : vector<2x16xf32>
    %309 = arith.addf %307, %308 : vector<2x16xf32>
    %310 = math.tanh %309 : vector<2x16xf32>
    %311 = arith.mulf %306, %310 : vector<2x16xf32>
    %cst_91 = arith.constant dense<0.000000e+00> : vector<2x64xf32>
    %312 = tpu.matmul %275, %24, %cst_91 {dimension_numbers = #tpu.dot_dimension_numbers<[1], [0], [0], [1], [0, 0, 1, 1], [], []>} : vector<2x16xf32>, vector<16x64xf32>, vector<2x64xf32> -> vector<2x64xf32>
    %313 = arith.addf %284, %312 : vector<2x64xf32>
    %314 = vector.extract_strided_slice %313 {offsets = [0, 0], sizes = [2, 16], strides = [1, 1]} : vector<2x64xf32> to vector<2x16xf32>
    %315 = arith.negf %314 : vector<2x16xf32>
    %316 = math.exp %315 : vector<2x16xf32>
    %cst_92 = arith.constant 1.000000e+00 : f32
    %317 = vector.broadcast %cst_92 : f32 to vector<2x16xf32>
    %318 = arith.addf %317, %316 : vector<2x16xf32>
    %319 = arith.divf %317, %318 : vector<2x16xf32>
    %320 = vector.extract_strided_slice %313 {offsets = [0, 16], sizes = [2, 16], strides = [1, 1]} : vector<2x64xf32> to vector<2x16xf32>
    %321 = arith.negf %320 : vector<2x16xf32>
    %322 = math.exp %321 : vector<2x16xf32>
    %cst_93 = arith.constant 1.000000e+00 : f32
    %323 = vector.broadcast %cst_93 : f32 to vector<2x16xf32>
    %324 = arith.addf %323, %322 : vector<2x16xf32>
    %325 = arith.divf %323, %324 : vector<2x16xf32>
    %326 = vector.extract_strided_slice %313 {offsets = [0, 32], sizes = [2, 16], strides = [1, 1]} : vector<2x64xf32> to vector<2x16xf32>
    %327 = math.tanh %326 : vector<2x16xf32>
    %328 = vector.extract_strided_slice %313 {offsets = [0, 48], sizes = [2, 16], strides = [1, 1]} : vector<2x64xf32> to vector<2x16xf32>
    %329 = arith.negf %328 : vector<2x16xf32>
    %330 = math.exp %329 : vector<2x16xf32>
    %cst_94 = arith.constant 1.000000e+00 : f32
    %331 = vector.broadcast %cst_94 : f32 to vector<2x16xf32>
    %332 = arith.addf %331, %330 : vector<2x16xf32>
    %333 = arith.divf %331, %332 : vector<2x16xf32>
    %334 = arith.mulf %325, %273 : vector<2x16xf32>
    %335 = arith.mulf %319, %327 : vector<2x16xf32>
    %336 = arith.addf %334, %335 : vector<2x16xf32>
    %337 = math.tanh %336 : vector<2x16xf32>
    %338 = arith.mulf %333, %337 : vector<2x16xf32>
    %339 = arith.addf %276, %311 : vector<2x16xf32>
    %340 = arith.addf %277, %338 : vector<2x16xf32>
    %c5_i32 = arith.constant 5 : i32
    %c7_i32_95 = arith.constant 7 : i32
    %341 = arith.subi %c7_i32_95, %c5_i32 : i32
    %c2_i32_96 = arith.constant 2 : i32
    %342 = arith.muli %c5_i32, %c2_i32_96 : i32
    %343 = arith.index_cast %342 : i32 to index
    %c0_97 = arith.constant 0 : index
    %344 = vector.load %arg17[%343, %c0_97] : memref<16x128xf32, #tpu.memory_space<vmem>>, vector<2x64xf32>
    %c2_i32_98 = arith.constant 2 : i32
    %345 = arith.muli %341, %c2_i32_98 : i32
    %346 = arith.index_cast %345 : i32 to index
    %c64_99 = arith.constant 64 : index
    %347 = vector.load %arg17[%346, %c64_99] : memref<16x128xf32, #tpu.memory_space<vmem>>, vector<2x64xf32>
    %cst_100 = arith.constant dense<0.000000e+00> : vector<2x64xf32>
    %348 = tpu.matmul %311, %23, %cst_100 {dimension_numbers = #tpu.dot_dimension_numbers<[1], [0], [0], [1], [0, 0, 1, 1], [], []>} : vector<2x16xf32>, vector<16x64xf32>, vector<2x64xf32> -> vector<2x64xf32>
    %349 = arith.addf %344, %348 : vector<2x64xf32>
    %350 = vector.extract_strided_slice %349 {offsets = [0, 0], sizes = [2, 16], strides = [1, 1]} : vector<2x64xf32> to vector<2x16xf32>
    %351 = arith.negf %350 : vector<2x16xf32>
    %352 = math.exp %351 : vector<2x16xf32>
    %cst_101 = arith.constant 1.000000e+00 : f32
    %353 = vector.broadcast %cst_101 : f32 to vector<2x16xf32>
    %354 = arith.addf %353, %352 : vector<2x16xf32>
    %355 = arith.divf %353, %354 : vector<2x16xf32>
    %356 = vector.extract_strided_slice %349 {offsets = [0, 16], sizes = [2, 16], strides = [1, 1]} : vector<2x64xf32> to vector<2x16xf32>
    %357 = arith.negf %356 : vector<2x16xf32>
    %358 = math.exp %357 : vector<2x16xf32>
    %cst_102 = arith.constant 1.000000e+00 : f32
    %359 = vector.broadcast %cst_102 : f32 to vector<2x16xf32>
    %360 = arith.addf %359, %358 : vector<2x16xf32>
    %361 = arith.divf %359, %360 : vector<2x16xf32>
    %362 = vector.extract_strided_slice %349 {offsets = [0, 32], sizes = [2, 16], strides = [1, 1]} : vector<2x64xf32> to vector<2x16xf32>
    %363 = math.tanh %362 : vector<2x16xf32>
    %364 = vector.extract_strided_slice %349 {offsets = [0, 48], sizes = [2, 16], strides = [1, 1]} : vector<2x64xf32> to vector<2x16xf32>
    %365 = arith.negf %364 : vector<2x16xf32>
    %366 = math.exp %365 : vector<2x16xf32>
    %cst_103 = arith.constant 1.000000e+00 : f32
    %367 = vector.broadcast %cst_103 : f32 to vector<2x16xf32>
    %368 = arith.addf %367, %366 : vector<2x16xf32>
    %369 = arith.divf %367, %368 : vector<2x16xf32>
    %370 = arith.mulf %361, %309 : vector<2x16xf32>
    %371 = arith.mulf %355, %363 : vector<2x16xf32>
    %372 = arith.addf %370, %371 : vector<2x16xf32>
    %373 = math.tanh %372 : vector<2x16xf32>
    %374 = arith.mulf %369, %373 : vector<2x16xf32>
    %cst_104 = arith.constant dense<0.000000e+00> : vector<2x64xf32>
    %375 = tpu.matmul %338, %24, %cst_104 {dimension_numbers = #tpu.dot_dimension_numbers<[1], [0], [0], [1], [0, 0, 1, 1], [], []>} : vector<2x16xf32>, vector<16x64xf32>, vector<2x64xf32> -> vector<2x64xf32>
    %376 = arith.addf %347, %375 : vector<2x64xf32>
    %377 = vector.extract_strided_slice %376 {offsets = [0, 0], sizes = [2, 16], strides = [1, 1]} : vector<2x64xf32> to vector<2x16xf32>
    %378 = arith.negf %377 : vector<2x16xf32>
    %379 = math.exp %378 : vector<2x16xf32>
    %cst_105 = arith.constant 1.000000e+00 : f32
    %380 = vector.broadcast %cst_105 : f32 to vector<2x16xf32>
    %381 = arith.addf %380, %379 : vector<2x16xf32>
    %382 = arith.divf %380, %381 : vector<2x16xf32>
    %383 = vector.extract_strided_slice %376 {offsets = [0, 16], sizes = [2, 16], strides = [1, 1]} : vector<2x64xf32> to vector<2x16xf32>
    %384 = arith.negf %383 : vector<2x16xf32>
    %385 = math.exp %384 : vector<2x16xf32>
    %cst_106 = arith.constant 1.000000e+00 : f32
    %386 = vector.broadcast %cst_106 : f32 to vector<2x16xf32>
    %387 = arith.addf %386, %385 : vector<2x16xf32>
    %388 = arith.divf %386, %387 : vector<2x16xf32>
    %389 = vector.extract_strided_slice %376 {offsets = [0, 32], sizes = [2, 16], strides = [1, 1]} : vector<2x64xf32> to vector<2x16xf32>
    %390 = math.tanh %389 : vector<2x16xf32>
    %391 = vector.extract_strided_slice %376 {offsets = [0, 48], sizes = [2, 16], strides = [1, 1]} : vector<2x64xf32> to vector<2x16xf32>
    %392 = arith.negf %391 : vector<2x16xf32>
    %393 = math.exp %392 : vector<2x16xf32>
    %cst_107 = arith.constant 1.000000e+00 : f32
    %394 = vector.broadcast %cst_107 : f32 to vector<2x16xf32>
    %395 = arith.addf %394, %393 : vector<2x16xf32>
    %396 = arith.divf %394, %395 : vector<2x16xf32>
    %397 = arith.mulf %388, %336 : vector<2x16xf32>
    %398 = arith.mulf %382, %390 : vector<2x16xf32>
    %399 = arith.addf %397, %398 : vector<2x16xf32>
    %400 = math.tanh %399 : vector<2x16xf32>
    %401 = arith.mulf %396, %400 : vector<2x16xf32>
    %402 = arith.addf %339, %374 : vector<2x16xf32>
    %403 = arith.addf %340, %401 : vector<2x16xf32>
    %c6_i32 = arith.constant 6 : i32
    %c7_i32_108 = arith.constant 7 : i32
    %404 = arith.subi %c7_i32_108, %c6_i32 : i32
    %c2_i32_109 = arith.constant 2 : i32
    %405 = arith.muli %c6_i32, %c2_i32_109 : i32
    %406 = arith.index_cast %405 : i32 to index
    %c0_110 = arith.constant 0 : index
    %407 = vector.load %arg17[%406, %c0_110] : memref<16x128xf32, #tpu.memory_space<vmem>>, vector<2x64xf32>
    %c2_i32_111 = arith.constant 2 : i32
    %408 = arith.muli %404, %c2_i32_111 : i32
    %409 = arith.index_cast %408 : i32 to index
    %c64_112 = arith.constant 64 : index
    %410 = vector.load %arg17[%409, %c64_112] : memref<16x128xf32, #tpu.memory_space<vmem>>, vector<2x64xf32>
    %cst_113 = arith.constant dense<0.000000e+00> : vector<2x64xf32>
    %411 = tpu.matmul %374, %23, %cst_113 {dimension_numbers = #tpu.dot_dimension_numbers<[1], [0], [0], [1], [0, 0, 1, 1], [], []>} : vector<2x16xf32>, vector<16x64xf32>, vector<2x64xf32> -> vector<2x64xf32>
    %412 = arith.addf %407, %411 : vector<2x64xf32>
    %413 = vector.extract_strided_slice %412 {offsets = [0, 0], sizes = [2, 16], strides = [1, 1]} : vector<2x64xf32> to vector<2x16xf32>
    %414 = arith.negf %413 : vector<2x16xf32>
    %415 = math.exp %414 : vector<2x16xf32>
    %cst_114 = arith.constant 1.000000e+00 : f32
    %416 = vector.broadcast %cst_114 : f32 to vector<2x16xf32>
    %417 = arith.addf %416, %415 : vector<2x16xf32>
    %418 = arith.divf %416, %417 : vector<2x16xf32>
    %419 = vector.extract_strided_slice %412 {offsets = [0, 16], sizes = [2, 16], strides = [1, 1]} : vector<2x64xf32> to vector<2x16xf32>
    %420 = arith.negf %419 : vector<2x16xf32>
    %421 = math.exp %420 : vector<2x16xf32>
    %cst_115 = arith.constant 1.000000e+00 : f32
    %422 = vector.broadcast %cst_115 : f32 to vector<2x16xf32>
    %423 = arith.addf %422, %421 : vector<2x16xf32>
    %424 = arith.divf %422, %423 : vector<2x16xf32>
    %425 = vector.extract_strided_slice %412 {offsets = [0, 32], sizes = [2, 16], strides = [1, 1]} : vector<2x64xf32> to vector<2x16xf32>
    %426 = math.tanh %425 : vector<2x16xf32>
    %427 = vector.extract_strided_slice %412 {offsets = [0, 48], sizes = [2, 16], strides = [1, 1]} : vector<2x64xf32> to vector<2x16xf32>
    %428 = arith.negf %427 : vector<2x16xf32>
    %429 = math.exp %428 : vector<2x16xf32>
    %cst_116 = arith.constant 1.000000e+00 : f32
    %430 = vector.broadcast %cst_116 : f32 to vector<2x16xf32>
    %431 = arith.addf %430, %429 : vector<2x16xf32>
    %432 = arith.divf %430, %431 : vector<2x16xf32>
    %433 = arith.mulf %424, %372 : vector<2x16xf32>
    %434 = arith.mulf %418, %426 : vector<2x16xf32>
    %435 = arith.addf %433, %434 : vector<2x16xf32>
    %436 = math.tanh %435 : vector<2x16xf32>
    %437 = arith.mulf %432, %436 : vector<2x16xf32>
    %cst_117 = arith.constant dense<0.000000e+00> : vector<2x64xf32>
    %438 = tpu.matmul %401, %24, %cst_117 {dimension_numbers = #tpu.dot_dimension_numbers<[1], [0], [0], [1], [0, 0, 1, 1], [], []>} : vector<2x16xf32>, vector<16x64xf32>, vector<2x64xf32> -> vector<2x64xf32>
    %439 = arith.addf %410, %438 : vector<2x64xf32>
    %440 = vector.extract_strided_slice %439 {offsets = [0, 0], sizes = [2, 16], strides = [1, 1]} : vector<2x64xf32> to vector<2x16xf32>
    %441 = arith.negf %440 : vector<2x16xf32>
    %442 = math.exp %441 : vector<2x16xf32>
    %cst_118 = arith.constant 1.000000e+00 : f32
    %443 = vector.broadcast %cst_118 : f32 to vector<2x16xf32>
    %444 = arith.addf %443, %442 : vector<2x16xf32>
    %445 = arith.divf %443, %444 : vector<2x16xf32>
    %446 = vector.extract_strided_slice %439 {offsets = [0, 16], sizes = [2, 16], strides = [1, 1]} : vector<2x64xf32> to vector<2x16xf32>
    %447 = arith.negf %446 : vector<2x16xf32>
    %448 = math.exp %447 : vector<2x16xf32>
    %cst_119 = arith.constant 1.000000e+00 : f32
    %449 = vector.broadcast %cst_119 : f32 to vector<2x16xf32>
    %450 = arith.addf %449, %448 : vector<2x16xf32>
    %451 = arith.divf %449, %450 : vector<2x16xf32>
    %452 = vector.extract_strided_slice %439 {offsets = [0, 32], sizes = [2, 16], strides = [1, 1]} : vector<2x64xf32> to vector<2x16xf32>
    %453 = math.tanh %452 : vector<2x16xf32>
    %454 = vector.extract_strided_slice %439 {offsets = [0, 48], sizes = [2, 16], strides = [1, 1]} : vector<2x64xf32> to vector<2x16xf32>
    %455 = arith.negf %454 : vector<2x16xf32>
    %456 = math.exp %455 : vector<2x16xf32>
    %cst_120 = arith.constant 1.000000e+00 : f32
    %457 = vector.broadcast %cst_120 : f32 to vector<2x16xf32>
    %458 = arith.addf %457, %456 : vector<2x16xf32>
    %459 = arith.divf %457, %458 : vector<2x16xf32>
    %460 = arith.mulf %451, %399 : vector<2x16xf32>
    %461 = arith.mulf %445, %453 : vector<2x16xf32>
    %462 = arith.addf %460, %461 : vector<2x16xf32>
    %463 = math.tanh %462 : vector<2x16xf32>
    %464 = arith.mulf %459, %463 : vector<2x16xf32>
    %465 = arith.addf %402, %437 : vector<2x16xf32>
    %466 = arith.addf %403, %464 : vector<2x16xf32>
    %c7_i32_121 = arith.constant 7 : i32
    %c7_i32_122 = arith.constant 7 : i32
    %467 = arith.subi %c7_i32_122, %c7_i32_121 : i32
    %c2_i32_123 = arith.constant 2 : i32
    %468 = arith.muli %c7_i32_121, %c2_i32_123 : i32
    %469 = arith.index_cast %468 : i32 to index
    %c0_124 = arith.constant 0 : index
    %470 = vector.load %arg17[%469, %c0_124] : memref<16x128xf32, #tpu.memory_space<vmem>>, vector<2x64xf32>
    %c2_i32_125 = arith.constant 2 : i32
    %471 = arith.muli %467, %c2_i32_125 : i32
    %472 = arith.index_cast %471 : i32 to index
    %c64_126 = arith.constant 64 : index
    %473 = vector.load %arg17[%472, %c64_126] : memref<16x128xf32, #tpu.memory_space<vmem>>, vector<2x64xf32>
    %cst_127 = arith.constant dense<0.000000e+00> : vector<2x64xf32>
    %474 = tpu.matmul %437, %23, %cst_127 {dimension_numbers = #tpu.dot_dimension_numbers<[1], [0], [0], [1], [0, 0, 1, 1], [], []>} : vector<2x16xf32>, vector<16x64xf32>, vector<2x64xf32> -> vector<2x64xf32>
    %475 = arith.addf %470, %474 : vector<2x64xf32>
    %476 = vector.extract_strided_slice %475 {offsets = [0, 0], sizes = [2, 16], strides = [1, 1]} : vector<2x64xf32> to vector<2x16xf32>
    %477 = arith.negf %476 : vector<2x16xf32>
    %478 = math.exp %477 : vector<2x16xf32>
    %cst_128 = arith.constant 1.000000e+00 : f32
    %479 = vector.broadcast %cst_128 : f32 to vector<2x16xf32>
    %480 = arith.addf %479, %478 : vector<2x16xf32>
    %481 = arith.divf %479, %480 : vector<2x16xf32>
    %482 = vector.extract_strided_slice %475 {offsets = [0, 16], sizes = [2, 16], strides = [1, 1]} : vector<2x64xf32> to vector<2x16xf32>
    %483 = arith.negf %482 : vector<2x16xf32>
    %484 = math.exp %483 : vector<2x16xf32>
    %cst_129 = arith.constant 1.000000e+00 : f32
    %485 = vector.broadcast %cst_129 : f32 to vector<2x16xf32>
    %486 = arith.addf %485, %484 : vector<2x16xf32>
    %487 = arith.divf %485, %486 : vector<2x16xf32>
    %488 = vector.extract_strided_slice %475 {offsets = [0, 32], sizes = [2, 16], strides = [1, 1]} : vector<2x64xf32> to vector<2x16xf32>
    %489 = math.tanh %488 : vector<2x16xf32>
    %490 = vector.extract_strided_slice %475 {offsets = [0, 48], sizes = [2, 16], strides = [1, 1]} : vector<2x64xf32> to vector<2x16xf32>
    %491 = arith.negf %490 : vector<2x16xf32>
    %492 = math.exp %491 : vector<2x16xf32>
    %cst_130 = arith.constant 1.000000e+00 : f32
    %493 = vector.broadcast %cst_130 : f32 to vector<2x16xf32>
    %494 = arith.addf %493, %492 : vector<2x16xf32>
    %495 = arith.divf %493, %494 : vector<2x16xf32>
    %496 = arith.mulf %487, %435 : vector<2x16xf32>
    %497 = arith.mulf %481, %489 : vector<2x16xf32>
    %498 = arith.addf %496, %497 : vector<2x16xf32>
    %499 = math.tanh %498 : vector<2x16xf32>
    %500 = arith.mulf %495, %499 : vector<2x16xf32>
    %cst_131 = arith.constant dense<0.000000e+00> : vector<2x64xf32>
    %501 = tpu.matmul %464, %24, %cst_131 {dimension_numbers = #tpu.dot_dimension_numbers<[1], [0], [0], [1], [0, 0, 1, 1], [], []>} : vector<2x16xf32>, vector<16x64xf32>, vector<2x64xf32> -> vector<2x64xf32>
    %502 = arith.addf %473, %501 : vector<2x64xf32>
    %503 = vector.extract_strided_slice %502 {offsets = [0, 0], sizes = [2, 16], strides = [1, 1]} : vector<2x64xf32> to vector<2x16xf32>
    %504 = arith.negf %503 : vector<2x16xf32>
    %505 = math.exp %504 : vector<2x16xf32>
    %cst_132 = arith.constant 1.000000e+00 : f32
    %506 = vector.broadcast %cst_132 : f32 to vector<2x16xf32>
    %507 = arith.addf %506, %505 : vector<2x16xf32>
    %508 = arith.divf %506, %507 : vector<2x16xf32>
    %509 = vector.extract_strided_slice %502 {offsets = [0, 16], sizes = [2, 16], strides = [1, 1]} : vector<2x64xf32> to vector<2x16xf32>
    %510 = arith.negf %509 : vector<2x16xf32>
    %511 = math.exp %510 : vector<2x16xf32>
    %cst_133 = arith.constant 1.000000e+00 : f32
    %512 = vector.broadcast %cst_133 : f32 to vector<2x16xf32>
    %513 = arith.addf %512, %511 : vector<2x16xf32>
    %514 = arith.divf %512, %513 : vector<2x16xf32>
    %515 = vector.extract_strided_slice %502 {offsets = [0, 32], sizes = [2, 16], strides = [1, 1]} : vector<2x64xf32> to vector<2x16xf32>
    %516 = math.tanh %515 : vector<2x16xf32>
    %517 = vector.extract_strided_slice %502 {offsets = [0, 48], sizes = [2, 16], strides = [1, 1]} : vector<2x64xf32> to vector<2x16xf32>
    %518 = arith.negf %517 : vector<2x16xf32>
    %519 = math.exp %518 : vector<2x16xf32>
    %cst_134 = arith.constant 1.000000e+00 : f32
    %520 = vector.broadcast %cst_134 : f32 to vector<2x16xf32>
    %521 = arith.addf %520, %519 : vector<2x16xf32>
    %522 = arith.divf %520, %521 : vector<2x16xf32>
    %523 = arith.mulf %514, %462 : vector<2x16xf32>
    %524 = arith.mulf %508, %516 : vector<2x16xf32>
    %525 = arith.addf %523, %524 : vector<2x16xf32>
    %526 = math.tanh %525 : vector<2x16xf32>
    %527 = arith.mulf %522, %526 : vector<2x16xf32>
    %528 = arith.addf %465, %500 : vector<2x16xf32>
    %529 = arith.addf %466, %527 : vector<2x16xf32>
    %c8_i32 = arith.constant 8 : i32
    %cst_135 = arith.constant 1.250000e-01 : f32
    %530 = vector.broadcast %cst_135 : f32 to vector<2x16xf32>
    %531 = arith.mulf %528, %530 : vector<2x16xf32>
    %c0_136 = arith.constant 0 : index
    %c0_137 = arith.constant 0 : index
    %532 = vector.load %arg13[%c0_136, %c0_137] : memref<16x3xf32, #tpu.memory_space<vmem>>, vector<16x3xf32>
    %cst_138 = arith.constant dense<0.000000e+00> : vector<2x3xf32>
    %533 = tpu.matmul %531, %532, %cst_138 {dimension_numbers = #tpu.dot_dimension_numbers<[1], [0], [0], [1], [0, 0, 1, 1], [], []>} : vector<2x16xf32>, vector<16x3xf32>, vector<2x3xf32> -> vector<2x3xf32>
    %cst_139 = arith.constant 1.250000e-01 : f32
    %534 = vector.broadcast %cst_139 : f32 to vector<2x16xf32>
    %535 = arith.mulf %529, %534 : vector<2x16xf32>
    %c0_140 = arith.constant 0 : index
    %c0_141 = arith.constant 0 : index
    %536 = vector.load %arg14[%c0_140, %c0_141] : memref<16x3xf32, #tpu.memory_space<vmem>>, vector<16x3xf32>
    %cst_142 = arith.constant dense<0.000000e+00> : vector<2x3xf32>
    %537 = tpu.matmul %535, %536, %cst_142 {dimension_numbers = #tpu.dot_dimension_numbers<[1], [0], [0], [1], [0, 0, 1, 1], [], []>} : vector<2x16xf32>, vector<16x3xf32>, vector<2x3xf32> -> vector<2x3xf32>
    %538 = arith.addf %533, %537 : vector<2x3xf32>
    %c0_143 = arith.constant 0 : index
    %c0_144 = arith.constant 0 : index
    %539 = vector.load %arg15[%c0_143, %c0_144] : memref<1x3xf32, #tpu.memory_space<vmem>>, vector<1x3xf32>
    %540 = vector.broadcast %539 : vector<1x3xf32> to vector<2x3xf32>
    %541 = arith.addf %538, %540 : vector<2x3xf32>
    %c0_145 = arith.constant 0 : index
    %c0_146 = arith.constant 0 : index
    %542 = vector.load %arg16[%c0_145, %c0_146] : memref<2x3xf32, #tpu.memory_space<vmem>>, vector<2x3xf32>
    tpu.vector_store %arg16[%c0_145, %c0_146], %541 {strides = array<i32>} : memref<2x3xf32, #tpu.memory_space<vmem>>, vector<2x3xf32>,
    return
  }
}

module attributes {stable_mosaic.version = 11 : i64} {
  func.func @kernel(%arg0: memref<16x16xf32, #tpu.memory_space<vmem>>, %arg1: memref<16x16xf32, #tpu.memory_space<vmem>>, %arg2: memref<16x32xf32, #tpu.memory_space<vmem>>, %arg3: memref<16x128xf32, #tpu.memory_space<vmem>>, %arg4: memref<16x128xf32, #tpu.memory_space<vmem>>, %arg5: memref<32x128xf32, #tpu.memory_space<vmem>>, %arg6: memref<16x64xf32, #tpu.memory_space<vmem>>, %arg7: memref<16x64xf32, #tpu.memory_space<vmem>>, %arg8: memref<1x128xf32, #tpu.memory_space<vmem>>, %arg9: memref<16x16xf32, #tpu.memory_space<vmem>>, %arg10: memref<16x16xf32, #tpu.memory_space<vmem>>, %arg11: memref<16x128xf32, #tpu.memory_space<vmem>>) attributes {dimension_semantics = [], scalar_prefetch = 0 : i64, scratch_operands = 1 : i64, tpu.core_type = #tpu.core_type<tc>} {
    %c0 = arith.constant 0 : index
    %c0_0 = arith.constant 0 : index
    %0 = vector.load %arg0[%c0, %c0_0] : memref<16x16xf32, #tpu.memory_space<vmem>>, vector<16x16xf32>
    %c0_1 = arith.constant 0 : index
    %c0_2 = arith.constant 0 : index
    %1 = vector.load %arg3[%c0_1, %c0_2] : memref<16x128xf32, #tpu.memory_space<vmem>>, vector<16x128xf32>
    %cst = arith.constant dense<0.000000e+00> : vector<16x128xf32>
    %2 = tpu.matmul %0, %1, %cst {dimension_numbers = #tpu.dot_dimension_numbers<[1], [0], [0], [1], [0, 0, 1, 1], [], []>} : vector<16x16xf32>, vector<16x128xf32>, vector<16x128xf32> -> vector<16x128xf32>
    %c0_3 = arith.constant 0 : index
    %c0_4 = arith.constant 0 : index
    %3 = vector.load %arg1[%c0_3, %c0_4] : memref<16x16xf32, #tpu.memory_space<vmem>>, vector<16x16xf32>
    %c0_5 = arith.constant 0 : index
    %c0_6 = arith.constant 0 : index
    %4 = vector.load %arg4[%c0_5, %c0_6] : memref<16x128xf32, #tpu.memory_space<vmem>>, vector<16x128xf32>
    %cst_7 = arith.constant dense<0.000000e+00> : vector<16x128xf32>
    %5 = tpu.matmul %3, %4, %cst_7 {dimension_numbers = #tpu.dot_dimension_numbers<[1], [0], [0], [1], [0, 0, 1, 1], [], []>} : vector<16x16xf32>, vector<16x128xf32>, vector<16x128xf32> -> vector<16x128xf32>
    %6 = arith.addf %2, %5 : vector<16x128xf32>
    %c0_8 = arith.constant 0 : index
    %c0_9 = arith.constant 0 : index
    %7 = vector.load %arg2[%c0_8, %c0_9] : memref<16x32xf32, #tpu.memory_space<vmem>>, vector<16x32xf32>
    %c0_10 = arith.constant 0 : index
    %c0_11 = arith.constant 0 : index
    %8 = vector.load %arg5[%c0_10, %c0_11] : memref<32x128xf32, #tpu.memory_space<vmem>>, vector<32x128xf32>
    %cst_12 = arith.constant dense<0.000000e+00> : vector<16x128xf32>
    %9 = tpu.matmul %7, %8, %cst_12 {dimension_numbers = #tpu.dot_dimension_numbers<[1], [0], [0], [1], [0, 0, 1, 1], [], []>} : vector<16x32xf32>, vector<32x128xf32>, vector<16x128xf32> -> vector<16x128xf32>
    %10 = arith.addf %6, %9 : vector<16x128xf32>
    %c0_13 = arith.constant 0 : index
    %c0_14 = arith.constant 0 : index
    %11 = vector.load %arg8[%c0_13, %c0_14] : memref<1x128xf32, #tpu.memory_space<vmem>>, vector<1x128xf32>
    %12 = vector.broadcast %11 : vector<1x128xf32> to vector<16x128xf32>
    %13 = arith.addf %10, %12 : vector<16x128xf32>
    %c0_15 = arith.constant 0 : index
    %c0_16 = arith.constant 0 : index
    %14 = vector.load %arg11[%c0_15, %c0_16] : memref<16x128xf32, #tpu.memory_space<vmem>>, vector<16x128xf32>
    tpu.vector_store %arg11[%c0_15, %c0_16], %13 {strides = array<i32>} : memref<16x128xf32, #tpu.memory_space<vmem>>, vector<16x128xf32>,
    %c0_17 = arith.constant 0 : index
    %c0_18 = arith.constant 0 : index
    %15 = vector.load %arg6[%c0_17, %c0_18] : memref<16x64xf32, #tpu.memory_space<vmem>>, vector<16x64xf32>
    %c0_19 = arith.constant 0 : index
    %c0_20 = arith.constant 0 : index
    %16 = vector.load %arg7[%c0_19, %c0_20] : memref<16x64xf32, #tpu.memory_space<vmem>>, vector<16x64xf32>
    %cst_21 = arith.constant 0.000000e+00 : f32
    %17 = vector.broadcast %cst_21 : f32 to vector<2x16xf32>
    %c0_i32 = arith.constant 0 : i32
    %c7_i32 = arith.constant 7 : i32
    %18 = arith.subi %c7_i32, %c0_i32 : i32
    %c2_i32 = arith.constant 2 : i32
    %19 = arith.muli %c0_i32, %c2_i32 : i32
    %20 = arith.index_cast %19 : i32 to index
    %c0_22 = arith.constant 0 : index
    %21 = vector.load %arg11[%20, %c0_22] : memref<16x128xf32, #tpu.memory_space<vmem>>, vector<2x64xf32>
    %c2_i32_23 = arith.constant 2 : i32
    %22 = arith.muli %18, %c2_i32_23 : i32
    %23 = arith.index_cast %22 : i32 to index
    %c64 = arith.constant 64 : index
    %24 = vector.load %arg11[%23, %c64] : memref<16x128xf32, #tpu.memory_space<vmem>>, vector<2x64xf32>
    %cst_24 = arith.constant dense<0.000000e+00> : vector<2x64xf32>
    %25 = tpu.matmul %17, %15, %cst_24 {dimension_numbers = #tpu.dot_dimension_numbers<[1], [0], [0], [1], [0, 0, 1, 1], [], []>} : vector<2x16xf32>, vector<16x64xf32>, vector<2x64xf32> -> vector<2x64xf32>
    %26 = arith.addf %21, %25 : vector<2x64xf32>
    %27 = vector.extract_strided_slice %26 {offsets = [0, 0], sizes = [2, 16], strides = [1, 1]} : vector<2x64xf32> to vector<2x16xf32>
    %28 = arith.negf %27 : vector<2x16xf32>
    %29 = math.exp %28 : vector<2x16xf32>
    %cst_25 = arith.constant 1.000000e+00 : f32
    %30 = vector.broadcast %cst_25 : f32 to vector<2x16xf32>
    %31 = arith.addf %30, %29 : vector<2x16xf32>
    %32 = arith.divf %30, %31 : vector<2x16xf32>
    %33 = vector.extract_strided_slice %26 {offsets = [0, 16], sizes = [2, 16], strides = [1, 1]} : vector<2x64xf32> to vector<2x16xf32>
    %34 = arith.negf %33 : vector<2x16xf32>
    %35 = math.exp %34 : vector<2x16xf32>
    %cst_26 = arith.constant 1.000000e+00 : f32
    %36 = vector.broadcast %cst_26 : f32 to vector<2x16xf32>
    %37 = arith.addf %36, %35 : vector<2x16xf32>
    %38 = arith.divf %36, %37 : vector<2x16xf32>
    %39 = vector.extract_strided_slice %26 {offsets = [0, 32], sizes = [2, 16], strides = [1, 1]} : vector<2x64xf32> to vector<2x16xf32>
    %40 = math.tanh %39 : vector<2x16xf32>
    %41 = vector.extract_strided_slice %26 {offsets = [0, 48], sizes = [2, 16], strides = [1, 1]} : vector<2x64xf32> to vector<2x16xf32>
    %42 = arith.negf %41 : vector<2x16xf32>
    %43 = math.exp %42 : vector<2x16xf32>
    %cst_27 = arith.constant 1.000000e+00 : f32
    %44 = vector.broadcast %cst_27 : f32 to vector<2x16xf32>
    %45 = arith.addf %44, %43 : vector<2x16xf32>
    %46 = arith.divf %44, %45 : vector<2x16xf32>
    %47 = arith.mulf %38, %17 : vector<2x16xf32>
    %48 = arith.mulf %32, %40 : vector<2x16xf32>
    %49 = arith.addf %47, %48 : vector<2x16xf32>
    %50 = math.tanh %49 : vector<2x16xf32>
    %51 = arith.mulf %46, %50 : vector<2x16xf32>
    %cst_28 = arith.constant dense<0.000000e+00> : vector<2x64xf32>
    %52 = tpu.matmul %17, %16, %cst_28 {dimension_numbers = #tpu.dot_dimension_numbers<[1], [0], [0], [1], [0, 0, 1, 1], [], []>} : vector<2x16xf32>, vector<16x64xf32>, vector<2x64xf32> -> vector<2x64xf32>
    %53 = arith.addf %24, %52 : vector<2x64xf32>
    %54 = vector.extract_strided_slice %53 {offsets = [0, 0], sizes = [2, 16], strides = [1, 1]} : vector<2x64xf32> to vector<2x16xf32>
    %55 = arith.negf %54 : vector<2x16xf32>
    %56 = math.exp %55 : vector<2x16xf32>
    %cst_29 = arith.constant 1.000000e+00 : f32
    %57 = vector.broadcast %cst_29 : f32 to vector<2x16xf32>
    %58 = arith.addf %57, %56 : vector<2x16xf32>
    %59 = arith.divf %57, %58 : vector<2x16xf32>
    %60 = vector.extract_strided_slice %53 {offsets = [0, 16], sizes = [2, 16], strides = [1, 1]} : vector<2x64xf32> to vector<2x16xf32>
    %61 = arith.negf %60 : vector<2x16xf32>
    %62 = math.exp %61 : vector<2x16xf32>
    %cst_30 = arith.constant 1.000000e+00 : f32
    %63 = vector.broadcast %cst_30 : f32 to vector<2x16xf32>
    %64 = arith.addf %63, %62 : vector<2x16xf32>
    %65 = arith.divf %63, %64 : vector<2x16xf32>
    %66 = vector.extract_strided_slice %53 {offsets = [0, 32], sizes = [2, 16], strides = [1, 1]} : vector<2x64xf32> to vector<2x16xf32>
    %67 = math.tanh %66 : vector<2x16xf32>
    %68 = vector.extract_strided_slice %53 {offsets = [0, 48], sizes = [2, 16], strides = [1, 1]} : vector<2x64xf32> to vector<2x16xf32>
    %69 = arith.negf %68 : vector<2x16xf32>
    %70 = math.exp %69 : vector<2x16xf32>
    %cst_31 = arith.constant 1.000000e+00 : f32
    %71 = vector.broadcast %cst_31 : f32 to vector<2x16xf32>
    %72 = arith.addf %71, %70 : vector<2x16xf32>
    %73 = arith.divf %71, %72 : vector<2x16xf32>
    %74 = arith.mulf %65, %17 : vector<2x16xf32>
    %75 = arith.mulf %59, %67 : vector<2x16xf32>
    %76 = arith.addf %74, %75 : vector<2x16xf32>
    %77 = math.tanh %76 : vector<2x16xf32>
    %78 = arith.mulf %73, %77 : vector<2x16xf32>
    %c2_i32_32 = arith.constant 2 : i32
    %79 = arith.muli %c0_i32, %c2_i32_32 : i32
    %80 = arith.index_cast %79 : i32 to index
    %c0_33 = arith.constant 0 : index
    %81 = vector.load %arg9[%80, %c0_33] : memref<16x16xf32, #tpu.memory_space<vmem>>, vector<2x16xf32>
    tpu.vector_store %arg9[%80, %c0_33], %51 {strides = array<i32>} : memref<16x16xf32, #tpu.memory_space<vmem>>, vector<2x16xf32>,
    %c2_i32_34 = arith.constant 2 : i32
    %82 = arith.muli %18, %c2_i32_34 : i32
    %83 = arith.index_cast %82 : i32 to index
    %c0_35 = arith.constant 0 : index
    %84 = vector.load %arg10[%83, %c0_35] : memref<16x16xf32, #tpu.memory_space<vmem>>, vector<2x16xf32>
    tpu.vector_store %arg10[%83, %c0_35], %78 {strides = array<i32>} : memref<16x16xf32, #tpu.memory_space<vmem>>, vector<2x16xf32>,
    %c1_i32 = arith.constant 1 : i32
    %c7_i32_36 = arith.constant 7 : i32
    %85 = arith.subi %c7_i32_36, %c1_i32 : i32
    %c2_i32_37 = arith.constant 2 : i32
    %86 = arith.muli %c1_i32, %c2_i32_37 : i32
    %87 = arith.index_cast %86 : i32 to index
    %c0_38 = arith.constant 0 : index
    %88 = vector.load %arg11[%87, %c0_38] : memref<16x128xf32, #tpu.memory_space<vmem>>, vector<2x64xf32>
    %c2_i32_39 = arith.constant 2 : i32
    %89 = arith.muli %85, %c2_i32_39 : i32
    %90 = arith.index_cast %89 : i32 to index
    %c64_40 = arith.constant 64 : index
    %91 = vector.load %arg11[%90, %c64_40] : memref<16x128xf32, #tpu.memory_space<vmem>>, vector<2x64xf32>
    %cst_41 = arith.constant dense<0.000000e+00> : vector<2x64xf32>
    %92 = tpu.matmul %51, %15, %cst_41 {dimension_numbers = #tpu.dot_dimension_numbers<[1], [0], [0], [1], [0, 0, 1, 1], [], []>} : vector<2x16xf32>, vector<16x64xf32>, vector<2x64xf32> -> vector<2x64xf32>
    %93 = arith.addf %88, %92 : vector<2x64xf32>
    %94 = vector.extract_strided_slice %93 {offsets = [0, 0], sizes = [2, 16], strides = [1, 1]} : vector<2x64xf32> to vector<2x16xf32>
    %95 = arith.negf %94 : vector<2x16xf32>
    %96 = math.exp %95 : vector<2x16xf32>
    %cst_42 = arith.constant 1.000000e+00 : f32
    %97 = vector.broadcast %cst_42 : f32 to vector<2x16xf32>
    %98 = arith.addf %97, %96 : vector<2x16xf32>
    %99 = arith.divf %97, %98 : vector<2x16xf32>
    %100 = vector.extract_strided_slice %93 {offsets = [0, 16], sizes = [2, 16], strides = [1, 1]} : vector<2x64xf32> to vector<2x16xf32>
    %101 = arith.negf %100 : vector<2x16xf32>
    %102 = math.exp %101 : vector<2x16xf32>
    %cst_43 = arith.constant 1.000000e+00 : f32
    %103 = vector.broadcast %cst_43 : f32 to vector<2x16xf32>
    %104 = arith.addf %103, %102 : vector<2x16xf32>
    %105 = arith.divf %103, %104 : vector<2x16xf32>
    %106 = vector.extract_strided_slice %93 {offsets = [0, 32], sizes = [2, 16], strides = [1, 1]} : vector<2x64xf32> to vector<2x16xf32>
    %107 = math.tanh %106 : vector<2x16xf32>
    %108 = vector.extract_strided_slice %93 {offsets = [0, 48], sizes = [2, 16], strides = [1, 1]} : vector<2x64xf32> to vector<2x16xf32>
    %109 = arith.negf %108 : vector<2x16xf32>
    %110 = math.exp %109 : vector<2x16xf32>
    %cst_44 = arith.constant 1.000000e+00 : f32
    %111 = vector.broadcast %cst_44 : f32 to vector<2x16xf32>
    %112 = arith.addf %111, %110 : vector<2x16xf32>
    %113 = arith.divf %111, %112 : vector<2x16xf32>
    %114 = arith.mulf %105, %49 : vector<2x16xf32>
    %115 = arith.mulf %99, %107 : vector<2x16xf32>
    %116 = arith.addf %114, %115 : vector<2x16xf32>
    %117 = math.tanh %116 : vector<2x16xf32>
    %118 = arith.mulf %113, %117 : vector<2x16xf32>
    %cst_45 = arith.constant dense<0.000000e+00> : vector<2x64xf32>
    %119 = tpu.matmul %78, %16, %cst_45 {dimension_numbers = #tpu.dot_dimension_numbers<[1], [0], [0], [1], [0, 0, 1, 1], [], []>} : vector<2x16xf32>, vector<16x64xf32>, vector<2x64xf32> -> vector<2x64xf32>
    %120 = arith.addf %91, %119 : vector<2x64xf32>
    %121 = vector.extract_strided_slice %120 {offsets = [0, 0], sizes = [2, 16], strides = [1, 1]} : vector<2x64xf32> to vector<2x16xf32>
    %122 = arith.negf %121 : vector<2x16xf32>
    %123 = math.exp %122 : vector<2x16xf32>
    %cst_46 = arith.constant 1.000000e+00 : f32
    %124 = vector.broadcast %cst_46 : f32 to vector<2x16xf32>
    %125 = arith.addf %124, %123 : vector<2x16xf32>
    %126 = arith.divf %124, %125 : vector<2x16xf32>
    %127 = vector.extract_strided_slice %120 {offsets = [0, 16], sizes = [2, 16], strides = [1, 1]} : vector<2x64xf32> to vector<2x16xf32>
    %128 = arith.negf %127 : vector<2x16xf32>
    %129 = math.exp %128 : vector<2x16xf32>
    %cst_47 = arith.constant 1.000000e+00 : f32
    %130 = vector.broadcast %cst_47 : f32 to vector<2x16xf32>
    %131 = arith.addf %130, %129 : vector<2x16xf32>
    %132 = arith.divf %130, %131 : vector<2x16xf32>
    %133 = vector.extract_strided_slice %120 {offsets = [0, 32], sizes = [2, 16], strides = [1, 1]} : vector<2x64xf32> to vector<2x16xf32>
    %134 = math.tanh %133 : vector<2x16xf32>
    %135 = vector.extract_strided_slice %120 {offsets = [0, 48], sizes = [2, 16], strides = [1, 1]} : vector<2x64xf32> to vector<2x16xf32>
    %136 = arith.negf %135 : vector<2x16xf32>
    %137 = math.exp %136 : vector<2x16xf32>
    %cst_48 = arith.constant 1.000000e+00 : f32
    %138 = vector.broadcast %cst_48 : f32 to vector<2x16xf32>
    %139 = arith.addf %138, %137 : vector<2x16xf32>
    %140 = arith.divf %138, %139 : vector<2x16xf32>
    %141 = arith.mulf %132, %76 : vector<2x16xf32>
    %142 = arith.mulf %126, %134 : vector<2x16xf32>
    %143 = arith.addf %141, %142 : vector<2x16xf32>
    %144 = math.tanh %143 : vector<2x16xf32>
    %145 = arith.mulf %140, %144 : vector<2x16xf32>
    %c2_i32_49 = arith.constant 2 : i32
    %146 = arith.muli %c1_i32, %c2_i32_49 : i32
    %147 = arith.index_cast %146 : i32 to index
    %c0_50 = arith.constant 0 : index
    %148 = vector.load %arg9[%147, %c0_50] : memref<16x16xf32, #tpu.memory_space<vmem>>, vector<2x16xf32>
    tpu.vector_store %arg9[%147, %c0_50], %118 {strides = array<i32>} : memref<16x16xf32, #tpu.memory_space<vmem>>, vector<2x16xf32>,
    %c2_i32_51 = arith.constant 2 : i32
    %149 = arith.muli %85, %c2_i32_51 : i32
    %150 = arith.index_cast %149 : i32 to index
    %c0_52 = arith.constant 0 : index
    %151 = vector.load %arg10[%150, %c0_52] : memref<16x16xf32, #tpu.memory_space<vmem>>, vector<2x16xf32>
    tpu.vector_store %arg10[%150, %c0_52], %145 {strides = array<i32>} : memref<16x16xf32, #tpu.memory_space<vmem>>, vector<2x16xf32>,
    %c2_i32_53 = arith.constant 2 : i32
    %c7_i32_54 = arith.constant 7 : i32
    %152 = arith.subi %c7_i32_54, %c2_i32_53 : i32
    %c2_i32_55 = arith.constant 2 : i32
    %153 = arith.muli %c2_i32_53, %c2_i32_55 : i32
    %154 = arith.index_cast %153 : i32 to index
    %c0_56 = arith.constant 0 : index
    %155 = vector.load %arg11[%154, %c0_56] : memref<16x128xf32, #tpu.memory_space<vmem>>, vector<2x64xf32>
    %c2_i32_57 = arith.constant 2 : i32
    %156 = arith.muli %152, %c2_i32_57 : i32
    %157 = arith.index_cast %156 : i32 to index
    %c64_58 = arith.constant 64 : index
    %158 = vector.load %arg11[%157, %c64_58] : memref<16x128xf32, #tpu.memory_space<vmem>>, vector<2x64xf32>
    %cst_59 = arith.constant dense<0.000000e+00> : vector<2x64xf32>
    %159 = tpu.matmul %118, %15, %cst_59 {dimension_numbers = #tpu.dot_dimension_numbers<[1], [0], [0], [1], [0, 0, 1, 1], [], []>} : vector<2x16xf32>, vector<16x64xf32>, vector<2x64xf32> -> vector<2x64xf32>
    %160 = arith.addf %155, %159 : vector<2x64xf32>
    %161 = vector.extract_strided_slice %160 {offsets = [0, 0], sizes = [2, 16], strides = [1, 1]} : vector<2x64xf32> to vector<2x16xf32>
    %162 = arith.negf %161 : vector<2x16xf32>
    %163 = math.exp %162 : vector<2x16xf32>
    %cst_60 = arith.constant 1.000000e+00 : f32
    %164 = vector.broadcast %cst_60 : f32 to vector<2x16xf32>
    %165 = arith.addf %164, %163 : vector<2x16xf32>
    %166 = arith.divf %164, %165 : vector<2x16xf32>
    %167 = vector.extract_strided_slice %160 {offsets = [0, 16], sizes = [2, 16], strides = [1, 1]} : vector<2x64xf32> to vector<2x16xf32>
    %168 = arith.negf %167 : vector<2x16xf32>
    %169 = math.exp %168 : vector<2x16xf32>
    %cst_61 = arith.constant 1.000000e+00 : f32
    %170 = vector.broadcast %cst_61 : f32 to vector<2x16xf32>
    %171 = arith.addf %170, %169 : vector<2x16xf32>
    %172 = arith.divf %170, %171 : vector<2x16xf32>
    %173 = vector.extract_strided_slice %160 {offsets = [0, 32], sizes = [2, 16], strides = [1, 1]} : vector<2x64xf32> to vector<2x16xf32>
    %174 = math.tanh %173 : vector<2x16xf32>
    %175 = vector.extract_strided_slice %160 {offsets = [0, 48], sizes = [2, 16], strides = [1, 1]} : vector<2x64xf32> to vector<2x16xf32>
    %176 = arith.negf %175 : vector<2x16xf32>
    %177 = math.exp %176 : vector<2x16xf32>
    %cst_62 = arith.constant 1.000000e+00 : f32
    %178 = vector.broadcast %cst_62 : f32 to vector<2x16xf32>
    %179 = arith.addf %178, %177 : vector<2x16xf32>
    %180 = arith.divf %178, %179 : vector<2x16xf32>
    %181 = arith.mulf %172, %116 : vector<2x16xf32>
    %182 = arith.mulf %166, %174 : vector<2x16xf32>
    %183 = arith.addf %181, %182 : vector<2x16xf32>
    %184 = math.tanh %183 : vector<2x16xf32>
    %185 = arith.mulf %180, %184 : vector<2x16xf32>
    %cst_63 = arith.constant dense<0.000000e+00> : vector<2x64xf32>
    %186 = tpu.matmul %145, %16, %cst_63 {dimension_numbers = #tpu.dot_dimension_numbers<[1], [0], [0], [1], [0, 0, 1, 1], [], []>} : vector<2x16xf32>, vector<16x64xf32>, vector<2x64xf32> -> vector<2x64xf32>
    %187 = arith.addf %158, %186 : vector<2x64xf32>
    %188 = vector.extract_strided_slice %187 {offsets = [0, 0], sizes = [2, 16], strides = [1, 1]} : vector<2x64xf32> to vector<2x16xf32>
    %189 = arith.negf %188 : vector<2x16xf32>
    %190 = math.exp %189 : vector<2x16xf32>
    %cst_64 = arith.constant 1.000000e+00 : f32
    %191 = vector.broadcast %cst_64 : f32 to vector<2x16xf32>
    %192 = arith.addf %191, %190 : vector<2x16xf32>
    %193 = arith.divf %191, %192 : vector<2x16xf32>
    %194 = vector.extract_strided_slice %187 {offsets = [0, 16], sizes = [2, 16], strides = [1, 1]} : vector<2x64xf32> to vector<2x16xf32>
    %195 = arith.negf %194 : vector<2x16xf32>
    %196 = math.exp %195 : vector<2x16xf32>
    %cst_65 = arith.constant 1.000000e+00 : f32
    %197 = vector.broadcast %cst_65 : f32 to vector<2x16xf32>
    %198 = arith.addf %197, %196 : vector<2x16xf32>
    %199 = arith.divf %197, %198 : vector<2x16xf32>
    %200 = vector.extract_strided_slice %187 {offsets = [0, 32], sizes = [2, 16], strides = [1, 1]} : vector<2x64xf32> to vector<2x16xf32>
    %201 = math.tanh %200 : vector<2x16xf32>
    %202 = vector.extract_strided_slice %187 {offsets = [0, 48], sizes = [2, 16], strides = [1, 1]} : vector<2x64xf32> to vector<2x16xf32>
    %203 = arith.negf %202 : vector<2x16xf32>
    %204 = math.exp %203 : vector<2x16xf32>
    %cst_66 = arith.constant 1.000000e+00 : f32
    %205 = vector.broadcast %cst_66 : f32 to vector<2x16xf32>
    %206 = arith.addf %205, %204 : vector<2x16xf32>
    %207 = arith.divf %205, %206 : vector<2x16xf32>
    %208 = arith.mulf %199, %143 : vector<2x16xf32>
    %209 = arith.mulf %193, %201 : vector<2x16xf32>
    %210 = arith.addf %208, %209 : vector<2x16xf32>
    %211 = math.tanh %210 : vector<2x16xf32>
    %212 = arith.mulf %207, %211 : vector<2x16xf32>
    %c2_i32_67 = arith.constant 2 : i32
    %213 = arith.muli %c2_i32_53, %c2_i32_67 : i32
    %214 = arith.index_cast %213 : i32 to index
    %c0_68 = arith.constant 0 : index
    %215 = vector.load %arg9[%214, %c0_68] : memref<16x16xf32, #tpu.memory_space<vmem>>, vector<2x16xf32>
    tpu.vector_store %arg9[%214, %c0_68], %185 {strides = array<i32>} : memref<16x16xf32, #tpu.memory_space<vmem>>, vector<2x16xf32>,
    %c2_i32_69 = arith.constant 2 : i32
    %216 = arith.muli %152, %c2_i32_69 : i32
    %217 = arith.index_cast %216 : i32 to index
    %c0_70 = arith.constant 0 : index
    %218 = vector.load %arg10[%217, %c0_70] : memref<16x16xf32, #tpu.memory_space<vmem>>, vector<2x16xf32>
    tpu.vector_store %arg10[%217, %c0_70], %212 {strides = array<i32>} : memref<16x16xf32, #tpu.memory_space<vmem>>, vector<2x16xf32>,
    %c3_i32 = arith.constant 3 : i32
    %c7_i32_71 = arith.constant 7 : i32
    %219 = arith.subi %c7_i32_71, %c3_i32 : i32
    %c2_i32_72 = arith.constant 2 : i32
    %220 = arith.muli %c3_i32, %c2_i32_72 : i32
    %221 = arith.index_cast %220 : i32 to index
    %c0_73 = arith.constant 0 : index
    %222 = vector.load %arg11[%221, %c0_73] : memref<16x128xf32, #tpu.memory_space<vmem>>, vector<2x64xf32>
    %c2_i32_74 = arith.constant 2 : i32
    %223 = arith.muli %219, %c2_i32_74 : i32
    %224 = arith.index_cast %223 : i32 to index
    %c64_75 = arith.constant 64 : index
    %225 = vector.load %arg11[%224, %c64_75] : memref<16x128xf32, #tpu.memory_space<vmem>>, vector<2x64xf32>
    %cst_76 = arith.constant dense<0.000000e+00> : vector<2x64xf32>
    %226 = tpu.matmul %185, %15, %cst_76 {dimension_numbers = #tpu.dot_dimension_numbers<[1], [0], [0], [1], [0, 0, 1, 1], [], []>} : vector<2x16xf32>, vector<16x64xf32>, vector<2x64xf32> -> vector<2x64xf32>
    %227 = arith.addf %222, %226 : vector<2x64xf32>
    %228 = vector.extract_strided_slice %227 {offsets = [0, 0], sizes = [2, 16], strides = [1, 1]} : vector<2x64xf32> to vector<2x16xf32>
    %229 = arith.negf %228 : vector<2x16xf32>
    %230 = math.exp %229 : vector<2x16xf32>
    %cst_77 = arith.constant 1.000000e+00 : f32
    %231 = vector.broadcast %cst_77 : f32 to vector<2x16xf32>
    %232 = arith.addf %231, %230 : vector<2x16xf32>
    %233 = arith.divf %231, %232 : vector<2x16xf32>
    %234 = vector.extract_strided_slice %227 {offsets = [0, 16], sizes = [2, 16], strides = [1, 1]} : vector<2x64xf32> to vector<2x16xf32>
    %235 = arith.negf %234 : vector<2x16xf32>
    %236 = math.exp %235 : vector<2x16xf32>
    %cst_78 = arith.constant 1.000000e+00 : f32
    %237 = vector.broadcast %cst_78 : f32 to vector<2x16xf32>
    %238 = arith.addf %237, %236 : vector<2x16xf32>
    %239 = arith.divf %237, %238 : vector<2x16xf32>
    %240 = vector.extract_strided_slice %227 {offsets = [0, 32], sizes = [2, 16], strides = [1, 1]} : vector<2x64xf32> to vector<2x16xf32>
    %241 = math.tanh %240 : vector<2x16xf32>
    %242 = vector.extract_strided_slice %227 {offsets = [0, 48], sizes = [2, 16], strides = [1, 1]} : vector<2x64xf32> to vector<2x16xf32>
    %243 = arith.negf %242 : vector<2x16xf32>
    %244 = math.exp %243 : vector<2x16xf32>
    %cst_79 = arith.constant 1.000000e+00 : f32
    %245 = vector.broadcast %cst_79 : f32 to vector<2x16xf32>
    %246 = arith.addf %245, %244 : vector<2x16xf32>
    %247 = arith.divf %245, %246 : vector<2x16xf32>
    %248 = arith.mulf %239, %183 : vector<2x16xf32>
    %249 = arith.mulf %233, %241 : vector<2x16xf32>
    %250 = arith.addf %248, %249 : vector<2x16xf32>
    %251 = math.tanh %250 : vector<2x16xf32>
    %252 = arith.mulf %247, %251 : vector<2x16xf32>
    %cst_80 = arith.constant dense<0.000000e+00> : vector<2x64xf32>
    %253 = tpu.matmul %212, %16, %cst_80 {dimension_numbers = #tpu.dot_dimension_numbers<[1], [0], [0], [1], [0, 0, 1, 1], [], []>} : vector<2x16xf32>, vector<16x64xf32>, vector<2x64xf32> -> vector<2x64xf32>
    %254 = arith.addf %225, %253 : vector<2x64xf32>
    %255 = vector.extract_strided_slice %254 {offsets = [0, 0], sizes = [2, 16], strides = [1, 1]} : vector<2x64xf32> to vector<2x16xf32>
    %256 = arith.negf %255 : vector<2x16xf32>
    %257 = math.exp %256 : vector<2x16xf32>
    %cst_81 = arith.constant 1.000000e+00 : f32
    %258 = vector.broadcast %cst_81 : f32 to vector<2x16xf32>
    %259 = arith.addf %258, %257 : vector<2x16xf32>
    %260 = arith.divf %258, %259 : vector<2x16xf32>
    %261 = vector.extract_strided_slice %254 {offsets = [0, 16], sizes = [2, 16], strides = [1, 1]} : vector<2x64xf32> to vector<2x16xf32>
    %262 = arith.negf %261 : vector<2x16xf32>
    %263 = math.exp %262 : vector<2x16xf32>
    %cst_82 = arith.constant 1.000000e+00 : f32
    %264 = vector.broadcast %cst_82 : f32 to vector<2x16xf32>
    %265 = arith.addf %264, %263 : vector<2x16xf32>
    %266 = arith.divf %264, %265 : vector<2x16xf32>
    %267 = vector.extract_strided_slice %254 {offsets = [0, 32], sizes = [2, 16], strides = [1, 1]} : vector<2x64xf32> to vector<2x16xf32>
    %268 = math.tanh %267 : vector<2x16xf32>
    %269 = vector.extract_strided_slice %254 {offsets = [0, 48], sizes = [2, 16], strides = [1, 1]} : vector<2x64xf32> to vector<2x16xf32>
    %270 = arith.negf %269 : vector<2x16xf32>
    %271 = math.exp %270 : vector<2x16xf32>
    %cst_83 = arith.constant 1.000000e+00 : f32
    %272 = vector.broadcast %cst_83 : f32 to vector<2x16xf32>
    %273 = arith.addf %272, %271 : vector<2x16xf32>
    %274 = arith.divf %272, %273 : vector<2x16xf32>
    %275 = arith.mulf %266, %210 : vector<2x16xf32>
    %276 = arith.mulf %260, %268 : vector<2x16xf32>
    %277 = arith.addf %275, %276 : vector<2x16xf32>
    %278 = math.tanh %277 : vector<2x16xf32>
    %279 = arith.mulf %274, %278 : vector<2x16xf32>
    %c2_i32_84 = arith.constant 2 : i32
    %280 = arith.muli %c3_i32, %c2_i32_84 : i32
    %281 = arith.index_cast %280 : i32 to index
    %c0_85 = arith.constant 0 : index
    %282 = vector.load %arg9[%281, %c0_85] : memref<16x16xf32, #tpu.memory_space<vmem>>, vector<2x16xf32>
    tpu.vector_store %arg9[%281, %c0_85], %252 {strides = array<i32>} : memref<16x16xf32, #tpu.memory_space<vmem>>, vector<2x16xf32>,
    %c2_i32_86 = arith.constant 2 : i32
    %283 = arith.muli %219, %c2_i32_86 : i32
    %284 = arith.index_cast %283 : i32 to index
    %c0_87 = arith.constant 0 : index
    %285 = vector.load %arg10[%284, %c0_87] : memref<16x16xf32, #tpu.memory_space<vmem>>, vector<2x16xf32>
    tpu.vector_store %arg10[%284, %c0_87], %279 {strides = array<i32>} : memref<16x16xf32, #tpu.memory_space<vmem>>, vector<2x16xf32>,
    %c4_i32 = arith.constant 4 : i32
    %c7_i32_88 = arith.constant 7 : i32
    %286 = arith.subi %c7_i32_88, %c4_i32 : i32
    %c2_i32_89 = arith.constant 2 : i32
    %287 = arith.muli %c4_i32, %c2_i32_89 : i32
    %288 = arith.index_cast %287 : i32 to index
    %c0_90 = arith.constant 0 : index
    %289 = vector.load %arg11[%288, %c0_90] : memref<16x128xf32, #tpu.memory_space<vmem>>, vector<2x64xf32>
    %c2_i32_91 = arith.constant 2 : i32
    %290 = arith.muli %286, %c2_i32_91 : i32
    %291 = arith.index_cast %290 : i32 to index
    %c64_92 = arith.constant 64 : index
    %292 = vector.load %arg11[%291, %c64_92] : memref<16x128xf32, #tpu.memory_space<vmem>>, vector<2x64xf32>
    %cst_93 = arith.constant dense<0.000000e+00> : vector<2x64xf32>
    %293 = tpu.matmul %252, %15, %cst_93 {dimension_numbers = #tpu.dot_dimension_numbers<[1], [0], [0], [1], [0, 0, 1, 1], [], []>} : vector<2x16xf32>, vector<16x64xf32>, vector<2x64xf32> -> vector<2x64xf32>
    %294 = arith.addf %289, %293 : vector<2x64xf32>
    %295 = vector.extract_strided_slice %294 {offsets = [0, 0], sizes = [2, 16], strides = [1, 1]} : vector<2x64xf32> to vector<2x16xf32>
    %296 = arith.negf %295 : vector<2x16xf32>
    %297 = math.exp %296 : vector<2x16xf32>
    %cst_94 = arith.constant 1.000000e+00 : f32
    %298 = vector.broadcast %cst_94 : f32 to vector<2x16xf32>
    %299 = arith.addf %298, %297 : vector<2x16xf32>
    %300 = arith.divf %298, %299 : vector<2x16xf32>
    %301 = vector.extract_strided_slice %294 {offsets = [0, 16], sizes = [2, 16], strides = [1, 1]} : vector<2x64xf32> to vector<2x16xf32>
    %302 = arith.negf %301 : vector<2x16xf32>
    %303 = math.exp %302 : vector<2x16xf32>
    %cst_95 = arith.constant 1.000000e+00 : f32
    %304 = vector.broadcast %cst_95 : f32 to vector<2x16xf32>
    %305 = arith.addf %304, %303 : vector<2x16xf32>
    %306 = arith.divf %304, %305 : vector<2x16xf32>
    %307 = vector.extract_strided_slice %294 {offsets = [0, 32], sizes = [2, 16], strides = [1, 1]} : vector<2x64xf32> to vector<2x16xf32>
    %308 = math.tanh %307 : vector<2x16xf32>
    %309 = vector.extract_strided_slice %294 {offsets = [0, 48], sizes = [2, 16], strides = [1, 1]} : vector<2x64xf32> to vector<2x16xf32>
    %310 = arith.negf %309 : vector<2x16xf32>
    %311 = math.exp %310 : vector<2x16xf32>
    %cst_96 = arith.constant 1.000000e+00 : f32
    %312 = vector.broadcast %cst_96 : f32 to vector<2x16xf32>
    %313 = arith.addf %312, %311 : vector<2x16xf32>
    %314 = arith.divf %312, %313 : vector<2x16xf32>
    %315 = arith.mulf %306, %250 : vector<2x16xf32>
    %316 = arith.mulf %300, %308 : vector<2x16xf32>
    %317 = arith.addf %315, %316 : vector<2x16xf32>
    %318 = math.tanh %317 : vector<2x16xf32>
    %319 = arith.mulf %314, %318 : vector<2x16xf32>
    %cst_97 = arith.constant dense<0.000000e+00> : vector<2x64xf32>
    %320 = tpu.matmul %279, %16, %cst_97 {dimension_numbers = #tpu.dot_dimension_numbers<[1], [0], [0], [1], [0, 0, 1, 1], [], []>} : vector<2x16xf32>, vector<16x64xf32>, vector<2x64xf32> -> vector<2x64xf32>
    %321 = arith.addf %292, %320 : vector<2x64xf32>
    %322 = vector.extract_strided_slice %321 {offsets = [0, 0], sizes = [2, 16], strides = [1, 1]} : vector<2x64xf32> to vector<2x16xf32>
    %323 = arith.negf %322 : vector<2x16xf32>
    %324 = math.exp %323 : vector<2x16xf32>
    %cst_98 = arith.constant 1.000000e+00 : f32
    %325 = vector.broadcast %cst_98 : f32 to vector<2x16xf32>
    %326 = arith.addf %325, %324 : vector<2x16xf32>
    %327 = arith.divf %325, %326 : vector<2x16xf32>
    %328 = vector.extract_strided_slice %321 {offsets = [0, 16], sizes = [2, 16], strides = [1, 1]} : vector<2x64xf32> to vector<2x16xf32>
    %329 = arith.negf %328 : vector<2x16xf32>
    %330 = math.exp %329 : vector<2x16xf32>
    %cst_99 = arith.constant 1.000000e+00 : f32
    %331 = vector.broadcast %cst_99 : f32 to vector<2x16xf32>
    %332 = arith.addf %331, %330 : vector<2x16xf32>
    %333 = arith.divf %331, %332 : vector<2x16xf32>
    %334 = vector.extract_strided_slice %321 {offsets = [0, 32], sizes = [2, 16], strides = [1, 1]} : vector<2x64xf32> to vector<2x16xf32>
    %335 = math.tanh %334 : vector<2x16xf32>
    %336 = vector.extract_strided_slice %321 {offsets = [0, 48], sizes = [2, 16], strides = [1, 1]} : vector<2x64xf32> to vector<2x16xf32>
    %337 = arith.negf %336 : vector<2x16xf32>
    %338 = math.exp %337 : vector<2x16xf32>
    %cst_100 = arith.constant 1.000000e+00 : f32
    %339 = vector.broadcast %cst_100 : f32 to vector<2x16xf32>
    %340 = arith.addf %339, %338 : vector<2x16xf32>
    %341 = arith.divf %339, %340 : vector<2x16xf32>
    %342 = arith.mulf %333, %277 : vector<2x16xf32>
    %343 = arith.mulf %327, %335 : vector<2x16xf32>
    %344 = arith.addf %342, %343 : vector<2x16xf32>
    %345 = math.tanh %344 : vector<2x16xf32>
    %346 = arith.mulf %341, %345 : vector<2x16xf32>
    %c2_i32_101 = arith.constant 2 : i32
    %347 = arith.muli %c4_i32, %c2_i32_101 : i32
    %348 = arith.index_cast %347 : i32 to index
    %c0_102 = arith.constant 0 : index
    %349 = vector.load %arg9[%348, %c0_102] : memref<16x16xf32, #tpu.memory_space<vmem>>, vector<2x16xf32>
    tpu.vector_store %arg9[%348, %c0_102], %319 {strides = array<i32>} : memref<16x16xf32, #tpu.memory_space<vmem>>, vector<2x16xf32>,
    %c2_i32_103 = arith.constant 2 : i32
    %350 = arith.muli %286, %c2_i32_103 : i32
    %351 = arith.index_cast %350 : i32 to index
    %c0_104 = arith.constant 0 : index
    %352 = vector.load %arg10[%351, %c0_104] : memref<16x16xf32, #tpu.memory_space<vmem>>, vector<2x16xf32>
    tpu.vector_store %arg10[%351, %c0_104], %346 {strides = array<i32>} : memref<16x16xf32, #tpu.memory_space<vmem>>, vector<2x16xf32>,
    %c5_i32 = arith.constant 5 : i32
    %c7_i32_105 = arith.constant 7 : i32
    %353 = arith.subi %c7_i32_105, %c5_i32 : i32
    %c2_i32_106 = arith.constant 2 : i32
    %354 = arith.muli %c5_i32, %c2_i32_106 : i32
    %355 = arith.index_cast %354 : i32 to index
    %c0_107 = arith.constant 0 : index
    %356 = vector.load %arg11[%355, %c0_107] : memref<16x128xf32, #tpu.memory_space<vmem>>, vector<2x64xf32>
    %c2_i32_108 = arith.constant 2 : i32
    %357 = arith.muli %353, %c2_i32_108 : i32
    %358 = arith.index_cast %357 : i32 to index
    %c64_109 = arith.constant 64 : index
    %359 = vector.load %arg11[%358, %c64_109] : memref<16x128xf32, #tpu.memory_space<vmem>>, vector<2x64xf32>
    %cst_110 = arith.constant dense<0.000000e+00> : vector<2x64xf32>
    %360 = tpu.matmul %319, %15, %cst_110 {dimension_numbers = #tpu.dot_dimension_numbers<[1], [0], [0], [1], [0, 0, 1, 1], [], []>} : vector<2x16xf32>, vector<16x64xf32>, vector<2x64xf32> -> vector<2x64xf32>
    %361 = arith.addf %356, %360 : vector<2x64xf32>
    %362 = vector.extract_strided_slice %361 {offsets = [0, 0], sizes = [2, 16], strides = [1, 1]} : vector<2x64xf32> to vector<2x16xf32>
    %363 = arith.negf %362 : vector<2x16xf32>
    %364 = math.exp %363 : vector<2x16xf32>
    %cst_111 = arith.constant 1.000000e+00 : f32
    %365 = vector.broadcast %cst_111 : f32 to vector<2x16xf32>
    %366 = arith.addf %365, %364 : vector<2x16xf32>
    %367 = arith.divf %365, %366 : vector<2x16xf32>
    %368 = vector.extract_strided_slice %361 {offsets = [0, 16], sizes = [2, 16], strides = [1, 1]} : vector<2x64xf32> to vector<2x16xf32>
    %369 = arith.negf %368 : vector<2x16xf32>
    %370 = math.exp %369 : vector<2x16xf32>
    %cst_112 = arith.constant 1.000000e+00 : f32
    %371 = vector.broadcast %cst_112 : f32 to vector<2x16xf32>
    %372 = arith.addf %371, %370 : vector<2x16xf32>
    %373 = arith.divf %371, %372 : vector<2x16xf32>
    %374 = vector.extract_strided_slice %361 {offsets = [0, 32], sizes = [2, 16], strides = [1, 1]} : vector<2x64xf32> to vector<2x16xf32>
    %375 = math.tanh %374 : vector<2x16xf32>
    %376 = vector.extract_strided_slice %361 {offsets = [0, 48], sizes = [2, 16], strides = [1, 1]} : vector<2x64xf32> to vector<2x16xf32>
    %377 = arith.negf %376 : vector<2x16xf32>
    %378 = math.exp %377 : vector<2x16xf32>
    %cst_113 = arith.constant 1.000000e+00 : f32
    %379 = vector.broadcast %cst_113 : f32 to vector<2x16xf32>
    %380 = arith.addf %379, %378 : vector<2x16xf32>
    %381 = arith.divf %379, %380 : vector<2x16xf32>
    %382 = arith.mulf %373, %317 : vector<2x16xf32>
    %383 = arith.mulf %367, %375 : vector<2x16xf32>
    %384 = arith.addf %382, %383 : vector<2x16xf32>
    %385 = math.tanh %384 : vector<2x16xf32>
    %386 = arith.mulf %381, %385 : vector<2x16xf32>
    %cst_114 = arith.constant dense<0.000000e+00> : vector<2x64xf32>
    %387 = tpu.matmul %346, %16, %cst_114 {dimension_numbers = #tpu.dot_dimension_numbers<[1], [0], [0], [1], [0, 0, 1, 1], [], []>} : vector<2x16xf32>, vector<16x64xf32>, vector<2x64xf32> -> vector<2x64xf32>
    %388 = arith.addf %359, %387 : vector<2x64xf32>
    %389 = vector.extract_strided_slice %388 {offsets = [0, 0], sizes = [2, 16], strides = [1, 1]} : vector<2x64xf32> to vector<2x16xf32>
    %390 = arith.negf %389 : vector<2x16xf32>
    %391 = math.exp %390 : vector<2x16xf32>
    %cst_115 = arith.constant 1.000000e+00 : f32
    %392 = vector.broadcast %cst_115 : f32 to vector<2x16xf32>
    %393 = arith.addf %392, %391 : vector<2x16xf32>
    %394 = arith.divf %392, %393 : vector<2x16xf32>
    %395 = vector.extract_strided_slice %388 {offsets = [0, 16], sizes = [2, 16], strides = [1, 1]} : vector<2x64xf32> to vector<2x16xf32>
    %396 = arith.negf %395 : vector<2x16xf32>
    %397 = math.exp %396 : vector<2x16xf32>
    %cst_116 = arith.constant 1.000000e+00 : f32
    %398 = vector.broadcast %cst_116 : f32 to vector<2x16xf32>
    %399 = arith.addf %398, %397 : vector<2x16xf32>
    %400 = arith.divf %398, %399 : vector<2x16xf32>
    %401 = vector.extract_strided_slice %388 {offsets = [0, 32], sizes = [2, 16], strides = [1, 1]} : vector<2x64xf32> to vector<2x16xf32>
    %402 = math.tanh %401 : vector<2x16xf32>
    %403 = vector.extract_strided_slice %388 {offsets = [0, 48], sizes = [2, 16], strides = [1, 1]} : vector<2x64xf32> to vector<2x16xf32>
    %404 = arith.negf %403 : vector<2x16xf32>
    %405 = math.exp %404 : vector<2x16xf32>
    %cst_117 = arith.constant 1.000000e+00 : f32
    %406 = vector.broadcast %cst_117 : f32 to vector<2x16xf32>
    %407 = arith.addf %406, %405 : vector<2x16xf32>
    %408 = arith.divf %406, %407 : vector<2x16xf32>
    %409 = arith.mulf %400, %344 : vector<2x16xf32>
    %410 = arith.mulf %394, %402 : vector<2x16xf32>
    %411 = arith.addf %409, %410 : vector<2x16xf32>
    %412 = math.tanh %411 : vector<2x16xf32>
    %413 = arith.mulf %408, %412 : vector<2x16xf32>
    %c2_i32_118 = arith.constant 2 : i32
    %414 = arith.muli %c5_i32, %c2_i32_118 : i32
    %415 = arith.index_cast %414 : i32 to index
    %c0_119 = arith.constant 0 : index
    %416 = vector.load %arg9[%415, %c0_119] : memref<16x16xf32, #tpu.memory_space<vmem>>, vector<2x16xf32>
    tpu.vector_store %arg9[%415, %c0_119], %386 {strides = array<i32>} : memref<16x16xf32, #tpu.memory_space<vmem>>, vector<2x16xf32>,
    %c2_i32_120 = arith.constant 2 : i32
    %417 = arith.muli %353, %c2_i32_120 : i32
    %418 = arith.index_cast %417 : i32 to index
    %c0_121 = arith.constant 0 : index
    %419 = vector.load %arg10[%418, %c0_121] : memref<16x16xf32, #tpu.memory_space<vmem>>, vector<2x16xf32>
    tpu.vector_store %arg10[%418, %c0_121], %413 {strides = array<i32>} : memref<16x16xf32, #tpu.memory_space<vmem>>, vector<2x16xf32>,
    %c6_i32 = arith.constant 6 : i32
    %c7_i32_122 = arith.constant 7 : i32
    %420 = arith.subi %c7_i32_122, %c6_i32 : i32
    %c2_i32_123 = arith.constant 2 : i32
    %421 = arith.muli %c6_i32, %c2_i32_123 : i32
    %422 = arith.index_cast %421 : i32 to index
    %c0_124 = arith.constant 0 : index
    %423 = vector.load %arg11[%422, %c0_124] : memref<16x128xf32, #tpu.memory_space<vmem>>, vector<2x64xf32>
    %c2_i32_125 = arith.constant 2 : i32
    %424 = arith.muli %420, %c2_i32_125 : i32
    %425 = arith.index_cast %424 : i32 to index
    %c64_126 = arith.constant 64 : index
    %426 = vector.load %arg11[%425, %c64_126] : memref<16x128xf32, #tpu.memory_space<vmem>>, vector<2x64xf32>
    %cst_127 = arith.constant dense<0.000000e+00> : vector<2x64xf32>
    %427 = tpu.matmul %386, %15, %cst_127 {dimension_numbers = #tpu.dot_dimension_numbers<[1], [0], [0], [1], [0, 0, 1, 1], [], []>} : vector<2x16xf32>, vector<16x64xf32>, vector<2x64xf32> -> vector<2x64xf32>
    %428 = arith.addf %423, %427 : vector<2x64xf32>
    %429 = vector.extract_strided_slice %428 {offsets = [0, 0], sizes = [2, 16], strides = [1, 1]} : vector<2x64xf32> to vector<2x16xf32>
    %430 = arith.negf %429 : vector<2x16xf32>
    %431 = math.exp %430 : vector<2x16xf32>
    %cst_128 = arith.constant 1.000000e+00 : f32
    %432 = vector.broadcast %cst_128 : f32 to vector<2x16xf32>
    %433 = arith.addf %432, %431 : vector<2x16xf32>
    %434 = arith.divf %432, %433 : vector<2x16xf32>
    %435 = vector.extract_strided_slice %428 {offsets = [0, 16], sizes = [2, 16], strides = [1, 1]} : vector<2x64xf32> to vector<2x16xf32>
    %436 = arith.negf %435 : vector<2x16xf32>
    %437 = math.exp %436 : vector<2x16xf32>
    %cst_129 = arith.constant 1.000000e+00 : f32
    %438 = vector.broadcast %cst_129 : f32 to vector<2x16xf32>
    %439 = arith.addf %438, %437 : vector<2x16xf32>
    %440 = arith.divf %438, %439 : vector<2x16xf32>
    %441 = vector.extract_strided_slice %428 {offsets = [0, 32], sizes = [2, 16], strides = [1, 1]} : vector<2x64xf32> to vector<2x16xf32>
    %442 = math.tanh %441 : vector<2x16xf32>
    %443 = vector.extract_strided_slice %428 {offsets = [0, 48], sizes = [2, 16], strides = [1, 1]} : vector<2x64xf32> to vector<2x16xf32>
    %444 = arith.negf %443 : vector<2x16xf32>
    %445 = math.exp %444 : vector<2x16xf32>
    %cst_130 = arith.constant 1.000000e+00 : f32
    %446 = vector.broadcast %cst_130 : f32 to vector<2x16xf32>
    %447 = arith.addf %446, %445 : vector<2x16xf32>
    %448 = arith.divf %446, %447 : vector<2x16xf32>
    %449 = arith.mulf %440, %384 : vector<2x16xf32>
    %450 = arith.mulf %434, %442 : vector<2x16xf32>
    %451 = arith.addf %449, %450 : vector<2x16xf32>
    %452 = math.tanh %451 : vector<2x16xf32>
    %453 = arith.mulf %448, %452 : vector<2x16xf32>
    %cst_131 = arith.constant dense<0.000000e+00> : vector<2x64xf32>
    %454 = tpu.matmul %413, %16, %cst_131 {dimension_numbers = #tpu.dot_dimension_numbers<[1], [0], [0], [1], [0, 0, 1, 1], [], []>} : vector<2x16xf32>, vector<16x64xf32>, vector<2x64xf32> -> vector<2x64xf32>
    %455 = arith.addf %426, %454 : vector<2x64xf32>
    %456 = vector.extract_strided_slice %455 {offsets = [0, 0], sizes = [2, 16], strides = [1, 1]} : vector<2x64xf32> to vector<2x16xf32>
    %457 = arith.negf %456 : vector<2x16xf32>
    %458 = math.exp %457 : vector<2x16xf32>
    %cst_132 = arith.constant 1.000000e+00 : f32
    %459 = vector.broadcast %cst_132 : f32 to vector<2x16xf32>
    %460 = arith.addf %459, %458 : vector<2x16xf32>
    %461 = arith.divf %459, %460 : vector<2x16xf32>
    %462 = vector.extract_strided_slice %455 {offsets = [0, 16], sizes = [2, 16], strides = [1, 1]} : vector<2x64xf32> to vector<2x16xf32>
    %463 = arith.negf %462 : vector<2x16xf32>
    %464 = math.exp %463 : vector<2x16xf32>
    %cst_133 = arith.constant 1.000000e+00 : f32
    %465 = vector.broadcast %cst_133 : f32 to vector<2x16xf32>
    %466 = arith.addf %465, %464 : vector<2x16xf32>
    %467 = arith.divf %465, %466 : vector<2x16xf32>
    %468 = vector.extract_strided_slice %455 {offsets = [0, 32], sizes = [2, 16], strides = [1, 1]} : vector<2x64xf32> to vector<2x16xf32>
    %469 = math.tanh %468 : vector<2x16xf32>
    %470 = vector.extract_strided_slice %455 {offsets = [0, 48], sizes = [2, 16], strides = [1, 1]} : vector<2x64xf32> to vector<2x16xf32>
    %471 = arith.negf %470 : vector<2x16xf32>
    %472 = math.exp %471 : vector<2x16xf32>
    %cst_134 = arith.constant 1.000000e+00 : f32
    %473 = vector.broadcast %cst_134 : f32 to vector<2x16xf32>
    %474 = arith.addf %473, %472 : vector<2x16xf32>
    %475 = arith.divf %473, %474 : vector<2x16xf32>
    %476 = arith.mulf %467, %411 : vector<2x16xf32>
    %477 = arith.mulf %461, %469 : vector<2x16xf32>
    %478 = arith.addf %476, %477 : vector<2x16xf32>
    %479 = math.tanh %478 : vector<2x16xf32>
    %480 = arith.mulf %475, %479 : vector<2x16xf32>
    %c2_i32_135 = arith.constant 2 : i32
    %481 = arith.muli %c6_i32, %c2_i32_135 : i32
    %482 = arith.index_cast %481 : i32 to index
    %c0_136 = arith.constant 0 : index
    %483 = vector.load %arg9[%482, %c0_136] : memref<16x16xf32, #tpu.memory_space<vmem>>, vector<2x16xf32>
    tpu.vector_store %arg9[%482, %c0_136], %453 {strides = array<i32>} : memref<16x16xf32, #tpu.memory_space<vmem>>, vector<2x16xf32>,
    %c2_i32_137 = arith.constant 2 : i32
    %484 = arith.muli %420, %c2_i32_137 : i32
    %485 = arith.index_cast %484 : i32 to index
    %c0_138 = arith.constant 0 : index
    %486 = vector.load %arg10[%485, %c0_138] : memref<16x16xf32, #tpu.memory_space<vmem>>, vector<2x16xf32>
    tpu.vector_store %arg10[%485, %c0_138], %480 {strides = array<i32>} : memref<16x16xf32, #tpu.memory_space<vmem>>, vector<2x16xf32>,
    %c7_i32_139 = arith.constant 7 : i32
    %c7_i32_140 = arith.constant 7 : i32
    %487 = arith.subi %c7_i32_140, %c7_i32_139 : i32
    %c2_i32_141 = arith.constant 2 : i32
    %488 = arith.muli %c7_i32_139, %c2_i32_141 : i32
    %489 = arith.index_cast %488 : i32 to index
    %c0_142 = arith.constant 0 : index
    %490 = vector.load %arg11[%489, %c0_142] : memref<16x128xf32, #tpu.memory_space<vmem>>, vector<2x64xf32>
    %c2_i32_143 = arith.constant 2 : i32
    %491 = arith.muli %487, %c2_i32_143 : i32
    %492 = arith.index_cast %491 : i32 to index
    %c64_144 = arith.constant 64 : index
    %493 = vector.load %arg11[%492, %c64_144] : memref<16x128xf32, #tpu.memory_space<vmem>>, vector<2x64xf32>
    %cst_145 = arith.constant dense<0.000000e+00> : vector<2x64xf32>
    %494 = tpu.matmul %453, %15, %cst_145 {dimension_numbers = #tpu.dot_dimension_numbers<[1], [0], [0], [1], [0, 0, 1, 1], [], []>} : vector<2x16xf32>, vector<16x64xf32>, vector<2x64xf32> -> vector<2x64xf32>
    %495 = arith.addf %490, %494 : vector<2x64xf32>
    %496 = vector.extract_strided_slice %495 {offsets = [0, 0], sizes = [2, 16], strides = [1, 1]} : vector<2x64xf32> to vector<2x16xf32>
    %497 = arith.negf %496 : vector<2x16xf32>
    %498 = math.exp %497 : vector<2x16xf32>
    %cst_146 = arith.constant 1.000000e+00 : f32
    %499 = vector.broadcast %cst_146 : f32 to vector<2x16xf32>
    %500 = arith.addf %499, %498 : vector<2x16xf32>
    %501 = arith.divf %499, %500 : vector<2x16xf32>
    %502 = vector.extract_strided_slice %495 {offsets = [0, 16], sizes = [2, 16], strides = [1, 1]} : vector<2x64xf32> to vector<2x16xf32>
    %503 = arith.negf %502 : vector<2x16xf32>
    %504 = math.exp %503 : vector<2x16xf32>
    %cst_147 = arith.constant 1.000000e+00 : f32
    %505 = vector.broadcast %cst_147 : f32 to vector<2x16xf32>
    %506 = arith.addf %505, %504 : vector<2x16xf32>
    %507 = arith.divf %505, %506 : vector<2x16xf32>
    %508 = vector.extract_strided_slice %495 {offsets = [0, 32], sizes = [2, 16], strides = [1, 1]} : vector<2x64xf32> to vector<2x16xf32>
    %509 = math.tanh %508 : vector<2x16xf32>
    %510 = vector.extract_strided_slice %495 {offsets = [0, 48], sizes = [2, 16], strides = [1, 1]} : vector<2x64xf32> to vector<2x16xf32>
    %511 = arith.negf %510 : vector<2x16xf32>
    %512 = math.exp %511 : vector<2x16xf32>
    %cst_148 = arith.constant 1.000000e+00 : f32
    %513 = vector.broadcast %cst_148 : f32 to vector<2x16xf32>
    %514 = arith.addf %513, %512 : vector<2x16xf32>
    %515 = arith.divf %513, %514 : vector<2x16xf32>
    %516 = arith.mulf %507, %451 : vector<2x16xf32>
    %517 = arith.mulf %501, %509 : vector<2x16xf32>
    %518 = arith.addf %516, %517 : vector<2x16xf32>
    %519 = math.tanh %518 : vector<2x16xf32>
    %520 = arith.mulf %515, %519 : vector<2x16xf32>
    %cst_149 = arith.constant dense<0.000000e+00> : vector<2x64xf32>
    %521 = tpu.matmul %480, %16, %cst_149 {dimension_numbers = #tpu.dot_dimension_numbers<[1], [0], [0], [1], [0, 0, 1, 1], [], []>} : vector<2x16xf32>, vector<16x64xf32>, vector<2x64xf32> -> vector<2x64xf32>
    %522 = arith.addf %493, %521 : vector<2x64xf32>
    %523 = vector.extract_strided_slice %522 {offsets = [0, 0], sizes = [2, 16], strides = [1, 1]} : vector<2x64xf32> to vector<2x16xf32>
    %524 = arith.negf %523 : vector<2x16xf32>
    %525 = math.exp %524 : vector<2x16xf32>
    %cst_150 = arith.constant 1.000000e+00 : f32
    %526 = vector.broadcast %cst_150 : f32 to vector<2x16xf32>
    %527 = arith.addf %526, %525 : vector<2x16xf32>
    %528 = arith.divf %526, %527 : vector<2x16xf32>
    %529 = vector.extract_strided_slice %522 {offsets = [0, 16], sizes = [2, 16], strides = [1, 1]} : vector<2x64xf32> to vector<2x16xf32>
    %530 = arith.negf %529 : vector<2x16xf32>
    %531 = math.exp %530 : vector<2x16xf32>
    %cst_151 = arith.constant 1.000000e+00 : f32
    %532 = vector.broadcast %cst_151 : f32 to vector<2x16xf32>
    %533 = arith.addf %532, %531 : vector<2x16xf32>
    %534 = arith.divf %532, %533 : vector<2x16xf32>
    %535 = vector.extract_strided_slice %522 {offsets = [0, 32], sizes = [2, 16], strides = [1, 1]} : vector<2x64xf32> to vector<2x16xf32>
    %536 = math.tanh %535 : vector<2x16xf32>
    %537 = vector.extract_strided_slice %522 {offsets = [0, 48], sizes = [2, 16], strides = [1, 1]} : vector<2x64xf32> to vector<2x16xf32>
    %538 = arith.negf %537 : vector<2x16xf32>
    %539 = math.exp %538 : vector<2x16xf32>
    %cst_152 = arith.constant 1.000000e+00 : f32
    %540 = vector.broadcast %cst_152 : f32 to vector<2x16xf32>
    %541 = arith.addf %540, %539 : vector<2x16xf32>
    %542 = arith.divf %540, %541 : vector<2x16xf32>
    %543 = arith.mulf %534, %478 : vector<2x16xf32>
    %544 = arith.mulf %528, %536 : vector<2x16xf32>
    %545 = arith.addf %543, %544 : vector<2x16xf32>
    %546 = math.tanh %545 : vector<2x16xf32>
    %547 = arith.mulf %542, %546 : vector<2x16xf32>
    %c2_i32_153 = arith.constant 2 : i32
    %548 = arith.muli %c7_i32_139, %c2_i32_153 : i32
    %549 = arith.index_cast %548 : i32 to index
    %c0_154 = arith.constant 0 : index
    %550 = vector.load %arg9[%549, %c0_154] : memref<16x16xf32, #tpu.memory_space<vmem>>, vector<2x16xf32>
    tpu.vector_store %arg9[%549, %c0_154], %520 {strides = array<i32>} : memref<16x16xf32, #tpu.memory_space<vmem>>, vector<2x16xf32>,
    %c2_i32_155 = arith.constant 2 : i32
    %551 = arith.muli %487, %c2_i32_155 : i32
    %552 = arith.index_cast %551 : i32 to index
    %c0_156 = arith.constant 0 : index
    %553 = vector.load %arg10[%552, %c0_156] : memref<16x16xf32, #tpu.memory_space<vmem>>, vector<2x16xf32>
    tpu.vector_store %arg10[%552, %c0_156], %547 {strides = array<i32>} : memref<16x16xf32, #tpu.memory_space<vmem>>, vector<2x16xf32>,
    %c8_i32 = arith.constant 8 : i32
    return
  }
}

module attributes {stable_mosaic.version = 11 : i64} {
  func.func @kernel(%arg0: memref<16x32xf32, #tpu.memory_space<vmem>>, %arg1: memref<32x128xf32, #tpu.memory_space<vmem>>, %arg2: memref<16x64xf32, #tpu.memory_space<vmem>>, %arg3: memref<16x64xf32, #tpu.memory_space<vmem>>, %arg4: memref<1x128xf32, #tpu.memory_space<vmem>>, %arg5: memref<16x16xf32, #tpu.memory_space<vmem>>, %arg6: memref<16x16xf32, #tpu.memory_space<vmem>>, %arg7: memref<16x128xf32, #tpu.memory_space<vmem>>) attributes {dimension_semantics = [], scalar_prefetch = 0 : i64, scratch_operands = 1 : i64, tpu.core_type = #tpu.core_type<tc>} {
    %c0 = arith.constant 0 : index
    %c0_0 = arith.constant 0 : index
    %0 = vector.load %arg0[%c0, %c0_0] : memref<16x32xf32, #tpu.memory_space<vmem>>, vector<16x32xf32>
    %c0_1 = arith.constant 0 : index
    %c0_2 = arith.constant 0 : index
    %1 = vector.load %arg1[%c0_1, %c0_2] : memref<32x128xf32, #tpu.memory_space<vmem>>, vector<32x128xf32>
    %cst = arith.constant dense<0.000000e+00> : vector<16x128xf32>
    %2 = tpu.matmul %0, %1, %cst {dimension_numbers = #tpu.dot_dimension_numbers<[1], [0], [0], [1], [0, 0, 1, 1], [], []>} : vector<16x32xf32>, vector<32x128xf32>, vector<16x128xf32> -> vector<16x128xf32>
    %c0_3 = arith.constant 0 : index
    %c0_4 = arith.constant 0 : index
    %3 = vector.load %arg4[%c0_3, %c0_4] : memref<1x128xf32, #tpu.memory_space<vmem>>, vector<1x128xf32>
    %4 = vector.broadcast %3 : vector<1x128xf32> to vector<16x128xf32>
    %5 = arith.addf %2, %4 : vector<16x128xf32>
    %c0_5 = arith.constant 0 : index
    %c0_6 = arith.constant 0 : index
    %6 = vector.load %arg7[%c0_5, %c0_6] : memref<16x128xf32, #tpu.memory_space<vmem>>, vector<16x128xf32>
    tpu.vector_store %arg7[%c0_5, %c0_6], %5 {strides = array<i32>} : memref<16x128xf32, #tpu.memory_space<vmem>>, vector<16x128xf32>,
    %c0_7 = arith.constant 0 : index
    %c0_8 = arith.constant 0 : index
    %7 = vector.load %arg2[%c0_7, %c0_8] : memref<16x64xf32, #tpu.memory_space<vmem>>, vector<16x64xf32>
    %c0_9 = arith.constant 0 : index
    %c0_10 = arith.constant 0 : index
    %8 = vector.load %arg3[%c0_9, %c0_10] : memref<16x64xf32, #tpu.memory_space<vmem>>, vector<16x64xf32>
    %cst_11 = arith.constant 0.000000e+00 : f32
    %9 = vector.broadcast %cst_11 : f32 to vector<2x16xf32>
    %c0_i32 = arith.constant 0 : i32
    %c7_i32 = arith.constant 7 : i32
    %10 = arith.subi %c7_i32, %c0_i32 : i32
    %c2_i32 = arith.constant 2 : i32
    %11 = arith.muli %c0_i32, %c2_i32 : i32
    %12 = arith.index_cast %11 : i32 to index
    %c0_12 = arith.constant 0 : index
    %13 = vector.load %arg7[%12, %c0_12] : memref<16x128xf32, #tpu.memory_space<vmem>>, vector<2x64xf32>
    %c2_i32_13 = arith.constant 2 : i32
    %14 = arith.muli %10, %c2_i32_13 : i32
    %15 = arith.index_cast %14 : i32 to index
    %c64 = arith.constant 64 : index
    %16 = vector.load %arg7[%15, %c64] : memref<16x128xf32, #tpu.memory_space<vmem>>, vector<2x64xf32>
    %cst_14 = arith.constant dense<0.000000e+00> : vector<2x64xf32>
    %17 = tpu.matmul %9, %7, %cst_14 {dimension_numbers = #tpu.dot_dimension_numbers<[1], [0], [0], [1], [0, 0, 1, 1], [], []>} : vector<2x16xf32>, vector<16x64xf32>, vector<2x64xf32> -> vector<2x64xf32>
    %18 = arith.addf %13, %17 : vector<2x64xf32>
    %19 = vector.extract_strided_slice %18 {offsets = [0, 0], sizes = [2, 16], strides = [1, 1]} : vector<2x64xf32> to vector<2x16xf32>
    %20 = arith.negf %19 : vector<2x16xf32>
    %21 = math.exp %20 : vector<2x16xf32>
    %cst_15 = arith.constant 1.000000e+00 : f32
    %22 = vector.broadcast %cst_15 : f32 to vector<2x16xf32>
    %23 = arith.addf %22, %21 : vector<2x16xf32>
    %24 = arith.divf %22, %23 : vector<2x16xf32>
    %25 = vector.extract_strided_slice %18 {offsets = [0, 16], sizes = [2, 16], strides = [1, 1]} : vector<2x64xf32> to vector<2x16xf32>
    %26 = arith.negf %25 : vector<2x16xf32>
    %27 = math.exp %26 : vector<2x16xf32>
    %cst_16 = arith.constant 1.000000e+00 : f32
    %28 = vector.broadcast %cst_16 : f32 to vector<2x16xf32>
    %29 = arith.addf %28, %27 : vector<2x16xf32>
    %30 = arith.divf %28, %29 : vector<2x16xf32>
    %31 = vector.extract_strided_slice %18 {offsets = [0, 32], sizes = [2, 16], strides = [1, 1]} : vector<2x64xf32> to vector<2x16xf32>
    %32 = math.tanh %31 : vector<2x16xf32>
    %33 = vector.extract_strided_slice %18 {offsets = [0, 48], sizes = [2, 16], strides = [1, 1]} : vector<2x64xf32> to vector<2x16xf32>
    %34 = arith.negf %33 : vector<2x16xf32>
    %35 = math.exp %34 : vector<2x16xf32>
    %cst_17 = arith.constant 1.000000e+00 : f32
    %36 = vector.broadcast %cst_17 : f32 to vector<2x16xf32>
    %37 = arith.addf %36, %35 : vector<2x16xf32>
    %38 = arith.divf %36, %37 : vector<2x16xf32>
    %39 = arith.mulf %30, %9 : vector<2x16xf32>
    %40 = arith.mulf %24, %32 : vector<2x16xf32>
    %41 = arith.addf %39, %40 : vector<2x16xf32>
    %42 = math.tanh %41 : vector<2x16xf32>
    %43 = arith.mulf %38, %42 : vector<2x16xf32>
    %cst_18 = arith.constant dense<0.000000e+00> : vector<2x64xf32>
    %44 = tpu.matmul %9, %8, %cst_18 {dimension_numbers = #tpu.dot_dimension_numbers<[1], [0], [0], [1], [0, 0, 1, 1], [], []>} : vector<2x16xf32>, vector<16x64xf32>, vector<2x64xf32> -> vector<2x64xf32>
    %45 = arith.addf %16, %44 : vector<2x64xf32>
    %46 = vector.extract_strided_slice %45 {offsets = [0, 0], sizes = [2, 16], strides = [1, 1]} : vector<2x64xf32> to vector<2x16xf32>
    %47 = arith.negf %46 : vector<2x16xf32>
    %48 = math.exp %47 : vector<2x16xf32>
    %cst_19 = arith.constant 1.000000e+00 : f32
    %49 = vector.broadcast %cst_19 : f32 to vector<2x16xf32>
    %50 = arith.addf %49, %48 : vector<2x16xf32>
    %51 = arith.divf %49, %50 : vector<2x16xf32>
    %52 = vector.extract_strided_slice %45 {offsets = [0, 16], sizes = [2, 16], strides = [1, 1]} : vector<2x64xf32> to vector<2x16xf32>
    %53 = arith.negf %52 : vector<2x16xf32>
    %54 = math.exp %53 : vector<2x16xf32>
    %cst_20 = arith.constant 1.000000e+00 : f32
    %55 = vector.broadcast %cst_20 : f32 to vector<2x16xf32>
    %56 = arith.addf %55, %54 : vector<2x16xf32>
    %57 = arith.divf %55, %56 : vector<2x16xf32>
    %58 = vector.extract_strided_slice %45 {offsets = [0, 32], sizes = [2, 16], strides = [1, 1]} : vector<2x64xf32> to vector<2x16xf32>
    %59 = math.tanh %58 : vector<2x16xf32>
    %60 = vector.extract_strided_slice %45 {offsets = [0, 48], sizes = [2, 16], strides = [1, 1]} : vector<2x64xf32> to vector<2x16xf32>
    %61 = arith.negf %60 : vector<2x16xf32>
    %62 = math.exp %61 : vector<2x16xf32>
    %cst_21 = arith.constant 1.000000e+00 : f32
    %63 = vector.broadcast %cst_21 : f32 to vector<2x16xf32>
    %64 = arith.addf %63, %62 : vector<2x16xf32>
    %65 = arith.divf %63, %64 : vector<2x16xf32>
    %66 = arith.mulf %57, %9 : vector<2x16xf32>
    %67 = arith.mulf %51, %59 : vector<2x16xf32>
    %68 = arith.addf %66, %67 : vector<2x16xf32>
    %69 = math.tanh %68 : vector<2x16xf32>
    %70 = arith.mulf %65, %69 : vector<2x16xf32>
    %c2_i32_22 = arith.constant 2 : i32
    %71 = arith.muli %c0_i32, %c2_i32_22 : i32
    %72 = arith.index_cast %71 : i32 to index
    %c0_23 = arith.constant 0 : index
    %73 = vector.load %arg5[%72, %c0_23] : memref<16x16xf32, #tpu.memory_space<vmem>>, vector<2x16xf32>
    tpu.vector_store %arg5[%72, %c0_23], %43 {strides = array<i32>} : memref<16x16xf32, #tpu.memory_space<vmem>>, vector<2x16xf32>,
    %c2_i32_24 = arith.constant 2 : i32
    %74 = arith.muli %10, %c2_i32_24 : i32
    %75 = arith.index_cast %74 : i32 to index
    %c0_25 = arith.constant 0 : index
    %76 = vector.load %arg6[%75, %c0_25] : memref<16x16xf32, #tpu.memory_space<vmem>>, vector<2x16xf32>
    tpu.vector_store %arg6[%75, %c0_25], %70 {strides = array<i32>} : memref<16x16xf32, #tpu.memory_space<vmem>>, vector<2x16xf32>,
    %c1_i32 = arith.constant 1 : i32
    %c7_i32_26 = arith.constant 7 : i32
    %77 = arith.subi %c7_i32_26, %c1_i32 : i32
    %c2_i32_27 = arith.constant 2 : i32
    %78 = arith.muli %c1_i32, %c2_i32_27 : i32
    %79 = arith.index_cast %78 : i32 to index
    %c0_28 = arith.constant 0 : index
    %80 = vector.load %arg7[%79, %c0_28] : memref<16x128xf32, #tpu.memory_space<vmem>>, vector<2x64xf32>
    %c2_i32_29 = arith.constant 2 : i32
    %81 = arith.muli %77, %c2_i32_29 : i32
    %82 = arith.index_cast %81 : i32 to index
    %c64_30 = arith.constant 64 : index
    %83 = vector.load %arg7[%82, %c64_30] : memref<16x128xf32, #tpu.memory_space<vmem>>, vector<2x64xf32>
    %cst_31 = arith.constant dense<0.000000e+00> : vector<2x64xf32>
    %84 = tpu.matmul %43, %7, %cst_31 {dimension_numbers = #tpu.dot_dimension_numbers<[1], [0], [0], [1], [0, 0, 1, 1], [], []>} : vector<2x16xf32>, vector<16x64xf32>, vector<2x64xf32> -> vector<2x64xf32>
    %85 = arith.addf %80, %84 : vector<2x64xf32>
    %86 = vector.extract_strided_slice %85 {offsets = [0, 0], sizes = [2, 16], strides = [1, 1]} : vector<2x64xf32> to vector<2x16xf32>
    %87 = arith.negf %86 : vector<2x16xf32>
    %88 = math.exp %87 : vector<2x16xf32>
    %cst_32 = arith.constant 1.000000e+00 : f32
    %89 = vector.broadcast %cst_32 : f32 to vector<2x16xf32>
    %90 = arith.addf %89, %88 : vector<2x16xf32>
    %91 = arith.divf %89, %90 : vector<2x16xf32>
    %92 = vector.extract_strided_slice %85 {offsets = [0, 16], sizes = [2, 16], strides = [1, 1]} : vector<2x64xf32> to vector<2x16xf32>
    %93 = arith.negf %92 : vector<2x16xf32>
    %94 = math.exp %93 : vector<2x16xf32>
    %cst_33 = arith.constant 1.000000e+00 : f32
    %95 = vector.broadcast %cst_33 : f32 to vector<2x16xf32>
    %96 = arith.addf %95, %94 : vector<2x16xf32>
    %97 = arith.divf %95, %96 : vector<2x16xf32>
    %98 = vector.extract_strided_slice %85 {offsets = [0, 32], sizes = [2, 16], strides = [1, 1]} : vector<2x64xf32> to vector<2x16xf32>
    %99 = math.tanh %98 : vector<2x16xf32>
    %100 = vector.extract_strided_slice %85 {offsets = [0, 48], sizes = [2, 16], strides = [1, 1]} : vector<2x64xf32> to vector<2x16xf32>
    %101 = arith.negf %100 : vector<2x16xf32>
    %102 = math.exp %101 : vector<2x16xf32>
    %cst_34 = arith.constant 1.000000e+00 : f32
    %103 = vector.broadcast %cst_34 : f32 to vector<2x16xf32>
    %104 = arith.addf %103, %102 : vector<2x16xf32>
    %105 = arith.divf %103, %104 : vector<2x16xf32>
    %106 = arith.mulf %97, %41 : vector<2x16xf32>
    %107 = arith.mulf %91, %99 : vector<2x16xf32>
    %108 = arith.addf %106, %107 : vector<2x16xf32>
    %109 = math.tanh %108 : vector<2x16xf32>
    %110 = arith.mulf %105, %109 : vector<2x16xf32>
    %cst_35 = arith.constant dense<0.000000e+00> : vector<2x64xf32>
    %111 = tpu.matmul %70, %8, %cst_35 {dimension_numbers = #tpu.dot_dimension_numbers<[1], [0], [0], [1], [0, 0, 1, 1], [], []>} : vector<2x16xf32>, vector<16x64xf32>, vector<2x64xf32> -> vector<2x64xf32>
    %112 = arith.addf %83, %111 : vector<2x64xf32>
    %113 = vector.extract_strided_slice %112 {offsets = [0, 0], sizes = [2, 16], strides = [1, 1]} : vector<2x64xf32> to vector<2x16xf32>
    %114 = arith.negf %113 : vector<2x16xf32>
    %115 = math.exp %114 : vector<2x16xf32>
    %cst_36 = arith.constant 1.000000e+00 : f32
    %116 = vector.broadcast %cst_36 : f32 to vector<2x16xf32>
    %117 = arith.addf %116, %115 : vector<2x16xf32>
    %118 = arith.divf %116, %117 : vector<2x16xf32>
    %119 = vector.extract_strided_slice %112 {offsets = [0, 16], sizes = [2, 16], strides = [1, 1]} : vector<2x64xf32> to vector<2x16xf32>
    %120 = arith.negf %119 : vector<2x16xf32>
    %121 = math.exp %120 : vector<2x16xf32>
    %cst_37 = arith.constant 1.000000e+00 : f32
    %122 = vector.broadcast %cst_37 : f32 to vector<2x16xf32>
    %123 = arith.addf %122, %121 : vector<2x16xf32>
    %124 = arith.divf %122, %123 : vector<2x16xf32>
    %125 = vector.extract_strided_slice %112 {offsets = [0, 32], sizes = [2, 16], strides = [1, 1]} : vector<2x64xf32> to vector<2x16xf32>
    %126 = math.tanh %125 : vector<2x16xf32>
    %127 = vector.extract_strided_slice %112 {offsets = [0, 48], sizes = [2, 16], strides = [1, 1]} : vector<2x64xf32> to vector<2x16xf32>
    %128 = arith.negf %127 : vector<2x16xf32>
    %129 = math.exp %128 : vector<2x16xf32>
    %cst_38 = arith.constant 1.000000e+00 : f32
    %130 = vector.broadcast %cst_38 : f32 to vector<2x16xf32>
    %131 = arith.addf %130, %129 : vector<2x16xf32>
    %132 = arith.divf %130, %131 : vector<2x16xf32>
    %133 = arith.mulf %124, %68 : vector<2x16xf32>
    %134 = arith.mulf %118, %126 : vector<2x16xf32>
    %135 = arith.addf %133, %134 : vector<2x16xf32>
    %136 = math.tanh %135 : vector<2x16xf32>
    %137 = arith.mulf %132, %136 : vector<2x16xf32>
    %c2_i32_39 = arith.constant 2 : i32
    %138 = arith.muli %c1_i32, %c2_i32_39 : i32
    %139 = arith.index_cast %138 : i32 to index
    %c0_40 = arith.constant 0 : index
    %140 = vector.load %arg5[%139, %c0_40] : memref<16x16xf32, #tpu.memory_space<vmem>>, vector<2x16xf32>
    tpu.vector_store %arg5[%139, %c0_40], %110 {strides = array<i32>} : memref<16x16xf32, #tpu.memory_space<vmem>>, vector<2x16xf32>,
    %c2_i32_41 = arith.constant 2 : i32
    %141 = arith.muli %77, %c2_i32_41 : i32
    %142 = arith.index_cast %141 : i32 to index
    %c0_42 = arith.constant 0 : index
    %143 = vector.load %arg6[%142, %c0_42] : memref<16x16xf32, #tpu.memory_space<vmem>>, vector<2x16xf32>
    tpu.vector_store %arg6[%142, %c0_42], %137 {strides = array<i32>} : memref<16x16xf32, #tpu.memory_space<vmem>>, vector<2x16xf32>,
    %c2_i32_43 = arith.constant 2 : i32
    %c7_i32_44 = arith.constant 7 : i32
    %144 = arith.subi %c7_i32_44, %c2_i32_43 : i32
    %c2_i32_45 = arith.constant 2 : i32
    %145 = arith.muli %c2_i32_43, %c2_i32_45 : i32
    %146 = arith.index_cast %145 : i32 to index
    %c0_46 = arith.constant 0 : index
    %147 = vector.load %arg7[%146, %c0_46] : memref<16x128xf32, #tpu.memory_space<vmem>>, vector<2x64xf32>
    %c2_i32_47 = arith.constant 2 : i32
    %148 = arith.muli %144, %c2_i32_47 : i32
    %149 = arith.index_cast %148 : i32 to index
    %c64_48 = arith.constant 64 : index
    %150 = vector.load %arg7[%149, %c64_48] : memref<16x128xf32, #tpu.memory_space<vmem>>, vector<2x64xf32>
    %cst_49 = arith.constant dense<0.000000e+00> : vector<2x64xf32>
    %151 = tpu.matmul %110, %7, %cst_49 {dimension_numbers = #tpu.dot_dimension_numbers<[1], [0], [0], [1], [0, 0, 1, 1], [], []>} : vector<2x16xf32>, vector<16x64xf32>, vector<2x64xf32> -> vector<2x64xf32>
    %152 = arith.addf %147, %151 : vector<2x64xf32>
    %153 = vector.extract_strided_slice %152 {offsets = [0, 0], sizes = [2, 16], strides = [1, 1]} : vector<2x64xf32> to vector<2x16xf32>
    %154 = arith.negf %153 : vector<2x16xf32>
    %155 = math.exp %154 : vector<2x16xf32>
    %cst_50 = arith.constant 1.000000e+00 : f32
    %156 = vector.broadcast %cst_50 : f32 to vector<2x16xf32>
    %157 = arith.addf %156, %155 : vector<2x16xf32>
    %158 = arith.divf %156, %157 : vector<2x16xf32>
    %159 = vector.extract_strided_slice %152 {offsets = [0, 16], sizes = [2, 16], strides = [1, 1]} : vector<2x64xf32> to vector<2x16xf32>
    %160 = arith.negf %159 : vector<2x16xf32>
    %161 = math.exp %160 : vector<2x16xf32>
    %cst_51 = arith.constant 1.000000e+00 : f32
    %162 = vector.broadcast %cst_51 : f32 to vector<2x16xf32>
    %163 = arith.addf %162, %161 : vector<2x16xf32>
    %164 = arith.divf %162, %163 : vector<2x16xf32>
    %165 = vector.extract_strided_slice %152 {offsets = [0, 32], sizes = [2, 16], strides = [1, 1]} : vector<2x64xf32> to vector<2x16xf32>
    %166 = math.tanh %165 : vector<2x16xf32>
    %167 = vector.extract_strided_slice %152 {offsets = [0, 48], sizes = [2, 16], strides = [1, 1]} : vector<2x64xf32> to vector<2x16xf32>
    %168 = arith.negf %167 : vector<2x16xf32>
    %169 = math.exp %168 : vector<2x16xf32>
    %cst_52 = arith.constant 1.000000e+00 : f32
    %170 = vector.broadcast %cst_52 : f32 to vector<2x16xf32>
    %171 = arith.addf %170, %169 : vector<2x16xf32>
    %172 = arith.divf %170, %171 : vector<2x16xf32>
    %173 = arith.mulf %164, %108 : vector<2x16xf32>
    %174 = arith.mulf %158, %166 : vector<2x16xf32>
    %175 = arith.addf %173, %174 : vector<2x16xf32>
    %176 = math.tanh %175 : vector<2x16xf32>
    %177 = arith.mulf %172, %176 : vector<2x16xf32>
    %cst_53 = arith.constant dense<0.000000e+00> : vector<2x64xf32>
    %178 = tpu.matmul %137, %8, %cst_53 {dimension_numbers = #tpu.dot_dimension_numbers<[1], [0], [0], [1], [0, 0, 1, 1], [], []>} : vector<2x16xf32>, vector<16x64xf32>, vector<2x64xf32> -> vector<2x64xf32>
    %179 = arith.addf %150, %178 : vector<2x64xf32>
    %180 = vector.extract_strided_slice %179 {offsets = [0, 0], sizes = [2, 16], strides = [1, 1]} : vector<2x64xf32> to vector<2x16xf32>
    %181 = arith.negf %180 : vector<2x16xf32>
    %182 = math.exp %181 : vector<2x16xf32>
    %cst_54 = arith.constant 1.000000e+00 : f32
    %183 = vector.broadcast %cst_54 : f32 to vector<2x16xf32>
    %184 = arith.addf %183, %182 : vector<2x16xf32>
    %185 = arith.divf %183, %184 : vector<2x16xf32>
    %186 = vector.extract_strided_slice %179 {offsets = [0, 16], sizes = [2, 16], strides = [1, 1]} : vector<2x64xf32> to vector<2x16xf32>
    %187 = arith.negf %186 : vector<2x16xf32>
    %188 = math.exp %187 : vector<2x16xf32>
    %cst_55 = arith.constant 1.000000e+00 : f32
    %189 = vector.broadcast %cst_55 : f32 to vector<2x16xf32>
    %190 = arith.addf %189, %188 : vector<2x16xf32>
    %191 = arith.divf %189, %190 : vector<2x16xf32>
    %192 = vector.extract_strided_slice %179 {offsets = [0, 32], sizes = [2, 16], strides = [1, 1]} : vector<2x64xf32> to vector<2x16xf32>
    %193 = math.tanh %192 : vector<2x16xf32>
    %194 = vector.extract_strided_slice %179 {offsets = [0, 48], sizes = [2, 16], strides = [1, 1]} : vector<2x64xf32> to vector<2x16xf32>
    %195 = arith.negf %194 : vector<2x16xf32>
    %196 = math.exp %195 : vector<2x16xf32>
    %cst_56 = arith.constant 1.000000e+00 : f32
    %197 = vector.broadcast %cst_56 : f32 to vector<2x16xf32>
    %198 = arith.addf %197, %196 : vector<2x16xf32>
    %199 = arith.divf %197, %198 : vector<2x16xf32>
    %200 = arith.mulf %191, %135 : vector<2x16xf32>
    %201 = arith.mulf %185, %193 : vector<2x16xf32>
    %202 = arith.addf %200, %201 : vector<2x16xf32>
    %203 = math.tanh %202 : vector<2x16xf32>
    %204 = arith.mulf %199, %203 : vector<2x16xf32>
    %c2_i32_57 = arith.constant 2 : i32
    %205 = arith.muli %c2_i32_43, %c2_i32_57 : i32
    %206 = arith.index_cast %205 : i32 to index
    %c0_58 = arith.constant 0 : index
    %207 = vector.load %arg5[%206, %c0_58] : memref<16x16xf32, #tpu.memory_space<vmem>>, vector<2x16xf32>
    tpu.vector_store %arg5[%206, %c0_58], %177 {strides = array<i32>} : memref<16x16xf32, #tpu.memory_space<vmem>>, vector<2x16xf32>,
    %c2_i32_59 = arith.constant 2 : i32
    %208 = arith.muli %144, %c2_i32_59 : i32
    %209 = arith.index_cast %208 : i32 to index
    %c0_60 = arith.constant 0 : index
    %210 = vector.load %arg6[%209, %c0_60] : memref<16x16xf32, #tpu.memory_space<vmem>>, vector<2x16xf32>
    tpu.vector_store %arg6[%209, %c0_60], %204 {strides = array<i32>} : memref<16x16xf32, #tpu.memory_space<vmem>>, vector<2x16xf32>,
    %c3_i32 = arith.constant 3 : i32
    %c7_i32_61 = arith.constant 7 : i32
    %211 = arith.subi %c7_i32_61, %c3_i32 : i32
    %c2_i32_62 = arith.constant 2 : i32
    %212 = arith.muli %c3_i32, %c2_i32_62 : i32
    %213 = arith.index_cast %212 : i32 to index
    %c0_63 = arith.constant 0 : index
    %214 = vector.load %arg7[%213, %c0_63] : memref<16x128xf32, #tpu.memory_space<vmem>>, vector<2x64xf32>
    %c2_i32_64 = arith.constant 2 : i32
    %215 = arith.muli %211, %c2_i32_64 : i32
    %216 = arith.index_cast %215 : i32 to index
    %c64_65 = arith.constant 64 : index
    %217 = vector.load %arg7[%216, %c64_65] : memref<16x128xf32, #tpu.memory_space<vmem>>, vector<2x64xf32>
    %cst_66 = arith.constant dense<0.000000e+00> : vector<2x64xf32>
    %218 = tpu.matmul %177, %7, %cst_66 {dimension_numbers = #tpu.dot_dimension_numbers<[1], [0], [0], [1], [0, 0, 1, 1], [], []>} : vector<2x16xf32>, vector<16x64xf32>, vector<2x64xf32> -> vector<2x64xf32>
    %219 = arith.addf %214, %218 : vector<2x64xf32>
    %220 = vector.extract_strided_slice %219 {offsets = [0, 0], sizes = [2, 16], strides = [1, 1]} : vector<2x64xf32> to vector<2x16xf32>
    %221 = arith.negf %220 : vector<2x16xf32>
    %222 = math.exp %221 : vector<2x16xf32>
    %cst_67 = arith.constant 1.000000e+00 : f32
    %223 = vector.broadcast %cst_67 : f32 to vector<2x16xf32>
    %224 = arith.addf %223, %222 : vector<2x16xf32>
    %225 = arith.divf %223, %224 : vector<2x16xf32>
    %226 = vector.extract_strided_slice %219 {offsets = [0, 16], sizes = [2, 16], strides = [1, 1]} : vector<2x64xf32> to vector<2x16xf32>
    %227 = arith.negf %226 : vector<2x16xf32>
    %228 = math.exp %227 : vector<2x16xf32>
    %cst_68 = arith.constant 1.000000e+00 : f32
    %229 = vector.broadcast %cst_68 : f32 to vector<2x16xf32>
    %230 = arith.addf %229, %228 : vector<2x16xf32>
    %231 = arith.divf %229, %230 : vector<2x16xf32>
    %232 = vector.extract_strided_slice %219 {offsets = [0, 32], sizes = [2, 16], strides = [1, 1]} : vector<2x64xf32> to vector<2x16xf32>
    %233 = math.tanh %232 : vector<2x16xf32>
    %234 = vector.extract_strided_slice %219 {offsets = [0, 48], sizes = [2, 16], strides = [1, 1]} : vector<2x64xf32> to vector<2x16xf32>
    %235 = arith.negf %234 : vector<2x16xf32>
    %236 = math.exp %235 : vector<2x16xf32>
    %cst_69 = arith.constant 1.000000e+00 : f32
    %237 = vector.broadcast %cst_69 : f32 to vector<2x16xf32>
    %238 = arith.addf %237, %236 : vector<2x16xf32>
    %239 = arith.divf %237, %238 : vector<2x16xf32>
    %240 = arith.mulf %231, %175 : vector<2x16xf32>
    %241 = arith.mulf %225, %233 : vector<2x16xf32>
    %242 = arith.addf %240, %241 : vector<2x16xf32>
    %243 = math.tanh %242 : vector<2x16xf32>
    %244 = arith.mulf %239, %243 : vector<2x16xf32>
    %cst_70 = arith.constant dense<0.000000e+00> : vector<2x64xf32>
    %245 = tpu.matmul %204, %8, %cst_70 {dimension_numbers = #tpu.dot_dimension_numbers<[1], [0], [0], [1], [0, 0, 1, 1], [], []>} : vector<2x16xf32>, vector<16x64xf32>, vector<2x64xf32> -> vector<2x64xf32>
    %246 = arith.addf %217, %245 : vector<2x64xf32>
    %247 = vector.extract_strided_slice %246 {offsets = [0, 0], sizes = [2, 16], strides = [1, 1]} : vector<2x64xf32> to vector<2x16xf32>
    %248 = arith.negf %247 : vector<2x16xf32>
    %249 = math.exp %248 : vector<2x16xf32>
    %cst_71 = arith.constant 1.000000e+00 : f32
    %250 = vector.broadcast %cst_71 : f32 to vector<2x16xf32>
    %251 = arith.addf %250, %249 : vector<2x16xf32>
    %252 = arith.divf %250, %251 : vector<2x16xf32>
    %253 = vector.extract_strided_slice %246 {offsets = [0, 16], sizes = [2, 16], strides = [1, 1]} : vector<2x64xf32> to vector<2x16xf32>
    %254 = arith.negf %253 : vector<2x16xf32>
    %255 = math.exp %254 : vector<2x16xf32>
    %cst_72 = arith.constant 1.000000e+00 : f32
    %256 = vector.broadcast %cst_72 : f32 to vector<2x16xf32>
    %257 = arith.addf %256, %255 : vector<2x16xf32>
    %258 = arith.divf %256, %257 : vector<2x16xf32>
    %259 = vector.extract_strided_slice %246 {offsets = [0, 32], sizes = [2, 16], strides = [1, 1]} : vector<2x64xf32> to vector<2x16xf32>
    %260 = math.tanh %259 : vector<2x16xf32>
    %261 = vector.extract_strided_slice %246 {offsets = [0, 48], sizes = [2, 16], strides = [1, 1]} : vector<2x64xf32> to vector<2x16xf32>
    %262 = arith.negf %261 : vector<2x16xf32>
    %263 = math.exp %262 : vector<2x16xf32>
    %cst_73 = arith.constant 1.000000e+00 : f32
    %264 = vector.broadcast %cst_73 : f32 to vector<2x16xf32>
    %265 = arith.addf %264, %263 : vector<2x16xf32>
    %266 = arith.divf %264, %265 : vector<2x16xf32>
    %267 = arith.mulf %258, %202 : vector<2x16xf32>
    %268 = arith.mulf %252, %260 : vector<2x16xf32>
    %269 = arith.addf %267, %268 : vector<2x16xf32>
    %270 = math.tanh %269 : vector<2x16xf32>
    %271 = arith.mulf %266, %270 : vector<2x16xf32>
    %c2_i32_74 = arith.constant 2 : i32
    %272 = arith.muli %c3_i32, %c2_i32_74 : i32
    %273 = arith.index_cast %272 : i32 to index
    %c0_75 = arith.constant 0 : index
    %274 = vector.load %arg5[%273, %c0_75] : memref<16x16xf32, #tpu.memory_space<vmem>>, vector<2x16xf32>
    tpu.vector_store %arg5[%273, %c0_75], %244 {strides = array<i32>} : memref<16x16xf32, #tpu.memory_space<vmem>>, vector<2x16xf32>,
    %c2_i32_76 = arith.constant 2 : i32
    %275 = arith.muli %211, %c2_i32_76 : i32
    %276 = arith.index_cast %275 : i32 to index
    %c0_77 = arith.constant 0 : index
    %277 = vector.load %arg6[%276, %c0_77] : memref<16x16xf32, #tpu.memory_space<vmem>>, vector<2x16xf32>
    tpu.vector_store %arg6[%276, %c0_77], %271 {strides = array<i32>} : memref<16x16xf32, #tpu.memory_space<vmem>>, vector<2x16xf32>,
    %c4_i32 = arith.constant 4 : i32
    %c7_i32_78 = arith.constant 7 : i32
    %278 = arith.subi %c7_i32_78, %c4_i32 : i32
    %c2_i32_79 = arith.constant 2 : i32
    %279 = arith.muli %c4_i32, %c2_i32_79 : i32
    %280 = arith.index_cast %279 : i32 to index
    %c0_80 = arith.constant 0 : index
    %281 = vector.load %arg7[%280, %c0_80] : memref<16x128xf32, #tpu.memory_space<vmem>>, vector<2x64xf32>
    %c2_i32_81 = arith.constant 2 : i32
    %282 = arith.muli %278, %c2_i32_81 : i32
    %283 = arith.index_cast %282 : i32 to index
    %c64_82 = arith.constant 64 : index
    %284 = vector.load %arg7[%283, %c64_82] : memref<16x128xf32, #tpu.memory_space<vmem>>, vector<2x64xf32>
    %cst_83 = arith.constant dense<0.000000e+00> : vector<2x64xf32>
    %285 = tpu.matmul %244, %7, %cst_83 {dimension_numbers = #tpu.dot_dimension_numbers<[1], [0], [0], [1], [0, 0, 1, 1], [], []>} : vector<2x16xf32>, vector<16x64xf32>, vector<2x64xf32> -> vector<2x64xf32>
    %286 = arith.addf %281, %285 : vector<2x64xf32>
    %287 = vector.extract_strided_slice %286 {offsets = [0, 0], sizes = [2, 16], strides = [1, 1]} : vector<2x64xf32> to vector<2x16xf32>
    %288 = arith.negf %287 : vector<2x16xf32>
    %289 = math.exp %288 : vector<2x16xf32>
    %cst_84 = arith.constant 1.000000e+00 : f32
    %290 = vector.broadcast %cst_84 : f32 to vector<2x16xf32>
    %291 = arith.addf %290, %289 : vector<2x16xf32>
    %292 = arith.divf %290, %291 : vector<2x16xf32>
    %293 = vector.extract_strided_slice %286 {offsets = [0, 16], sizes = [2, 16], strides = [1, 1]} : vector<2x64xf32> to vector<2x16xf32>
    %294 = arith.negf %293 : vector<2x16xf32>
    %295 = math.exp %294 : vector<2x16xf32>
    %cst_85 = arith.constant 1.000000e+00 : f32
    %296 = vector.broadcast %cst_85 : f32 to vector<2x16xf32>
    %297 = arith.addf %296, %295 : vector<2x16xf32>
    %298 = arith.divf %296, %297 : vector<2x16xf32>
    %299 = vector.extract_strided_slice %286 {offsets = [0, 32], sizes = [2, 16], strides = [1, 1]} : vector<2x64xf32> to vector<2x16xf32>
    %300 = math.tanh %299 : vector<2x16xf32>
    %301 = vector.extract_strided_slice %286 {offsets = [0, 48], sizes = [2, 16], strides = [1, 1]} : vector<2x64xf32> to vector<2x16xf32>
    %302 = arith.negf %301 : vector<2x16xf32>
    %303 = math.exp %302 : vector<2x16xf32>
    %cst_86 = arith.constant 1.000000e+00 : f32
    %304 = vector.broadcast %cst_86 : f32 to vector<2x16xf32>
    %305 = arith.addf %304, %303 : vector<2x16xf32>
    %306 = arith.divf %304, %305 : vector<2x16xf32>
    %307 = arith.mulf %298, %242 : vector<2x16xf32>
    %308 = arith.mulf %292, %300 : vector<2x16xf32>
    %309 = arith.addf %307, %308 : vector<2x16xf32>
    %310 = math.tanh %309 : vector<2x16xf32>
    %311 = arith.mulf %306, %310 : vector<2x16xf32>
    %cst_87 = arith.constant dense<0.000000e+00> : vector<2x64xf32>
    %312 = tpu.matmul %271, %8, %cst_87 {dimension_numbers = #tpu.dot_dimension_numbers<[1], [0], [0], [1], [0, 0, 1, 1], [], []>} : vector<2x16xf32>, vector<16x64xf32>, vector<2x64xf32> -> vector<2x64xf32>
    %313 = arith.addf %284, %312 : vector<2x64xf32>
    %314 = vector.extract_strided_slice %313 {offsets = [0, 0], sizes = [2, 16], strides = [1, 1]} : vector<2x64xf32> to vector<2x16xf32>
    %315 = arith.negf %314 : vector<2x16xf32>
    %316 = math.exp %315 : vector<2x16xf32>
    %cst_88 = arith.constant 1.000000e+00 : f32
    %317 = vector.broadcast %cst_88 : f32 to vector<2x16xf32>
    %318 = arith.addf %317, %316 : vector<2x16xf32>
    %319 = arith.divf %317, %318 : vector<2x16xf32>
    %320 = vector.extract_strided_slice %313 {offsets = [0, 16], sizes = [2, 16], strides = [1, 1]} : vector<2x64xf32> to vector<2x16xf32>
    %321 = arith.negf %320 : vector<2x16xf32>
    %322 = math.exp %321 : vector<2x16xf32>
    %cst_89 = arith.constant 1.000000e+00 : f32
    %323 = vector.broadcast %cst_89 : f32 to vector<2x16xf32>
    %324 = arith.addf %323, %322 : vector<2x16xf32>
    %325 = arith.divf %323, %324 : vector<2x16xf32>
    %326 = vector.extract_strided_slice %313 {offsets = [0, 32], sizes = [2, 16], strides = [1, 1]} : vector<2x64xf32> to vector<2x16xf32>
    %327 = math.tanh %326 : vector<2x16xf32>
    %328 = vector.extract_strided_slice %313 {offsets = [0, 48], sizes = [2, 16], strides = [1, 1]} : vector<2x64xf32> to vector<2x16xf32>
    %329 = arith.negf %328 : vector<2x16xf32>
    %330 = math.exp %329 : vector<2x16xf32>
    %cst_90 = arith.constant 1.000000e+00 : f32
    %331 = vector.broadcast %cst_90 : f32 to vector<2x16xf32>
    %332 = arith.addf %331, %330 : vector<2x16xf32>
    %333 = arith.divf %331, %332 : vector<2x16xf32>
    %334 = arith.mulf %325, %269 : vector<2x16xf32>
    %335 = arith.mulf %319, %327 : vector<2x16xf32>
    %336 = arith.addf %334, %335 : vector<2x16xf32>
    %337 = math.tanh %336 : vector<2x16xf32>
    %338 = arith.mulf %333, %337 : vector<2x16xf32>
    %c2_i32_91 = arith.constant 2 : i32
    %339 = arith.muli %c4_i32, %c2_i32_91 : i32
    %340 = arith.index_cast %339 : i32 to index
    %c0_92 = arith.constant 0 : index
    %341 = vector.load %arg5[%340, %c0_92] : memref<16x16xf32, #tpu.memory_space<vmem>>, vector<2x16xf32>
    tpu.vector_store %arg5[%340, %c0_92], %311 {strides = array<i32>} : memref<16x16xf32, #tpu.memory_space<vmem>>, vector<2x16xf32>,
    %c2_i32_93 = arith.constant 2 : i32
    %342 = arith.muli %278, %c2_i32_93 : i32
    %343 = arith.index_cast %342 : i32 to index
    %c0_94 = arith.constant 0 : index
    %344 = vector.load %arg6[%343, %c0_94] : memref<16x16xf32, #tpu.memory_space<vmem>>, vector<2x16xf32>
    tpu.vector_store %arg6[%343, %c0_94], %338 {strides = array<i32>} : memref<16x16xf32, #tpu.memory_space<vmem>>, vector<2x16xf32>,
    %c5_i32 = arith.constant 5 : i32
    %c7_i32_95 = arith.constant 7 : i32
    %345 = arith.subi %c7_i32_95, %c5_i32 : i32
    %c2_i32_96 = arith.constant 2 : i32
    %346 = arith.muli %c5_i32, %c2_i32_96 : i32
    %347 = arith.index_cast %346 : i32 to index
    %c0_97 = arith.constant 0 : index
    %348 = vector.load %arg7[%347, %c0_97] : memref<16x128xf32, #tpu.memory_space<vmem>>, vector<2x64xf32>
    %c2_i32_98 = arith.constant 2 : i32
    %349 = arith.muli %345, %c2_i32_98 : i32
    %350 = arith.index_cast %349 : i32 to index
    %c64_99 = arith.constant 64 : index
    %351 = vector.load %arg7[%350, %c64_99] : memref<16x128xf32, #tpu.memory_space<vmem>>, vector<2x64xf32>
    %cst_100 = arith.constant dense<0.000000e+00> : vector<2x64xf32>
    %352 = tpu.matmul %311, %7, %cst_100 {dimension_numbers = #tpu.dot_dimension_numbers<[1], [0], [0], [1], [0, 0, 1, 1], [], []>} : vector<2x16xf32>, vector<16x64xf32>, vector<2x64xf32> -> vector<2x64xf32>
    %353 = arith.addf %348, %352 : vector<2x64xf32>
    %354 = vector.extract_strided_slice %353 {offsets = [0, 0], sizes = [2, 16], strides = [1, 1]} : vector<2x64xf32> to vector<2x16xf32>
    %355 = arith.negf %354 : vector<2x16xf32>
    %356 = math.exp %355 : vector<2x16xf32>
    %cst_101 = arith.constant 1.000000e+00 : f32
    %357 = vector.broadcast %cst_101 : f32 to vector<2x16xf32>
    %358 = arith.addf %357, %356 : vector<2x16xf32>
    %359 = arith.divf %357, %358 : vector<2x16xf32>
    %360 = vector.extract_strided_slice %353 {offsets = [0, 16], sizes = [2, 16], strides = [1, 1]} : vector<2x64xf32> to vector<2x16xf32>
    %361 = arith.negf %360 : vector<2x16xf32>
    %362 = math.exp %361 : vector<2x16xf32>
    %cst_102 = arith.constant 1.000000e+00 : f32
    %363 = vector.broadcast %cst_102 : f32 to vector<2x16xf32>
    %364 = arith.addf %363, %362 : vector<2x16xf32>
    %365 = arith.divf %363, %364 : vector<2x16xf32>
    %366 = vector.extract_strided_slice %353 {offsets = [0, 32], sizes = [2, 16], strides = [1, 1]} : vector<2x64xf32> to vector<2x16xf32>
    %367 = math.tanh %366 : vector<2x16xf32>
    %368 = vector.extract_strided_slice %353 {offsets = [0, 48], sizes = [2, 16], strides = [1, 1]} : vector<2x64xf32> to vector<2x16xf32>
    %369 = arith.negf %368 : vector<2x16xf32>
    %370 = math.exp %369 : vector<2x16xf32>
    %cst_103 = arith.constant 1.000000e+00 : f32
    %371 = vector.broadcast %cst_103 : f32 to vector<2x16xf32>
    %372 = arith.addf %371, %370 : vector<2x16xf32>
    %373 = arith.divf %371, %372 : vector<2x16xf32>
    %374 = arith.mulf %365, %309 : vector<2x16xf32>
    %375 = arith.mulf %359, %367 : vector<2x16xf32>
    %376 = arith.addf %374, %375 : vector<2x16xf32>
    %377 = math.tanh %376 : vector<2x16xf32>
    %378 = arith.mulf %373, %377 : vector<2x16xf32>
    %cst_104 = arith.constant dense<0.000000e+00> : vector<2x64xf32>
    %379 = tpu.matmul %338, %8, %cst_104 {dimension_numbers = #tpu.dot_dimension_numbers<[1], [0], [0], [1], [0, 0, 1, 1], [], []>} : vector<2x16xf32>, vector<16x64xf32>, vector<2x64xf32> -> vector<2x64xf32>
    %380 = arith.addf %351, %379 : vector<2x64xf32>
    %381 = vector.extract_strided_slice %380 {offsets = [0, 0], sizes = [2, 16], strides = [1, 1]} : vector<2x64xf32> to vector<2x16xf32>
    %382 = arith.negf %381 : vector<2x16xf32>
    %383 = math.exp %382 : vector<2x16xf32>
    %cst_105 = arith.constant 1.000000e+00 : f32
    %384 = vector.broadcast %cst_105 : f32 to vector<2x16xf32>
    %385 = arith.addf %384, %383 : vector<2x16xf32>
    %386 = arith.divf %384, %385 : vector<2x16xf32>
    %387 = vector.extract_strided_slice %380 {offsets = [0, 16], sizes = [2, 16], strides = [1, 1]} : vector<2x64xf32> to vector<2x16xf32>
    %388 = arith.negf %387 : vector<2x16xf32>
    %389 = math.exp %388 : vector<2x16xf32>
    %cst_106 = arith.constant 1.000000e+00 : f32
    %390 = vector.broadcast %cst_106 : f32 to vector<2x16xf32>
    %391 = arith.addf %390, %389 : vector<2x16xf32>
    %392 = arith.divf %390, %391 : vector<2x16xf32>
    %393 = vector.extract_strided_slice %380 {offsets = [0, 32], sizes = [2, 16], strides = [1, 1]} : vector<2x64xf32> to vector<2x16xf32>
    %394 = math.tanh %393 : vector<2x16xf32>
    %395 = vector.extract_strided_slice %380 {offsets = [0, 48], sizes = [2, 16], strides = [1, 1]} : vector<2x64xf32> to vector<2x16xf32>
    %396 = arith.negf %395 : vector<2x16xf32>
    %397 = math.exp %396 : vector<2x16xf32>
    %cst_107 = arith.constant 1.000000e+00 : f32
    %398 = vector.broadcast %cst_107 : f32 to vector<2x16xf32>
    %399 = arith.addf %398, %397 : vector<2x16xf32>
    %400 = arith.divf %398, %399 : vector<2x16xf32>
    %401 = arith.mulf %392, %336 : vector<2x16xf32>
    %402 = arith.mulf %386, %394 : vector<2x16xf32>
    %403 = arith.addf %401, %402 : vector<2x16xf32>
    %404 = math.tanh %403 : vector<2x16xf32>
    %405 = arith.mulf %400, %404 : vector<2x16xf32>
    %c2_i32_108 = arith.constant 2 : i32
    %406 = arith.muli %c5_i32, %c2_i32_108 : i32
    %407 = arith.index_cast %406 : i32 to index
    %c0_109 = arith.constant 0 : index
    %408 = vector.load %arg5[%407, %c0_109] : memref<16x16xf32, #tpu.memory_space<vmem>>, vector<2x16xf32>
    tpu.vector_store %arg5[%407, %c0_109], %378 {strides = array<i32>} : memref<16x16xf32, #tpu.memory_space<vmem>>, vector<2x16xf32>,
    %c2_i32_110 = arith.constant 2 : i32
    %409 = arith.muli %345, %c2_i32_110 : i32
    %410 = arith.index_cast %409 : i32 to index
    %c0_111 = arith.constant 0 : index
    %411 = vector.load %arg6[%410, %c0_111] : memref<16x16xf32, #tpu.memory_space<vmem>>, vector<2x16xf32>
    tpu.vector_store %arg6[%410, %c0_111], %405 {strides = array<i32>} : memref<16x16xf32, #tpu.memory_space<vmem>>, vector<2x16xf32>,
    %c6_i32 = arith.constant 6 : i32
    %c7_i32_112 = arith.constant 7 : i32
    %412 = arith.subi %c7_i32_112, %c6_i32 : i32
    %c2_i32_113 = arith.constant 2 : i32
    %413 = arith.muli %c6_i32, %c2_i32_113 : i32
    %414 = arith.index_cast %413 : i32 to index
    %c0_114 = arith.constant 0 : index
    %415 = vector.load %arg7[%414, %c0_114] : memref<16x128xf32, #tpu.memory_space<vmem>>, vector<2x64xf32>
    %c2_i32_115 = arith.constant 2 : i32
    %416 = arith.muli %412, %c2_i32_115 : i32
    %417 = arith.index_cast %416 : i32 to index
    %c64_116 = arith.constant 64 : index
    %418 = vector.load %arg7[%417, %c64_116] : memref<16x128xf32, #tpu.memory_space<vmem>>, vector<2x64xf32>
    %cst_117 = arith.constant dense<0.000000e+00> : vector<2x64xf32>
    %419 = tpu.matmul %378, %7, %cst_117 {dimension_numbers = #tpu.dot_dimension_numbers<[1], [0], [0], [1], [0, 0, 1, 1], [], []>} : vector<2x16xf32>, vector<16x64xf32>, vector<2x64xf32> -> vector<2x64xf32>
    %420 = arith.addf %415, %419 : vector<2x64xf32>
    %421 = vector.extract_strided_slice %420 {offsets = [0, 0], sizes = [2, 16], strides = [1, 1]} : vector<2x64xf32> to vector<2x16xf32>
    %422 = arith.negf %421 : vector<2x16xf32>
    %423 = math.exp %422 : vector<2x16xf32>
    %cst_118 = arith.constant 1.000000e+00 : f32
    %424 = vector.broadcast %cst_118 : f32 to vector<2x16xf32>
    %425 = arith.addf %424, %423 : vector<2x16xf32>
    %426 = arith.divf %424, %425 : vector<2x16xf32>
    %427 = vector.extract_strided_slice %420 {offsets = [0, 16], sizes = [2, 16], strides = [1, 1]} : vector<2x64xf32> to vector<2x16xf32>
    %428 = arith.negf %427 : vector<2x16xf32>
    %429 = math.exp %428 : vector<2x16xf32>
    %cst_119 = arith.constant 1.000000e+00 : f32
    %430 = vector.broadcast %cst_119 : f32 to vector<2x16xf32>
    %431 = arith.addf %430, %429 : vector<2x16xf32>
    %432 = arith.divf %430, %431 : vector<2x16xf32>
    %433 = vector.extract_strided_slice %420 {offsets = [0, 32], sizes = [2, 16], strides = [1, 1]} : vector<2x64xf32> to vector<2x16xf32>
    %434 = math.tanh %433 : vector<2x16xf32>
    %435 = vector.extract_strided_slice %420 {offsets = [0, 48], sizes = [2, 16], strides = [1, 1]} : vector<2x64xf32> to vector<2x16xf32>
    %436 = arith.negf %435 : vector<2x16xf32>
    %437 = math.exp %436 : vector<2x16xf32>
    %cst_120 = arith.constant 1.000000e+00 : f32
    %438 = vector.broadcast %cst_120 : f32 to vector<2x16xf32>
    %439 = arith.addf %438, %437 : vector<2x16xf32>
    %440 = arith.divf %438, %439 : vector<2x16xf32>
    %441 = arith.mulf %432, %376 : vector<2x16xf32>
    %442 = arith.mulf %426, %434 : vector<2x16xf32>
    %443 = arith.addf %441, %442 : vector<2x16xf32>
    %444 = math.tanh %443 : vector<2x16xf32>
    %445 = arith.mulf %440, %444 : vector<2x16xf32>
    %cst_121 = arith.constant dense<0.000000e+00> : vector<2x64xf32>
    %446 = tpu.matmul %405, %8, %cst_121 {dimension_numbers = #tpu.dot_dimension_numbers<[1], [0], [0], [1], [0, 0, 1, 1], [], []>} : vector<2x16xf32>, vector<16x64xf32>, vector<2x64xf32> -> vector<2x64xf32>
    %447 = arith.addf %418, %446 : vector<2x64xf32>
    %448 = vector.extract_strided_slice %447 {offsets = [0, 0], sizes = [2, 16], strides = [1, 1]} : vector<2x64xf32> to vector<2x16xf32>
    %449 = arith.negf %448 : vector<2x16xf32>
    %450 = math.exp %449 : vector<2x16xf32>
    %cst_122 = arith.constant 1.000000e+00 : f32
    %451 = vector.broadcast %cst_122 : f32 to vector<2x16xf32>
    %452 = arith.addf %451, %450 : vector<2x16xf32>
    %453 = arith.divf %451, %452 : vector<2x16xf32>
    %454 = vector.extract_strided_slice %447 {offsets = [0, 16], sizes = [2, 16], strides = [1, 1]} : vector<2x64xf32> to vector<2x16xf32>
    %455 = arith.negf %454 : vector<2x16xf32>
    %456 = math.exp %455 : vector<2x16xf32>
    %cst_123 = arith.constant 1.000000e+00 : f32
    %457 = vector.broadcast %cst_123 : f32 to vector<2x16xf32>
    %458 = arith.addf %457, %456 : vector<2x16xf32>
    %459 = arith.divf %457, %458 : vector<2x16xf32>
    %460 = vector.extract_strided_slice %447 {offsets = [0, 32], sizes = [2, 16], strides = [1, 1]} : vector<2x64xf32> to vector<2x16xf32>
    %461 = math.tanh %460 : vector<2x16xf32>
    %462 = vector.extract_strided_slice %447 {offsets = [0, 48], sizes = [2, 16], strides = [1, 1]} : vector<2x64xf32> to vector<2x16xf32>
    %463 = arith.negf %462 : vector<2x16xf32>
    %464 = math.exp %463 : vector<2x16xf32>
    %cst_124 = arith.constant 1.000000e+00 : f32
    %465 = vector.broadcast %cst_124 : f32 to vector<2x16xf32>
    %466 = arith.addf %465, %464 : vector<2x16xf32>
    %467 = arith.divf %465, %466 : vector<2x16xf32>
    %468 = arith.mulf %459, %403 : vector<2x16xf32>
    %469 = arith.mulf %453, %461 : vector<2x16xf32>
    %470 = arith.addf %468, %469 : vector<2x16xf32>
    %471 = math.tanh %470 : vector<2x16xf32>
    %472 = arith.mulf %467, %471 : vector<2x16xf32>
    %c2_i32_125 = arith.constant 2 : i32
    %473 = arith.muli %c6_i32, %c2_i32_125 : i32
    %474 = arith.index_cast %473 : i32 to index
    %c0_126 = arith.constant 0 : index
    %475 = vector.load %arg5[%474, %c0_126] : memref<16x16xf32, #tpu.memory_space<vmem>>, vector<2x16xf32>
    tpu.vector_store %arg5[%474, %c0_126], %445 {strides = array<i32>} : memref<16x16xf32, #tpu.memory_space<vmem>>, vector<2x16xf32>,
    %c2_i32_127 = arith.constant 2 : i32
    %476 = arith.muli %412, %c2_i32_127 : i32
    %477 = arith.index_cast %476 : i32 to index
    %c0_128 = arith.constant 0 : index
    %478 = vector.load %arg6[%477, %c0_128] : memref<16x16xf32, #tpu.memory_space<vmem>>, vector<2x16xf32>
    tpu.vector_store %arg6[%477, %c0_128], %472 {strides = array<i32>} : memref<16x16xf32, #tpu.memory_space<vmem>>, vector<2x16xf32>,
    %c7_i32_129 = arith.constant 7 : i32
    %c7_i32_130 = arith.constant 7 : i32
    %479 = arith.subi %c7_i32_130, %c7_i32_129 : i32
    %c2_i32_131 = arith.constant 2 : i32
    %480 = arith.muli %c7_i32_129, %c2_i32_131 : i32
    %481 = arith.index_cast %480 : i32 to index
    %c0_132 = arith.constant 0 : index
    %482 = vector.load %arg7[%481, %c0_132] : memref<16x128xf32, #tpu.memory_space<vmem>>, vector<2x64xf32>
    %c2_i32_133 = arith.constant 2 : i32
    %483 = arith.muli %479, %c2_i32_133 : i32
    %484 = arith.index_cast %483 : i32 to index
    %c64_134 = arith.constant 64 : index
    %485 = vector.load %arg7[%484, %c64_134] : memref<16x128xf32, #tpu.memory_space<vmem>>, vector<2x64xf32>
    %cst_135 = arith.constant dense<0.000000e+00> : vector<2x64xf32>
    %486 = tpu.matmul %445, %7, %cst_135 {dimension_numbers = #tpu.dot_dimension_numbers<[1], [0], [0], [1], [0, 0, 1, 1], [], []>} : vector<2x16xf32>, vector<16x64xf32>, vector<2x64xf32> -> vector<2x64xf32>
    %487 = arith.addf %482, %486 : vector<2x64xf32>
    %488 = vector.extract_strided_slice %487 {offsets = [0, 0], sizes = [2, 16], strides = [1, 1]} : vector<2x64xf32> to vector<2x16xf32>
    %489 = arith.negf %488 : vector<2x16xf32>
    %490 = math.exp %489 : vector<2x16xf32>
    %cst_136 = arith.constant 1.000000e+00 : f32
    %491 = vector.broadcast %cst_136 : f32 to vector<2x16xf32>
    %492 = arith.addf %491, %490 : vector<2x16xf32>
    %493 = arith.divf %491, %492 : vector<2x16xf32>
    %494 = vector.extract_strided_slice %487 {offsets = [0, 16], sizes = [2, 16], strides = [1, 1]} : vector<2x64xf32> to vector<2x16xf32>
    %495 = arith.negf %494 : vector<2x16xf32>
    %496 = math.exp %495 : vector<2x16xf32>
    %cst_137 = arith.constant 1.000000e+00 : f32
    %497 = vector.broadcast %cst_137 : f32 to vector<2x16xf32>
    %498 = arith.addf %497, %496 : vector<2x16xf32>
    %499 = arith.divf %497, %498 : vector<2x16xf32>
    %500 = vector.extract_strided_slice %487 {offsets = [0, 32], sizes = [2, 16], strides = [1, 1]} : vector<2x64xf32> to vector<2x16xf32>
    %501 = math.tanh %500 : vector<2x16xf32>
    %502 = vector.extract_strided_slice %487 {offsets = [0, 48], sizes = [2, 16], strides = [1, 1]} : vector<2x64xf32> to vector<2x16xf32>
    %503 = arith.negf %502 : vector<2x16xf32>
    %504 = math.exp %503 : vector<2x16xf32>
    %cst_138 = arith.constant 1.000000e+00 : f32
    %505 = vector.broadcast %cst_138 : f32 to vector<2x16xf32>
    %506 = arith.addf %505, %504 : vector<2x16xf32>
    %507 = arith.divf %505, %506 : vector<2x16xf32>
    %508 = arith.mulf %499, %443 : vector<2x16xf32>
    %509 = arith.mulf %493, %501 : vector<2x16xf32>
    %510 = arith.addf %508, %509 : vector<2x16xf32>
    %511 = math.tanh %510 : vector<2x16xf32>
    %512 = arith.mulf %507, %511 : vector<2x16xf32>
    %cst_139 = arith.constant dense<0.000000e+00> : vector<2x64xf32>
    %513 = tpu.matmul %472, %8, %cst_139 {dimension_numbers = #tpu.dot_dimension_numbers<[1], [0], [0], [1], [0, 0, 1, 1], [], []>} : vector<2x16xf32>, vector<16x64xf32>, vector<2x64xf32> -> vector<2x64xf32>
    %514 = arith.addf %485, %513 : vector<2x64xf32>
    %515 = vector.extract_strided_slice %514 {offsets = [0, 0], sizes = [2, 16], strides = [1, 1]} : vector<2x64xf32> to vector<2x16xf32>
    %516 = arith.negf %515 : vector<2x16xf32>
    %517 = math.exp %516 : vector<2x16xf32>
    %cst_140 = arith.constant 1.000000e+00 : f32
    %518 = vector.broadcast %cst_140 : f32 to vector<2x16xf32>
    %519 = arith.addf %518, %517 : vector<2x16xf32>
    %520 = arith.divf %518, %519 : vector<2x16xf32>
    %521 = vector.extract_strided_slice %514 {offsets = [0, 16], sizes = [2, 16], strides = [1, 1]} : vector<2x64xf32> to vector<2x16xf32>
    %522 = arith.negf %521 : vector<2x16xf32>
    %523 = math.exp %522 : vector<2x16xf32>
    %cst_141 = arith.constant 1.000000e+00 : f32
    %524 = vector.broadcast %cst_141 : f32 to vector<2x16xf32>
    %525 = arith.addf %524, %523 : vector<2x16xf32>
    %526 = arith.divf %524, %525 : vector<2x16xf32>
    %527 = vector.extract_strided_slice %514 {offsets = [0, 32], sizes = [2, 16], strides = [1, 1]} : vector<2x64xf32> to vector<2x16xf32>
    %528 = math.tanh %527 : vector<2x16xf32>
    %529 = vector.extract_strided_slice %514 {offsets = [0, 48], sizes = [2, 16], strides = [1, 1]} : vector<2x64xf32> to vector<2x16xf32>
    %530 = arith.negf %529 : vector<2x16xf32>
    %531 = math.exp %530 : vector<2x16xf32>
    %cst_142 = arith.constant 1.000000e+00 : f32
    %532 = vector.broadcast %cst_142 : f32 to vector<2x16xf32>
    %533 = arith.addf %532, %531 : vector<2x16xf32>
    %534 = arith.divf %532, %533 : vector<2x16xf32>
    %535 = arith.mulf %526, %470 : vector<2x16xf32>
    %536 = arith.mulf %520, %528 : vector<2x16xf32>
    %537 = arith.addf %535, %536 : vector<2x16xf32>
    %538 = math.tanh %537 : vector<2x16xf32>
    %539 = arith.mulf %534, %538 : vector<2x16xf32>
    %c2_i32_143 = arith.constant 2 : i32
    %540 = arith.muli %c7_i32_129, %c2_i32_143 : i32
    %541 = arith.index_cast %540 : i32 to index
    %c0_144 = arith.constant 0 : index
    %542 = vector.load %arg5[%541, %c0_144] : memref<16x16xf32, #tpu.memory_space<vmem>>, vector<2x16xf32>
    tpu.vector_store %arg5[%541, %c0_144], %512 {strides = array<i32>} : memref<16x16xf32, #tpu.memory_space<vmem>>, vector<2x16xf32>,
    %c2_i32_145 = arith.constant 2 : i32
    %543 = arith.muli %479, %c2_i32_145 : i32
    %544 = arith.index_cast %543 : i32 to index
    %c0_146 = arith.constant 0 : index
    %545 = vector.load %arg6[%544, %c0_146] : memref<16x16xf32, #tpu.memory_space<vmem>>, vector<2x16xf32>
    tpu.vector_store %arg6[%544, %c0_146], %539 {strides = array<i32>} : memref<16x16xf32, #tpu.memory_space<vmem>>, vector<2x16xf32>,
    %c8_i32 = arith.constant 8 : i32
    return
  }
}

</mosaic_0001>

<bundles_post_ra>
// kernel: dc_lstm_forward.3
= control target key start
LH: loop header
LB: loop body
LE: loop exit
PB: predicated region body
PF: predicated region fallthrough
CT: control target
= control target key end

     0   :  { %v2214_v0 = vmov 0.0|0.0   ;;  %vm2215_vm0 = vmmov 0   ;;  %v2216_v4 = vmov 0.0   ;;  %vm35_vm1 = vcmask 261120   ;;  %s2217_s15 = smov 64   ;;  %s2218_s16 = smov 96   ;;  %s2532_s1 = inlined_call_operand.vmem [shape: f32[32,128], index: 1, kind: input, shape index: {}]   ;;  %s2533_s2 = inlined_call_operand.vmem [shape: f32[16,64], index: 2, kind: input, shape index: {}]   ;;  %s2534_s3 = inlined_call_operand.vmem [shape: f32[16,64], index: 3, kind: input, shape index: {}]   ;;  %s2535_s0 = inlined_call_operand.vmem [shape: f32[16,32], index: 0, kind: input, shape index: {}]   ;;  %s2536_s4 = inlined_call_operand.vmem [shape: f32[1,128], index: 4, kind: input, shape index: {}]   ;;  %s2537_s6 = inlined_call_operand.vmem [shape: f32[16,16], index: 6, kind: output, shape index: {1}]   ;;  %s2538_s5 = inlined_call_operand.vmem [shape: f32[16,16], index: 5, kind: output, shape index: {0}]  }
   0x1   :  { %2030 = vmatprep.subr.bf16.mxu1 %v2214_v0  ;;  %v24_v1 = vld [vmem:[%s2532_s1] sm:$0xff]  ;;  %v25_v2 = vld [vmem:[%s2532_s1 + $0x8] sm:$0xff]  ;;  %1914 = vmatprep.mubr.msk.f32.mxu1 %vm2215_vm0, %v2216_v4  ;;  %v26_v7 = vld [vmem:[%s2532_s1 + $0x10] sm:$0xff]  ;;  %s2220_s17 = smov 32   ;;  %vm327_vm2 = vcmask 123904   ;;  %vm125_vm3 = vcmask 130048  }
   0x2   :  { %v119_v3 = vld [vmem:[%s2533_s2] sm:$0xff]  ;;  %v2022_v5 = vpack.c.bf16 %v25_v2, %v24_v1  ;;  %v120_v6 = vld [vmem:[%s2533_s2 + $0x8] sm:$0xff]  ;;  %v27_v8 = vld [vmem:[%s2532_s1 + $0x18] sm:$0xff]  ;;  %s2221_s20 = smov 80  }
   0x3   :  { %v2278_v9 = vpack.c.bf16 %v120_v6, %v119_v3  ;;  %v2026_v10 = vpack.c.bf16 %v27_v8, %v26_v7  ;;  %v121_v11 = vld [vmem:[%s2534_s3] sm:$0xff]  ;;  %v122_v12 = vld [vmem:[%s2534_s3 + $0x8] sm:$0xff] }
   0x4   :  { %v22_v13 = vld [vmem:[%s2535_s0] sm:$0xff]  ;;  %2023 = vmatprep.subr.bf16.mxu0 %v2022_v5  ;;  %v2291_v14 = vpack.c.bf16 %v122_v12, %v121_v11  ;;  %v23_v15 = vld [vmem:[%s2535_s0 + $0x8] sm:$0xff] }
   0x5   :  { %1907 = vmatprep.mubr.msk.f32.mxu0 %vm35_vm1, %v22_v13  ;;  %2032 = vmatpush3.bf16.msra.mxu1 %v2278_v9  ;;  %v1812_v18 = vld [vmem:[%s2536_s4] ss:$0 sm:$0xff]  ;;  %s2219_s4 = smov 16  }
   0x6   :  { %2025 = vmatpush3.bf16.msra.mxu0 %v2022_v5  ;;  %2033 = vmatprep.subr.bf16.mxu1 %v2214_v0 }
   0x7   :  { %2027 = vmatprep.subr.bf16.mxu0 %v2026_v10 }
   0x8   :  { %1915 = vmatmul.mubr.f32.vlgmr.msra.gmra.mrb[0].mxu1 %v2216_v4 }
   0x9   :  { %2035 = vmatpush3.bf16.msra.mxu1 %v2291_v14  ;;  %1921 = vmatprep.mubr.msk.f32.mxu1 %vm2215_vm0, %v2216_v4 }
   0xa   :  { %2029 = vmatpush3.bf16.msra.mxu0 %v2026_v10  ;;  %2039 = vmatprep.subr.bf16.mxu1 %v2214_v0 }
   0xb   :  { %2036 = vmatprep.subr.bf16.mxu0 %v2214_v0 }
   0xc   :  { %1922 = vmatmul.mubr.f32.vlgmr.msra.gmra.mrb[2].mxu1 %v2216_v4 }
   0xd   :  { %1908 = vmatmul.mubr.msk.f32.vlgmr.msra.gmra.mrb[0].mxu0 %vm35_vm1, %v23_v15  ;;  %2041 = vmatpush3.bf16.msra.mxu1 %v2291_v14 }
   0xe   :  { %1935 = vmatprep.mubr.msk.f32.mxu1 %vm2215_vm0, %v2216_v4  ;;  %2038 = vmatpush3.bf16.msra.mxu0 %v2278_v9 }
   0xf   :  { %1928 = vmatprep.mubr.msk.f32.mxu0 %vm2215_vm0, %v2216_v4  ;;  %2045 = vmatprep.subr.bf16.mxu1 %v2214_v0 }
  0x10   :  { %2042 = vmatprep.subr.bf16.mxu0 %v2214_v0 }
  0xdb   :  { %v195_v16 = vpop.f32.mrb[0].mxu1 }
  0xdc   :  { %v1916_v17 = vpop.f32.mrb[1].mxu1 }
  0xdf   :  { %v290_v19 = vpop.f32.mrb[2].mxu1 }
  0xe0   :  { %v1909_v20 = vpop.f32.mrb[0].mxu0  ;;  %295 = vrot.lane.b32.xlu0 %v290_v19, %s2217_s15  ;;  %v1923_v22 = vpop.f32.mrb[3].mxu1 }
  0xe1   :  { %v114_v21 = vadd.f32 %v1909_v20, %v1812_v18  ;;  %v108_v23 = vpop.f32.mrb[1].mxu0 }
  0xe2   :  { %v109_v24 = vadd.f32 %v1812_v18, %v108_v23 }
  0xe3   :  { %118 = vst [vmem:[#allocation2 + $0x8] sm:$0xff] %v114_v21 }
  0xe4   :  { %117 = vst [vmem:[#allocation2] sm:$0xff] %v109_v24 }
  0xea   :  { %v124_v25 = vld [vmem:[#allocation2 + $0xe] sm:$0x3]  ;;  %v335_v60 = vld [vmem:[#allocation2 + $0xc] sm:$0x3] }
  0xeb   :  { %v123_v37 = vld [vmem:[#allocation2] sm:$0x3]  ;;  %v334_v15 = vld [vmem:[#allocation2 + $0x2] sm:$0x3] }
  0xec   :  { %v199_v39 = vadd.f32 %v195_v16, %v123_v37  ;;  %v545_v37 = vld [vmem:[#allocation2 + $0xa] sm:$0x3] }
  0xee   :  { %v1815_v42 = vmul.f32 -1.442695, %v199_v39 }
 0x152   :  { %v296_v26 = vpop.permute.xlu0 %295 }
 0x153   :  { %v298_v27 = vadd.f32 %v296_v26, %v124_v25 }
 0x155   :  { %2086 = vtanh.f32 %v298_v27  ;;  %v1816_v29 = vmul.f32 -1.442695, %v298_v27 }
 0x157   :  { %2088 = vpow2.f32 %v1816_v29 }
 0x15f   :  { %v2087_v28 = vpop.eup %2086 }
 0x160   :  { %308 = vrot.lane.b32.xlu0 %v2087_v28, %s2218_s16 }
 0x161   :  { %v2089_v30 = vpop.eup %2088 }
 0x162   :  { %v302_v31 = vadd.f32 1.0, %v2089_v30 }
 0x164   :  { %2090 = vrcp.f32 %v302_v31 }
 0x16e   :  { %v2091_v32 = vpop.eup %2090 }
 0x16f   :  { %v306_v35 = vmul.f32 0.0, %v2091_v32 }
 0x1d2   :  { %v309_v33 = vpop.permute.xlu0 %308 }
 0x1d3   :  { %v311_v34 = vmul.f32 %v2091_v32, %v309_v33 }
 0x1d5   :  { %313 = vrot.lane.b32.xlu1 %v311_v34, %s2219_s4 }
 0x247   :  { %v314_v36 = vpop.permute.xlu1 %313 }
 0x248   :  { %v2319_v38 = vadd.f32 %v314_v36, %v306_v35 }
 0x24a   :  { %2092 = vtanh.f32 %v2319_v38 }
 0x24b   :  { %2094 = vtanh.f32 %v199_v39 }
 0x24c   :  { %2096 = vpow2.f32 %v1815_v42 }
 0x254   :  { %v2093_v40 = vpop.eup %2092 }
 0x255   :  { %319 = vrot.lane.b32.xlu1 %v2093_v40, %s2220_s17  ;;  %v2095_v41 = vpop.eup %2094 }
 0x256   :  { %v2097_v43 = vpop.eup %2096 }
 0x257   :  { %v203_v44 = vadd.f32 1.0, %v2097_v43 }
 0x259   :  { %209 = vrot.lane.b32.xlu1 %v2095_v41, %s2218_s16  ;;  %2098 = vrcp.f32 %v203_v44 }
 0x263   :  { %v2099_v47 = vpop.eup %2098 }
 0x264   :  { %v207_v51 = vmul.f32 0.0, %v2099_v47 }
 0x2c7   :  { %v320_v45 = vpop.permute.xlu1 %319 }
 0x2c8   :  { %v322_v46 = vmul.f32 %v2091_v32, %v320_v45 }
 0x2ca   :  { %330 = vrot.lane.b32.xlu0 %v322_v46, %s2219_s4 }
 0x2cb   :  { %v210_v48 = vpop.permute.xlu1 %209 }
 0x2cc   :  { %v212_v49 = vmul.f32 %v2099_v47, %v210_v48 }
 0x2ce   :  { %214 = vrot.lane.b32.xlu1 %v212_v49, %s2219_s4 }
 0x33c   :  { %v331_v50 = vpop.permute.xlu0 %330 }
 0x33d   :  { %333 = vst.msk [vmem:[%s2537_s6 + $0xe] sm:$0x3] %vm327_vm2, %v331_v50  ;;  %1936 = vmatmul.mubr.msk.f32.vlgmr.msra.gmra.mrb[4].mxu1 %vm125_vm3, %v331_v50 }
 0x33e   :  { %2047 = vmatpush3.bf16.msra.mxu1 %v2291_v14  ;;  %1949 = vmatprep.mubr.msk.f32.mxu1 %vm2215_vm0, %v2216_v4 }
 0x33f   :  { %2051 = vmatprep.subr.bf16.mxu1 %v2214_v0 }
 0x340   :  { %v215_v52 = vpop.permute.xlu1 %214 }
 0x341   :  { %v2335_v53 = vadd.f32 %v215_v52, %v207_v51  ;;  %v544_v52 = vld [vmem:[#allocation2 + $0x4] sm:$0x3] }
 0x343   :  { %2100 = vtanh.f32 %v2335_v53 }
 0x34d   :  { %v2101_v54 = vpop.eup %2100 }
 0x34e   :  { %220 = vrot.lane.b32.xlu1 %v2101_v54, %s2220_s17 }
 0x3c0   :  { %v221_v55 = vpop.permute.xlu1 %220 }
 0x3c1   :  { %v223_v56 = vmul.f32 %v2099_v47, %v221_v55 }
 0x3c3   :  { %324 = vrot.lane.b32.xlu1 %v223_v56, %s2221_s20 }
 0x410   :  { %v501_v57 = vpop.f32.mrb[4].mxu1 }
 0x411   :  { %506 = vrot.lane.b32.xlu0 %v501_v57, %s2217_s15  ;;  %v1937_v58 = vpop.f32.mrb[5].mxu1 }
 0x435   :  { %v325_v59 = vpop.permute.xlu1 %324 }
 0x436   :  { %328 = vst.msk [vmem:[%s2538_s5] sm:$0x3] %vm327_vm2, %v325_v59  ;;  %1929 = vmatmul.mubr.msk.f32.vlgmr.msra.gmra.mrb[2].mxu0 %vm125_vm3, %v325_v59 }
 0x437   :  { %2044 = vmatpush3.bf16.msra.mxu0 %v2278_v9  ;;  %1942 = vmatprep.mubr.msk.f32.mxu0 %vm2215_vm0, %v2216_v4 }
 0x438   :  { %2048 = vmatprep.subr.bf16.mxu0 %v2214_v0 }
 0x483   :  { %v507_v61 = vpop.permute.xlu0 %506 }
 0x484   :  { %v509_v62 = vadd.f32 %v507_v61, %v335_v60 }
 0x486   :  { %2102 = vtanh.f32 %v509_v62  ;;  %v1820_v1 = vmul.f32 -1.442695, %v509_v62 }
 0x488   :  { %2104 = vpow2.f32 %v1820_v1 }
 0x490   :  { %v2103_v63 = vpop.eup %2102 }
 0x491   :  { %519 = vrot.lane.b32.xlu0 %v2103_v63, %s2218_s16 }
 0x492   :  { %v2105_v2 = vpop.eup %2104 }
 0x493   :  { %v513_v3 = vadd.f32 1.0, %v2105_v2 }
 0x495   :  { %2106 = vrcp.f32 %v513_v3 }
 0x49f   :  { %v2107_v5 = vpop.eup %2106 }
 0x4a0   :  { %v517_v11 = vmul.f32 %v2107_v5, %v2319_v38 }
 0x503   :  { %v520_v6 = vpop.permute.xlu0 %519 }
 0x504   :  { %v522_v7 = vmul.f32 %v2107_v5, %v520_v6 }
 0x506   :  { %524 = vrot.lane.b32.xlu0 %v522_v7, %s2219_s4 }
 0x509   :  { %v404_v8 = vpop.f32.mrb[2].mxu0 }
 0x50a   :  { %v1930_v10 = vpop.f32.mrb[3].mxu0  ;;  %v408_v16 = vadd.f32 %v404_v8, %v334_v15 }
 0x50c   :  { %v1818_v19 = vmul.f32 -1.442695, %v408_v16 }
 0x578   :  { %v525_v12 = vpop.permute.xlu0 %524 }
 0x579   :  { %v527_v13 = vadd.f32 %v525_v12, %v517_v11 }
 0x57b   :  { %2108 = vtanh.f32 %v527_v13 }
 0x57c   :  { %2110 = vtanh.f32 %v408_v16 }
 0x57d   :  { %2112 = vpow2.f32 %v1818_v19 }
 0x585   :  { %v2109_v17 = vpop.eup %2108 }
 0x586   :  { %530 = vrot.lane.b32.xlu0 %v2109_v17, %s2220_s17  ;;  %v2111_v18 = vpop.eup %2110 }
 0x587   :  { %v2113_v20 = vpop.eup %2112 }
 0x588   :  { %v412_v21 = vadd.f32 1.0, %v2113_v20 }
 0x58a   :  { %418 = vrot.lane.b32.xlu0 %v2111_v18, %s2218_s16  ;;  %2114 = vrcp.f32 %v412_v21 }
 0x594   :  { %v2115_v24 = vpop.eup %2114 }
 0x595   :  { %v416_v28 = vmul.f32 %v2115_v24, %v2335_v53 }
 0x5f8   :  { %v531_v22 = vpop.permute.xlu0 %530 }
 0x5f9   :  { %v533_v23 = vmul.f32 %v2107_v5, %v531_v22 }
 0x5fb   :  { %540 = vrot.lane.b32.xlu1 %v533_v23, %s2219_s4 }
 0x5fc   :  { %v419_v25 = vpop.permute.xlu0 %418 }
 0x5fd   :  { %v421_v26 = vmul.f32 %v2115_v24, %v419_v25 }
 0x5ff   :  { %423 = vrot.lane.b32.xlu1 %v421_v26, %s2219_s4 }
 0x66d   :  { %v541_v27 = vpop.permute.xlu1 %540 }
 0x66e   :  { %543 = vst.msk [vmem:[%s2537_s6 + $0xc] sm:$0x3] %vm327_vm2, %v541_v27  ;;  %1950 = vmatmul.mubr.msk.f32.vlgmr.msra.gmra.mrb[6].mxu1 %vm125_vm3, %v541_v27 }
 0x66f   :  { %2053 = vmatpush3.bf16.msra.mxu1 %v2291_v14  ;;  %1963 = vmatprep.mubr.msk.f32.mxu1 %vm2215_vm0, %v2216_v4 }
 0x670   :  { %2057 = vmatprep.subr.bf16.mxu1 %v2214_v0 }
 0x671   :  { %v424_v29 = vpop.permute.xlu1 %423 }
 0x672   :  { %v426_v30 = vadd.f32 %v424_v29, %v416_v28  ;;  %v754_v29 = vld [vmem:[#allocation2 + $0x6] sm:$0x3] }
 0x674   :  { %2116 = vtanh.f32 %v426_v30 }
 0x67e   :  { %v2117_v31 = vpop.eup %2116 }
 0x67f   :  { %429 = vrot.lane.b32.xlu1 %v2117_v31, %s2220_s17 }
 0x6f1   :  { %v430_v32 = vpop.permute.xlu1 %429 }
 0x6f2   :  { %v432_v33 = vmul.f32 %v2115_v24, %v430_v32 }
 0x6f4   :  { %535 = vrot.lane.b32.xlu1 %v432_v33, %s2221_s20 }
 0x741   :  { %v711_v34 = vpop.f32.mrb[6].mxu1 }
 0x742   :  { %716 = vrot.lane.b32.xlu0 %v711_v34, %s2217_s15  ;;  %v1951_v35 = vpop.f32.mrb[7].mxu1 }
 0x766   :  { %v536_v36 = vpop.permute.xlu1 %535 }
 0x767   :  { %538 = vst.msk [vmem:[%s2538_s5 + $0x2] sm:$0x3] %vm327_vm2, %v536_v36  ;;  %1943 = vmatmul.mubr.msk.f32.vlgmr.msra.gmra.mrb[4].mxu0 %vm125_vm3, %v536_v36 }
 0x768   :  { %2050 = vmatpush3.bf16.msra.mxu0 %v2278_v9  ;;  %1956 = vmatprep.mubr.msk.f32.mxu0 %vm2215_vm0, %v2216_v4 }
 0x769   :  { %2054 = vmatprep.subr.bf16.mxu0 %v2214_v0 }
 0x7b4   :  { %v717_v38 = vpop.permute.xlu0 %716 }
 0x7b5   :  { %v719_v39 = vadd.f32 %v717_v38, %v545_v37 }
 0x7b7   :  { %2118 = vtanh.f32 %v719_v39  ;;  %v1824_v41 = vmul.f32 -1.442695, %v719_v39 }
 0x7b9   :  { %2120 = vpow2.f32 %v1824_v41 }
 0x7c1   :  { %v2119_v40 = vpop.eup %2118 }
 0x7c2   :  { %729 = vrot.lane.b32.xlu0 %v2119_v40, %s2218_s16 }
 0x7c3   :  { %v2121_v42 = vpop.eup %2120 }
 0x7c4   :  { %v723_v43 = vadd.f32 1.0, %v2121_v42 }
 0x7c6   :  { %2122 = vrcp.f32 %v723_v43 }
 0x7d0   :  { %v2123_v44 = vpop.eup %2122 }
 0x7d1   :  { %v727_v49 = vmul.f32 %v2123_v44, %v527_v13  ;;  %v755_v13 = vld [vmem:[#allocation2 + $0x8] sm:$0x3] }
 0x834   :  { %v730_v45 = vpop.permute.xlu0 %729 }
 0x835   :  { %v732_v46 = vmul.f32 %v2123_v44, %v730_v45 }
 0x837   :  { %734 = vrot.lane.b32.xlu0 %v732_v46, %s2219_s4 }
 0x83a   :  { %v614_v47 = vpop.f32.mrb[4].mxu0 }
 0x83b   :  { %v1944_v48 = vpop.f32.mrb[5].mxu0  ;;  %v618_v53 = vadd.f32 %v614_v47, %v544_v52 }
 0x83d   :  { %v1822_v56 = vmul.f32 -1.442695, %v618_v53 }
 0x8a9   :  { %v735_v50 = vpop.permute.xlu0 %734 }
 0x8aa   :  { %v737_v51 = vadd.f32 %v735_v50, %v727_v49 }
 0x8ac   :  { %2124 = vtanh.f32 %v737_v51 }
 0x8ad   :  { %2126 = vtanh.f32 %v618_v53 }
 0x8ae   :  { %2128 = vpow2.f32 %v1822_v56 }
 0x8b6   :  { %v2125_v54 = vpop.eup %2124 }
 0x8b7   :  { %740 = vrot.lane.b32.xlu1 %v2125_v54, %s2220_s17  ;;  %v2127_v55 = vpop.eup %2126 }
 0x8b8   :  { %v2129_v57 = vpop.eup %2128 }
 0x8b9   :  { %v622_v58 = vadd.f32 1.0, %v2129_v57 }
 0x8bb   :  { %628 = vrot.lane.b32.xlu1 %v2127_v55, %s2218_s16  ;;  %2130 = vrcp.f32 %v622_v58 }
 0x8c5   :  { %v2131_v61 = vpop.eup %2130 }
 0x8c6   :  { %v626_v2 = vmul.f32 %v2131_v61, %v426_v30 }
 0x929   :  { %v741_v59 = vpop.permute.xlu1 %740 }
 0x92a   :  { %v743_v60 = vmul.f32 %v2123_v44, %v741_v59 }
 0x92c   :  { %750 = vrot.lane.b32.xlu0 %v743_v60, %s2219_s4 }
 0x92d   :  { %v629_v62 = vpop.permute.xlu1 %628 }
 0x92e   :  { %v631_v63 = vmul.f32 %v2131_v61, %v629_v62 }
 0x930   :  { %633 = vrot.lane.b32.xlu0 %v631_v63, %s2219_s4 }
 0x99e   :  { %v751_v1 = vpop.permute.xlu0 %750 }
 0x99f   :  { %753 = vst.msk [vmem:[%s2537_s6 + $0xa] sm:$0x3] %vm327_vm2, %v751_v1  ;;  %1964 = vmatmul.mubr.msk.f32.vlgmr.msra.gmra.mrb[8].mxu1 %vm125_vm3, %v751_v1 }
 0x9a0   :  { %2059 = vmatpush3.bf16.msra.mxu1 %v2291_v14  ;;  %1977 = vmatprep.mubr.msk.f32.mxu1 %vm2215_vm0, %v2216_v4 }
 0x9a1   :  { %2063 = vmatprep.subr.bf16.mxu1 %v2214_v0 }
 0x9a2   :  { %v634_v3 = vpop.permute.xlu0 %633 }
 0x9a3   :  { %v636_v5 = vadd.f32 %v634_v3, %v626_v2 }
 0x9a5   :  { %2132 = vtanh.f32 %v636_v5 }
 0x9af   :  { %v2133_v6 = vpop.eup %2132 }
 0x9b0   :  { %639 = vrot.lane.b32.xlu1 %v2133_v6, %s2220_s17 }
 0xa22   :  { %v640_v7 = vpop.permute.xlu1 %639 }
 0xa23   :  { %v642_v8 = vmul.f32 %v2131_v61, %v640_v7  ;;  %v964_v61 = vld [vmem:[#allocation2 + $0x8] sm:$0x3] }
 0xa25   :  { %745 = vrot.lane.b32.xlu1 %v642_v8, %s2221_s20 }
 0xa72   :  { %v921_v10 = vpop.f32.mrb[8].mxu1 }
 0xa73   :  { %v1965_v11 = vpop.f32.mrb[9].mxu1  ;;  %926 = vrot.lane.b32.xlu0 %v921_v10, %s2217_s15 }
 0xa97   :  { %v746_v12 = vpop.permute.xlu1 %745 }
 0xa98   :  { %748 = vst.msk [vmem:[%s2538_s5 + $0x4] sm:$0x3] %vm327_vm2, %v746_v12  ;;  %1957 = vmatmul.mubr.msk.f32.vlgmr.msra.gmra.mrb[6].mxu0 %vm125_vm3, %v746_v12 }
 0xa99   :  { %2056 = vmatpush3.bf16.msra.mxu0 %v2278_v9  ;;  %1970 = vmatprep.mubr.msk.f32.mxu0 %vm2215_vm0, %v2216_v4 }
 0xa9a   :  { %2060 = vmatprep.subr.bf16.mxu0 %v2214_v0 }
 0xae5   :  { %v927_v15 = vpop.permute.xlu0 %926 }
 0xae6   :  { %v929_v16 = vadd.f32 %v927_v15, %v755_v13 }
 0xae8   :  { %2134 = vtanh.f32 %v929_v16  ;;  %v1828_v18 = vmul.f32 -1.442695, %v929_v16 }
 0xaea   :  { %2136 = vpow2.f32 %v1828_v18 }
 0xaf2   :  { %v2135_v17 = vpop.eup %2134 }
 0xaf3   :  { %939 = vrot.lane.b32.xlu0 %v2135_v17, %s2218_s16 }
 0xaf4   :  { %v2137_v19 = vpop.eup %2136 }
 0xaf5   :  { %v933_v20 = vadd.f32 1.0, %v2137_v19 }
 0xaf7   :  { %2138 = vrcp.f32 %v933_v20 }
 0xb01   :  { %v2139_v21 = vpop.eup %2138 }
 0xb02   :  { %v937_v26 = vmul.f32 %v2139_v21, %v737_v51  ;;  %v965_v51 = vld [vmem:[#allocation2 + $0x6] sm:$0x3] }
 0xb65   :  { %v940_v22 = vpop.permute.xlu0 %939 }
 0xb66   :  { %v942_v23 = vmul.f32 %v2139_v21, %v940_v22 }
 0xb68   :  { %944 = vrot.lane.b32.xlu1 %v942_v23, %s2219_s4 }
 0xb6b   :  { %v824_v24 = vpop.f32.mrb[6].mxu0 }
 0xb6c   :  { %v1958_v25 = vpop.f32.mrb[7].mxu0  ;;  %v828_v30 = vadd.f32 %v824_v24, %v754_v29 }
 0xb6e   :  { %v1826_v33 = vmul.f32 -1.442695, %v828_v30 }
 0xbda   :  { %v945_v27 = vpop.permute.xlu1 %944 }
 0xbdb   :  { %v2408_v28 = vadd.f32 %v945_v27, %v937_v26 }
 0xbdd   :  { %2140 = vtanh.f32 %v2408_v28 }
 0xbde   :  { %2142 = vtanh.f32 %v828_v30 }
 0xbdf   :  { %2144 = vpow2.f32 %v1826_v33 }
 0xbe7   :  { %v2141_v31 = vpop.eup %2140 }
 0xbe8   :  { %950 = vrot.lane.b32.xlu0 %v2141_v31, %s2220_s17  ;;  %v2143_v32 = vpop.eup %2142 }
 0xbe9   :  { %v2145_v34 = vpop.eup %2144 }
 0xbea   :  { %v832_v35 = vadd.f32 1.0, %v2145_v34 }
 0xbec   :  { %838 = vrot.lane.b32.xlu0 %v2143_v32, %s2218_s16  ;;  %2146 = vrcp.f32 %v832_v35  ;;  %v1174_v32 = vld [vmem:[#allocation2 + $0xa] sm:$0x3] }
 0xbf6   :  { %v2147_v38 = vpop.eup %2146 }
 0xbf7   :  { %v836_v42 = vmul.f32 %v2147_v38, %v636_v5 }
 0xc5a   :  { %v951_v36 = vpop.permute.xlu0 %950 }
 0xc5b   :  { %v953_v37 = vmul.f32 %v2139_v21, %v951_v36 }
 0xc5d   :  { %960 = vrot.lane.b32.xlu1 %v953_v37, %s2219_s4 }
 0xc5e   :  { %v839_v39 = vpop.permute.xlu0 %838 }
 0xc5f   :  { %v841_v40 = vmul.f32 %v2147_v38, %v839_v39 }
 0xc61   :  { %843 = vrot.lane.b32.xlu1 %v841_v40, %s2219_s4 }
 0xccf   :  { %v961_v41 = vpop.permute.xlu1 %960 }
 0xcd0   :  { %963 = vst.msk [vmem:[%s2537_s6 + $0x8] sm:$0x3] %vm327_vm2, %v961_v41  ;;  %1978 = vmatmul.mubr.msk.f32.vlgmr.msra.gmra.mrb[10].mxu1 %vm125_vm3, %v961_v41 }
 0xcd1   :  { %2065 = vmatpush3.bf16.msra.mxu1 %v2291_v14  ;;  %1991 = vmatprep.mubr.msk.f32.mxu1 %vm2215_vm0, %v2216_v4 }
 0xcd2   :  { %2069 = vmatprep.subr.bf16.mxu1 %v2214_v0 }
 0xcd3   :  { %v844_v43 = vpop.permute.xlu1 %843 }
 0xcd4   :  { %v846_v44 = vadd.f32 %v844_v43, %v836_v42 }
 0xcd6   :  { %2148 = vtanh.f32 %v846_v44 }
 0xce0   :  { %v2149_v45 = vpop.eup %2148 }
 0xce1   :  { %849 = vrot.lane.b32.xlu0 %v2149_v45, %s2220_s17 }
 0xd53   :  { %v850_v46 = vpop.permute.xlu0 %849 }
 0xd54   :  { %v852_v47 = vmul.f32 %v2147_v38, %v850_v46 }
 0xd56   :  { %955 = vrot.lane.b32.xlu1 %v852_v47, %s2221_s20 }
 0xda3   :  { %v1131_v48 = vpop.f32.mrb[10].mxu1 }
 0xda4   :  { %v1979_v49 = vpop.f32.mrb[11].mxu1  ;;  %1136 = vrot.lane.b32.xlu0 %v1131_v48, %s2217_s15 }
 0xdc8   :  { %v956_v50 = vpop.permute.xlu1 %955 }
 0xdc9   :  { %958 = vst.msk [vmem:[%s2538_s5 + $0x6] sm:$0x3] %vm327_vm2, %v956_v50  ;;  %1971 = vmatmul.mubr.msk.f32.vlgmr.msra.gmra.mrb[8].mxu0 %vm125_vm3, %v956_v50 }
 0xdca   :  { %2062 = vmatpush3.bf16.msra.mxu0 %v2278_v9  ;;  %1984 = vmatprep.mubr.msk.f32.mxu0 %vm2215_vm0, %v2216_v4 }
 0xdcb   :  { %2066 = vmatprep.subr.bf16.mxu0 %v2214_v0 }
 0xe16   :  { %v1137_v52 = vpop.permute.xlu0 %1136 }
 0xe17   :  { %v1139_v53 = vadd.f32 %v1137_v52, %v965_v51 }
 0xe19   :  { %2150 = vtanh.f32 %v1139_v53  ;;  %v1832_v55 = vmul.f32 -1.442695, %v1139_v53 }
 0xe1b   :  { %2152 = vpow2.f32 %v1832_v55 }
 0xe23   :  { %v2151_v54 = vpop.eup %2150 }
 0xe24   :  { %1149 = vrot.lane.b32.xlu1 %v2151_v54, %s2218_s16 }
 0xe25   :  { %v2153_v56 = vpop.eup %2152 }
 0xe26   :  { %v1143_v57 = vadd.f32 1.0, %v2153_v56 }
 0xe28   :  { %2154 = vrcp.f32 %v1143_v57 }
 0xe32   :  { %v2155_v58 = vpop.eup %2154 }
 0xe33   :  { %v1147_v5 = vmul.f32 %v2155_v58, %v2408_v28  ;;  %v1175_v28 = vld [vmem:[#allocation2 + $0x4] sm:$0x3] }
 0xe96   :  { %v1150_v59 = vpop.permute.xlu1 %1149 }
 0xe97   :  { %v1152_v60 = vmul.f32 %v2155_v58, %v1150_v59 }
 0xe99   :  { %1154 = vrot.lane.b32.xlu0 %v1152_v60, %s2219_s4 }
 0xe9c   :  { %v1034_v62 = vpop.f32.mrb[8].mxu0 }
 0xe9d   :  { %v1038_v63 = vadd.f32 %v1034_v62, %v964_v61  ;;  %v1972_v1 = vpop.f32.mrb[9].mxu0 }
 0xe9f   :  { %2156 = vtanh.f32 %v1038_v63  ;;  %v1830_v3 = vmul.f32 -1.442695, %v1038_v63  ;;  %v1384_v63 = vld [vmem:[#allocation2 + $0xc] sm:$0x3] }
 0xea1   :  { %2158 = vpow2.f32 %v1830_v3 }
 0xea9   :  { %v2157_v2 = vpop.eup %2156 }
 0xeaa   :  { %1048 = vrot.lane.b32.xlu0 %v2157_v2, %s2218_s16 }
 0xeab   :  { %v2159_v6 = vpop.eup %2158 }
 0xeac   :  { %v1042_v10 = vadd.f32 1.0, %v2159_v6  ;;  %v1385_v6 = vld [vmem:[#allocation2 + $0x2] sm:$0x3] }
 0xf0b   :  { %v1155_v7 = vpop.permute.xlu0 %1154 }
 0xf0c   :  { %v2440_v8 = vadd.f32 %v1155_v7, %v1147_v5 }
 0xf0e   :  { %2160 = vtanh.f32 %v2440_v8 }
 0xf0f   :  { %2162 = vrcp.f32 %v1042_v10 }
 0xf18   :  { %v2161_v11 = vpop.eup %2160 }
 0xf19   :  { %1160 = vrot.lane.b32.xlu1 %v2161_v11, %s2220_s17  ;;  %v2163_v12 = vpop.eup %2162 }
 0xf1a   :  { %v1046_v18 = vmul.f32 %v2163_v12, %v846_v44 }
 0xf1c   :  { %v1049_v13 = vpop.permute.xlu0 %1048 }
 0xf1d   :  { %v1051_v15 = vmul.f32 %v2163_v12, %v1049_v13 }
 0xf1f   :  { %1053 = vrot.lane.b32.xlu0 %v1051_v15, %s2219_s4 }
 0xf8b   :  { %v1161_v16 = vpop.permute.xlu1 %1160 }
 0xf8c   :  { %v1163_v17 = vmul.f32 %v2155_v58, %v1161_v16 }
 0xf8e   :  { %1170 = vrot.lane.b32.xlu1 %v1163_v17, %s2219_s4 }
 0xf91   :  { %v1054_v19 = vpop.permute.xlu0 %1053 }
 0xf92   :  { %v1056_v20 = vadd.f32 %v1054_v19, %v1046_v18 }
 0xf94   :  { %2164 = vtanh.f32 %v1056_v20 }
 0xf9e   :  { %v2165_v21 = vpop.eup %2164 }
 0xf9f   :  { %1059 = vrot.lane.b32.xlu1 %v2165_v21, %s2220_s17 }
0x1000   :  { %v1171_v22 = vpop.permute.xlu1 %1170 }
0x1001   :  { %1173 = vst.msk [vmem:[%s2537_s6 + $0x6] sm:$0x3] %vm327_vm2, %v1171_v22  ;;  %1992 = vmatmul.mubr.msk.f32.vlgmr.msra.gmra.mrb[12].mxu1 %vm125_vm3, %v1171_v22 }
0x1002   :  { %2071 = vmatpush3.bf16.msra.mxu1 %v2291_v14  ;;  %2005 = vmatprep.mubr.msk.f32.mxu1 %vm2215_vm0, %v2216_v4 }
0x1003   :  { %2075 = vmatprep.subr.bf16.mxu1 %v2214_v0 }
0x1011   :  { %v1060_v23 = vpop.permute.xlu1 %1059 }
0x1012   :  { %v1062_v24 = vmul.f32 %v2163_v12, %v1060_v23 }
0x1014   :  { %1165 = vrot.lane.b32.xlu0 %v1062_v24, %s2221_s20 }
0x1086   :  { %v1166_v25 = vpop.permute.xlu0 %1165 }
0x1087   :  { %1168 = vst.msk [vmem:[%s2538_s5 + $0x8] sm:$0x3] %vm327_vm2, %v1166_v25  ;;  %1985 = vmatmul.mubr.msk.f32.vlgmr.msra.gmra.mrb[10].mxu0 %vm125_vm3, %v1166_v25 }
0x1088   :  { %2068 = vmatpush3.bf16.msra.mxu0 %v2278_v9  ;;  %1998 = vmatprep.mubr.msk.f32.mxu0 %vm2215_vm0, %v2216_v4 }
0x1089   :  { %2072 = vmatprep.subr.bf16.mxu0 %v2214_v0 }
0x10d4   :  { %v1341_v26 = vpop.f32.mrb[12].mxu1 }
0x10d5   :  { %1346 = vrot.lane.b32.xlu1 %v1341_v26, %s2217_s15  ;;  %v1993_v27 = vpop.f32.mrb[13].mxu1 }
0x1147   :  { %v1347_v29 = vpop.permute.xlu1 %1346 }
0x1148   :  { %v1349_v30 = vadd.f32 %v1347_v29, %v1175_v28 }
0x114a   :  { %2166 = vtanh.f32 %v1349_v30  ;;  %v1836_v0 = vmul.f32 -1.442695, %v1349_v30 }
0x1154   :  { %v2167_v31 = vpop.eup %2166 }
0x1155   :  { %1359 = vrot.lane.b32.xlu0 %v2167_v31, %s2218_s16 }
0x115a   :  { %v1244_v33 = vpop.f32.mrb[10].mxu0 }
0x115b   :  { %v1248_v34 = vadd.f32 %v1244_v33, %v1174_v32  ;;  %v1986_v35 = vpop.f32.mrb[11].mxu0 }
0x115d   :  { %2168 = vtanh.f32 %v1248_v34  ;;  %v1834_v39 = vmul.f32 -1.442695, %v1248_v34 }
0x115e   :  { %2170 = vpow2.f32 %v1836_v0 }
0x1167   :  { %v2169_v36 = vpop.eup %2168 }
0x1168   :  { %1258 = vrot.lane.b32.xlu0 %v2169_v36, %s2218_s16  ;;  %v2171_v37 = vpop.eup %2170  ;;  %v1594_v36 = vld [vmem:[#allocation2 + $0xe] sm:$0x3] }
0x1169   :  { %v1353_v38 = vadd.f32 1.0, %v2171_v37 }
0x116b   :  { %2172 = vrcp.f32 %v1353_v38 }
0x116c   :  { %2174 = vpow2.f32 %v1834_v39 }
0x1175   :  { %v2173_v40 = vpop.eup %2172 }
0x1176   :  { %v2175_v43 = vpop.eup %2174  ;;  %v1357_v48 = vmul.f32 %v2173_v40, %v2440_v8 }
0x1177   :  { %v1252_v44 = vadd.f32 1.0, %v2175_v43 }
0x1179   :  { %2176 = vrcp.f32 %v1252_v44 }
0x1183   :  { %v2177_v45 = vpop.eup %2176 }
0x1184   :  { %v1256_v52 = vmul.f32 %v2177_v45, %v1056_v20 }
0x11c7   :  { %v1360_v41 = vpop.permute.xlu0 %1359 }
0x11c8   :  { %v1362_v42 = vmul.f32 %v2173_v40, %v1360_v41 }
0x11ca   :  { %1364 = vrot.lane.b32.xlu1 %v1362_v42, %s2219_s4 }
0x11da   :  { %v1259_v46 = vpop.permute.xlu0 %1258 }
0x11db   :  { %v1261_v47 = vmul.f32 %v2177_v45, %v1259_v46 }
0x11dd   :  { %1263 = vrot.lane.b32.xlu0 %v1261_v47, %s2219_s4 }
0x123c   :  { %v1365_v49 = vpop.permute.xlu1 %1364 }
0x123d   :  { %v2472_v50 = vadd.f32 %v1365_v49, %v1357_v48  ;;  %v1595_v48 = vld [vmem:[#allocation2] sm:$0x3] }
0x123f   :  { %2178 = vtanh.f32 %v2472_v50 }
0x1249   :  { %v2179_v51 = vpop.eup %2178 }
0x124a   :  { %1370 = vrot.lane.b32.xlu1 %v2179_v51, %s2220_s17 }
0x124f   :  { %v1264_v53 = vpop.permute.xlu0 %1263 }
0x1250   :  { %v1266_v54 = vadd.f32 %v1264_v53, %v1256_v52 }
0x1252   :  { %2180 = vtanh.f32 %v1266_v54 }
0x125c   :  { %v2181_v55 = vpop.eup %2180 }
0x125d   :  { %1269 = vrot.lane.b32.xlu0 %v2181_v55, %s2220_s17 }
0x12bc   :  { %v1371_v56 = vpop.permute.xlu1 %1370 }
0x12bd   :  { %v1373_v57 = vmul.f32 %v2173_v40, %v1371_v56 }
0x12bf   :  { %1380 = vrot.lane.b32.xlu1 %v1373_v57, %s2219_s4 }
0x12cf   :  { %v1270_v58 = vpop.permute.xlu0 %1269 }
0x12d0   :  { %v1272_v59 = vmul.f32 %v2177_v45, %v1270_v58 }
0x12d2   :  { %1375 = vrot.lane.b32.xlu1 %v1272_v59, %s2221_s20 }
0x1331   :  { %v1381_v60 = vpop.permute.xlu1 %1380 }
0x1332   :  { %1383 = vst.msk [vmem:[%s2537_s6 + $0x4] sm:$0x3] %vm327_vm2, %v1381_v60  ;;  %2006 = vmatmul.mubr.msk.f32.vlgmr.msra.gmra.mrb[14].mxu1 %vm125_vm3, %v1381_v60 }
0x1333   :  { %2077 = vmatpush3.bf16.msra.mxu1 %v2291_v14  ;;  %2019 = vmatprep.mubr.msk.f32.mxu1 %vm2215_vm0, %v2216_v4 }
0x1344   :  { %v1376_v61 = vpop.permute.xlu1 %1375 }
0x1345   :  { %1378 = vst.msk [vmem:[%s2538_s5 + $0xa] sm:$0x3] %vm327_vm2, %v1376_v61  ;;  %1999 = vmatmul.mubr.msk.f32.vlgmr.msra.gmra.mrb[12].mxu0 %vm125_vm3, %v1376_v61 }
0x1346   :  { %2074 = vmatpush3.bf16.msra.mxu0 %v2278_v9  ;;  %2012 = vmatprep.mubr.msk.f32.mxu0 %vm2215_vm0, %v2216_v4 }
0x1405   :  { %v1551_v62 = vpop.f32.mrb[14].mxu1 }
0x1406   :  { %1556 = vrot.lane.b32.xlu0 %v1551_v62, %s2217_s15  ;;  %v2007_v14 = vpop.f32.mrb[15].mxu1 }
0x1418   :  { %v1454_v1 = vpop.f32.mrb[12].mxu0 }
0x1419   :  { %v1458_v2 = vadd.f32 %v1454_v1, %v1384_v63  ;;  %v2000_v3 = vpop.f32.mrb[13].mxu0 }
0x141b   :  { %2182 = vtanh.f32 %v1458_v2  ;;  %v1838_v8 = vmul.f32 -1.442695, %v1458_v2 }
0x1425   :  { %v2183_v5 = vpop.eup %2182 }
0x1426   :  { %1468 = vrot.lane.b32.xlu0 %v2183_v5, %s2218_s16 }
0x1478   :  { %v1557_v7 = vpop.permute.xlu0 %1556 }
0x1479   :  { %v1559_v10 = vadd.f32 %v1557_v7, %v1385_v6 }
0x147b   :  { %2184 = vtanh.f32 %v1559_v10  ;;  %v1840_v16 = vmul.f32 -1.442695, %v1559_v10 }
0x147c   :  { %2186 = vpow2.f32 %v1838_v8 }
0x1485   :  { %v2185_v9 = vpop.eup %2184 }
0x1486   :  { %1569 = vrot.lane.b32.xlu1 %v2185_v9, %s2218_s16  ;;  %v2187_v4 = vpop.eup %2186 }
0x1487   :  { %v1462_v11 = vadd.f32 1.0, %v2187_v4 }
0x1489   :  { %2188 = vrcp.f32 %v1462_v11 }
0x148a   :  { %2190 = vpow2.f32 %v1840_v16 }
0x1493   :  { %v2189_v12 = vpop.eup %2188 }
0x1494   :  { %v2191_v17 = vpop.eup %2190  ;;  %v1466_v22 = vmul.f32 %v2189_v12, %v1266_v54 }
0x1495   :  { %v1563_v18 = vadd.f32 1.0, %v2191_v17 }
0x1497   :  { %2192 = vrcp.f32 %v1563_v18 }
0x1498   :  { %v1469_v13 = vpop.permute.xlu0 %1468 }
0x1499   :  { %v1471_v15 = vmul.f32 %v2189_v12, %v1469_v13 }
0x149b   :  { %1473 = vrot.lane.b32.xlu0 %v1471_v15, %s2219_s4 }
0x14a1   :  { %v2193_v19 = vpop.eup %2192 }
0x14a2   :  { %v1567_v26 = vmul.f32 %v2193_v19, %v2472_v50 }
0x14f8   :  { %v1570_v20 = vpop.permute.xlu1 %1569 }
0x14f9   :  { %v1572_v21 = vmul.f32 %v2193_v19, %v1570_v20 }
0x14fb   :  { %1574 = vrot.lane.b32.xlu1 %v1572_v21, %s2219_s4 }
0x150d   :  { %v1474_v23 = vpop.permute.xlu0 %1473 }
0x150e   :  { %v1476_v24 = vadd.f32 %v1474_v23, %v1466_v22 }
0x1510   :  { %2194 = vtanh.f32 %v1476_v24 }
0x151a   :  { %v2195_v25 = vpop.eup %2194 }
0x151b   :  { %1479 = vrot.lane.b32.xlu0 %v2195_v25, %s2220_s17 }
0x156d   :  { %v1575_v27 = vpop.permute.xlu1 %1574 }
0x156e   :  { %v1577_v28 = vadd.f32 %v1575_v27, %v1567_v26 }
0x1570   :  { %2196 = vtanh.f32 %v1577_v28 }
0x157a   :  { %v2197_v29 = vpop.eup %2196 }
0x157b   :  { %1580 = vrot.lane.b32.xlu1 %v2197_v29, %s2220_s17 }
0x158d   :  { %v1480_v30 = vpop.permute.xlu0 %1479 }
0x158e   :  { %v1482_v31 = vmul.f32 %v2189_v12, %v1480_v30 }
0x1590   :  { %1585 = vrot.lane.b32.xlu0 %v1482_v31, %s2221_s20 }
0x15ed   :  { %v1581_v32 = vpop.permute.xlu1 %1580 }
0x15ee   :  { %v1583_v33 = vmul.f32 %v2193_v19, %v1581_v32 }
0x15f0   :  { %1590 = vrot.lane.b32.xlu1 %v1583_v33, %s2219_s4 }
0x1602   :  { %v1586_v34 = vpop.permute.xlu0 %1585 }
0x1603   :  { %1588 = vst.msk [vmem:[%s2538_s5 + $0xc] sm:$0x3] %vm327_vm2, %v1586_v34  ;;  %2013 = vmatmul.mubr.msk.f32.vlgmr.msra.gmra.mrb[14].mxu0 %vm125_vm3, %v1586_v34 }
0x1662   :  { %v1591_v35 = vpop.permute.xlu1 %1590 }
0x1663   :  { %1593 = vst.msk [vmem:[%s2537_s6 + $0x2] sm:$0x3] %vm327_vm2, %v1591_v35  ;;  %2020 = vmatmul.mubr.msk.f32.vlgmr.msra.gmra.mrb[16].mxu1 %vm125_vm3, %v1591_v35 }
0x16d6   :  { %v1664_v0 = vpop.f32.mrb[14].mxu0 }
0x16d7   :  { %v1668_v37 = vadd.f32 %v1664_v0, %v1594_v36  ;;  %v2014_v38 = vpop.f32.mrb[15].mxu0 }
0x16d9   :  { %2198 = vtanh.f32 %v1668_v37  ;;  %v1842_v41 = vmul.f32 -1.442695, %v1668_v37 }
0x16db   :  { %2200 = vpow2.f32 %v1842_v41 }
0x16e3   :  { %v2199_v39 = vpop.eup %2198 }
0x16e4   :  { %1678 = vrot.lane.b32.xlu0 %v2199_v39, %s2218_s16 }
0x16e5   :  { %v2201_v43 = vpop.eup %2200 }
0x16e6   :  { %v1672_v44 = vadd.f32 1.0, %v2201_v43 }
0x16e8   :  { %2202 = vrcp.f32 %v1672_v44 }
0x16f2   :  { %v2203_v45 = vpop.eup %2202 }
0x16f3   :  { %v1676_v52 = vmul.f32 %v2203_v45, %v1476_v24 }
0x1736   :  { %v1761_v40 = vpop.f32.mrb[16].mxu1 }
0x1737   :  { %1766 = vrot.lane.b32.xlu1 %v1761_v40, %s2217_s15  ;;  %v2021_v42 = vpop.f32.mrb[17].mxu1 }
0x1756   :  { %v1679_v46 = vpop.permute.xlu0 %1678 }
0x1757   :  { %v1681_v47 = vmul.f32 %v2203_v45, %v1679_v46 }
0x1759   :  { %1683 = vrot.lane.b32.xlu0 %v1681_v47, %s2219_s4 }
0x17a9   :  { %v1767_v49 = vpop.permute.xlu1 %1766 }
0x17aa   :  { %v1769_v50 = vadd.f32 %v1767_v49, %v1595_v48 }
0x17ac   :  { %2204 = vtanh.f32 %v1769_v50  ;;  %v1844_v56 = vmul.f32 -1.442695, %v1769_v50 }
0x17b6   :  { %v2205_v51 = vpop.eup %2204 }
0x17b7   :  { %1779 = vrot.lane.b32.xlu1 %v2205_v51, %s2218_s16 }
0x17cb   :  { %v1684_v53 = vpop.permute.xlu0 %1683 }
0x17cc   :  { %v1686_v54 = vadd.f32 %v1684_v53, %v1676_v52 }
0x17ce   :  { %2206 = vtanh.f32 %v1686_v54 }
0x17cf   :  { %2208 = vpow2.f32 %v1844_v56 }
0x17d8   :  { %v2207_v55 = vpop.eup %2206 }
0x17d9   :  { %1689 = vrot.lane.b32.xlu0 %v2207_v55, %s2220_s17  ;;  %v2209_v57 = vpop.eup %2208 }
0x17da   :  { %v1773_v58 = vadd.f32 1.0, %v2209_v57 }
0x17dc   :  { %2210 = vrcp.f32 %v1773_v58 }
0x17e6   :  { %v2211_v59 = vpop.eup %2210 }
0x17e7   :  { %v1777_v63 = vmul.f32 %v2211_v59, %v1577_v28 }
0x1829   :  { %v1780_v60 = vpop.permute.xlu1 %1779 }
0x182a   :  { %v1782_v61 = vmul.f32 %v2211_v59, %v1780_v60 }
0x182c   :  { %1784 = vrot.lane.b32.xlu1 %v1782_v61, %s2219_s4 }
0x184b   :  { %v1690_v62 = vpop.permute.xlu0 %1689 }
0x184c   :  { %v1692_v14 = vmul.f32 %v2203_v45, %v1690_v62 }
0x184e   :  { %1795 = vrot.lane.b32.xlu0 %v1692_v14, %s2221_s20 }
0x189e   :  { %v1785_v1 = vpop.permute.xlu1 %1784 }
0x189f   :  { %v1787_v2 = vadd.f32 %v1785_v1, %v1777_v63 }
0x18a1   :  { %2212 = vtanh.f32 %v1787_v2 }
0x18ab   :  { %v2213_v3 = vpop.eup %2212 }
0x18ac   :  { %1790 = vrot.lane.b32.xlu1 %v2213_v3, %s2220_s17 }
0x18c0   :  { %v1796_v5 = vpop.permute.xlu0 %1795 }
0x18c1   :  { %1798 = vst.msk [vmem:[%s2538_s5 + $0xe] sm:$0x3] %vm327_vm2, %v1796_v5 }
0x191e   :  { %v1791_v6 = vpop.permute.xlu1 %1790 }
0x191f   :  { %v1793_v7 = vmul.f32 %v2211_v59, %v1791_v6 }
0x1921   :  { %1800 = vrot.lane.b32.xlu1 %v1793_v7, %s2219_s4 }
0x1993   :  { %v1801_v8 = vpop.permute.xlu1 %1800 }
0x1994   :  { %1803 = vst.msk [vmem:[%s2537_s6] sm:$0x3] %vm327_vm2, %v1801_v8 }

// kernel: dc_lstm_forward.4
= control target key start
LH: loop header
LB: loop body
LE: loop exit
PB: predicated region body
PF: predicated region fallthrough
CT: control target
= control target key end

     0   :  { %vm42_vm0 = vcmask 130048   ;;  %v2438_v0 = vmov 0.0|0.0   ;;  %vm2439_vm1 = vmmov 0   ;;  %v2440_v4 = vmov 0.0   ;;  %s2441_s22 = smov 64   ;;  %s2444_s24 = smov 32   ;;  %s2798_s4 = inlined_call_operand.vmem [shape: f32[16,128], index: 4, kind: input, shape index: {}]   ;;  %s2799_s6 = inlined_call_operand.vmem [shape: f32[16,64], index: 6, kind: input, shape index: {}]   ;;  %s2800_s1 = inlined_call_operand.vmem [shape: f32[16,16], index: 1, kind: input, shape index: {}]   ;;  %s2801_s7 = inlined_call_operand.vmem [shape: f32[16,64], index: 7, kind: input, shape index: {}]   ;;  %s2802_s3 = inlined_call_operand.vmem [shape: f32[16,128], index: 3, kind: input, shape index: {}]   ;;  %s2803_s5 = inlined_call_operand.vmem [shape: f32[32,128], index: 5, kind: input, shape index: {}]   ;;  %s2804_s0 = inlined_call_operand.vmem [shape: f32[16,16], index: 0, kind: input, shape index: {}]   ;;  %s2805_s2 = inlined_call_operand.vmem [shape: f32[16,32], index: 2, kind: input, shape index: {}]   ;;  %s2806_s8 = inlined_call_operand.vmem [shape: f32[1,128], index: 8, kind: input, shape index: {}]   ;;  %s2807_s9 = inlined_call_operand.vmem [shape: f32[16,16], index: 9, kind: output, shape index: {0}]   ;;  %s2808_s10 = inlined_call_operand.vmem [shape: f32[16,16], index: 10, kind: output, shape index: {1}]  }
   0x1   :  { %2250 = vmatprep.subr.bf16.mxu1 %v2438_v0  ;;  %v40_v1 = vld [vmem:[%s2798_s4] sm:$0xff]  ;;  %v41_v2 = vld [vmem:[%s2798_s4 + $0x8] sm:$0xff]  ;;  %2126 = vmatprep.mubr.msk.f32.mxu1 %vm2439_vm1, %v2440_v4  ;;  %v209_v20 = vld [vmem:[%s2803_s5 + $0x10] sm:$0xff]  ;;  %vm211_vm2 = vcmask 261120   ;;  %s2445_s25 = smov 80   ;;  %vm513_vm3 = vcmask 123904  }
   0x2   :  { %v306_v3 = vld [vmem:[%s2799_s6] sm:$0xff]  ;;  %v2234_v5 = vpack.c.bf16 %v41_v2, %v40_v1  ;;  %v307_v6 = vld [vmem:[%s2799_s6 + $0x8] sm:$0xff]  ;;  %v210_v21 = vld [vmem:[%s2803_s5 + $0x18] sm:$0xff] }
   0x3   :  { %v38_v7 = vld [vmem:[%s2800_s1] sm:$0xff]  ;;  %v2519_v8 = vpack.c.bf16 %v307_v6, %v306_v3  ;;  %v309_v10 = vld [vmem:[%s2801_s7 + $0x8] sm:$0xff]  ;;  %v2246_v23 = vpack.c.bf16 %v210_v21, %v209_v20 }
   0x4   :  { %2101 = vmatprep.mubr.msk.f32.mxu0 %vm42_vm0, %v38_v7  ;;  %v308_v9 = vld [vmem:[%s2801_s7] sm:$0xff]  ;;  %2235 = vmatprep.subr.bf16.mxu0 %v2234_v5  ;;  %v37_v12 = vld [vmem:[%s2802_s3 + $0x8] sm:$0xff] }
   0x5   :  { %v36_v11 = vld [vmem:[%s2802_s3] sm:$0xff]  ;;  %2252 = vmatpush3.bf16.msra.mxu1 %v2519_v8  ;;  %2237 = vmatpush3.bf16.msra.mxu0 %v2234_v5  ;;  %v39_v13 = vld [vmem:[%s2800_s1 + $0x8] sm:$0xff]  ;;  %v2538_v14 = vpack.c.bf16 %v309_v10, %v308_v9 }
   0x6   :  { %v2238_v15 = vpack.c.bf16 %v37_v12, %v36_v11  ;;  %v207_v16 = vld [vmem:[%s2803_s5] sm:$0xff]  ;;  %v208_v17 = vld [vmem:[%s2803_s5 + $0x8] sm:$0xff]  ;;  %2253 = vmatprep.subr.bf16.mxu1 %v2438_v0 }
   0x7   :  { %v34_v18 = vld [vmem:[%s2804_s0] sm:$0xff]  ;;  %v2242_v19 = vpack.c.bf16 %v208_v17, %v207_v16  ;;  %v35_v22 = vld [vmem:[%s2804_s0 + $0x8] sm:$0xff] }
   0x8   :  { %2239 = vmatprep.subr.bf16.mxu0 %v2238_v15  ;;  %2127 = vmatmul.mubr.f32.vlgmr.msra.gmra.mrb[0].mxu1 %v2440_v4  ;;  %v205_v24 = vld [vmem:[%s2805_s2] sm:$0xff]  ;;  %v206_v25 = vld [vmem:[%s2805_s2 + $0x8] sm:$0xff]  ;;  %s2442_s2 = smov 96  }
   0x9   :  { %2102 = vmatmul.mubr.msk.f32.vlgmr.msra.gmra.mrb[0].mxu0 %vm42_vm0, %v39_v13  ;;  %2255 = vmatpush3.bf16.msra.mxu1 %v2538_v14  ;;  %v2004_v30 = vld [vmem:[%s2806_s8] ss:$0 sm:$0xff]  ;;  %s2443_s8 = smov 16  }
   0xa   :  { %2133 = vmatprep.mubr.msk.f32.mxu1 %vm2439_vm1, %v2440_v4  ;;  %2241 = vmatpush3.bf16.msra.mxu0 %v2238_v15 }
   0xb   :  { %2108 = vmatprep.mubr.msk.f32.mxu0 %vm42_vm0, %v34_v18  ;;  %2243 = vmatprep.subr.bf16.mxu0 %v2242_v19 }
   0xc   :  { %2256 = vmatprep.subr.bf16.mxu1 %v2438_v0  ;;  %2134 = vmatmul.mubr.f32.vlgmr.msra.gmra.mrb[2].mxu1 %v2440_v4 }
   0xd   :  { %2258 = vmatpush3.bf16.msra.mxu1 %v2519_v8  ;;  %2140 = vmatprep.mubr.msk.f32.mxu1 %vm2439_vm1, %v2440_v4 }
   0xe   :  { %2259 = vmatprep.subr.bf16.mxu1 %v2438_v0 }
  0x11   :  { %2109 = vmatmul.mubr.msk.f32.vlgmr.msra.gmra.mrb[0].mxu0 %vm42_vm0, %v35_v22 }
  0x12   :  { %2245 = vmatpush3.bf16.msra.mxu0 %v2242_v19  ;;  %2119 = vmatprep.mubr.msk.f32.mxu0 %vm211_vm2, %v205_v24 }
  0x13   :  { %2247 = vmatprep.subr.bf16.mxu0 %v2246_v23 }
  0x16   :  { %2249 = vmatpush3.bf16.msra.mxu0 %v2246_v23 }
  0x17   :  { %2262 = vmatprep.subr.bf16.mxu0 %v2438_v0 }
  0x19   :  { %2120 = vmatmul.mubr.msk.f32.vlgmr.msra.gmra.mrb[0].mxu0 %vm211_vm2, %v206_v25 }
  0x1a   :  { %2264 = vmatpush3.bf16.msra.mxu0 %v2519_v8  ;;  %2154 = vmatprep.mubr.msk.f32.mxu0 %vm2439_vm1, %v2440_v4 }
  0x1b   :  { %2268 = vmatprep.subr.bf16.mxu0 %v2438_v0 }
  0xdb   :  { %v381_v26 = vpop.f32.mrb[0].mxu1 }
  0xdc   :  { %v2128_v27 = vpop.f32.mrb[1].mxu1 }
  0xdf   :  { %v476_v28 = vpop.f32.mrb[2].mxu1 }
  0xe0   :  { %481 = vrot.lane.b32.xlu0 %v476_v28, %s2441_s22  ;;  %v2135_v29 = vpop.f32.mrb[3].mxu1 }
  0xec   :  { %v2121_v31 = vpop.f32.mrb[0].mxu0 }
  0xed   :  { %v303_v32 = vadd.f32 %v2121_v31, %v2004_v30  ;;  %v284_v33 = vpop.f32.mrb[1].mxu0 }
  0xee   :  { %v302_v34 = vadd.f32 %v2004_v30, %v284_v33 }
  0xef   :  { %305 = vst [vmem:[#allocation2 + $0x8] sm:$0xff] %v303_v32 }
  0xf0   :  { %304 = vst [vmem:[#allocation2] sm:$0xff] %v302_v34 }
  0xf6   :  { %v311_v39 = vld [vmem:[#allocation2 + $0xe] sm:$0x3]  ;;  %v521_v11 = vld [vmem:[#allocation2 + $0xc] sm:$0x3] }
  0xf7   :  { %v310_v35 = vld [vmem:[#allocation2] sm:$0x3]  ;;  %v520_v25 = vld [vmem:[#allocation2 + $0x2] sm:$0x3] }
  0xf8   :  { %v385_v36 = vadd.f32 %v381_v26, %v310_v35 }
  0xfa   :  { %2310 = vtanh.f32 %v385_v36  ;;  %v2005_v41 = vmul.f32 -1.442695, %v385_v36 }
 0x104   :  { %v2311_v37 = vpop.eup %2310 }
 0x105   :  { %395 = vrot.lane.b32.xlu0 %v2311_v37, %s2442_s2 }
 0x152   :  { %v482_v38 = vpop.permute.xlu0 %481 }
 0x153   :  { %v484_v40 = vadd.f32 %v482_v38, %v311_v39 }
 0x155   :  { %2312 = vtanh.f32 %v484_v40  ;;  %v2006_v48 = vmul.f32 -1.442695, %v484_v40 }
 0x156   :  { %2314 = vpow2.f32 %v2005_v41 }
 0x15f   :  { %v2313_v42 = vpop.eup %2312 }
 0x160   :  { %494 = vrot.lane.b32.xlu1 %v2313_v42, %s2442_s2  ;;  %v2315_v43 = vpop.eup %2314 }
 0x161   :  { %v389_v44 = vadd.f32 1.0, %v2315_v43 }
 0x163   :  { %2316 = vrcp.f32 %v389_v44 }
 0x164   :  { %2318 = vpow2.f32 %v2006_v48 }
 0x16d   :  { %v2317_v45 = vpop.eup %2316 }
 0x16e   :  { %v2319_v49 = vpop.eup %2318  ;;  %v393_v54 = vmul.f32 0.0, %v2317_v45 }
 0x16f   :  { %v488_v50 = vadd.f32 1.0, %v2319_v49 }
 0x171   :  { %2320 = vrcp.f32 %v488_v50 }
 0x177   :  { %v396_v46 = vpop.permute.xlu0 %395 }
 0x178   :  { %v398_v47 = vmul.f32 %v2317_v45, %v396_v46 }
 0x17a   :  { %400 = vrot.lane.b32.xlu1 %v398_v47, %s2443_s8  ;;  %v731_v47 = vld [vmem:[#allocation2 + $0xa] sm:$0x3] }
 0x17b   :  { %v2321_v51 = vpop.eup %2320 }
 0x17c   :  { %v492_v58 = vmul.f32 0.0, %v2321_v51 }
 0x1d2   :  { %v495_v52 = vpop.permute.xlu1 %494 }
 0x1d3   :  { %v497_v53 = vmul.f32 %v2321_v51, %v495_v52 }
 0x1d5   :  { %499 = vrot.lane.b32.xlu0 %v497_v53, %s2443_s8 }
 0x1ec   :  { %v401_v55 = vpop.permute.xlu1 %400 }
 0x1ed   :  { %v2591_v56 = vadd.f32 %v401_v55, %v393_v54 }
 0x1ef   :  { %2322 = vtanh.f32 %v2591_v56 }
 0x1f9   :  { %v2323_v57 = vpop.eup %2322 }
 0x1fa   :  { %406 = vrot.lane.b32.xlu1 %v2323_v57, %s2444_s24 }
 0x247   :  { %v500_v59 = vpop.permute.xlu0 %499 }
 0x248   :  { %v502_v60 = vadd.f32 %v500_v59, %v492_v58 }
 0x24a   :  { %2324 = vtanh.f32 %v502_v60 }
 0x254   :  { %v2325_v61 = vpop.eup %2324 }
 0x255   :  { %505 = vrot.lane.b32.xlu0 %v2325_v61, %s2444_s24 }
 0x26c   :  { %v407_v62 = vpop.permute.xlu1 %406 }
 0x26d   :  { %v409_v63 = vmul.f32 %v2317_v45, %v407_v62  ;;  %v730_v62 = vld [vmem:[#allocation2 + $0x4] sm:$0x3] }
 0x26f   :  { %510 = vrot.lane.b32.xlu1 %v409_v63, %s2445_s25 }
 0x2c7   :  { %v506_v1 = vpop.permute.xlu0 %505 }
 0x2c8   :  { %v508_v2 = vmul.f32 %v2321_v51, %v506_v1 }
 0x2ca   :  { %516 = vrot.lane.b32.xlu0 %v508_v2, %s2443_s8 }
 0x2e1   :  { %v511_v3 = vpop.permute.xlu1 %510 }
 0x2e2   :  { %514 = vst.msk [vmem:[%s2807_s9] sm:$0x3] %vm513_vm3, %v511_v3  ;;  %2141 = vmatmul.mubr.msk.f32.vlgmr.msra.gmra.mrb[4].mxu1 %vm42_vm0, %v511_v3 }
 0x2e3   :  { %2261 = vmatpush3.bf16.msra.mxu1 %v2538_v14  ;;  %2147 = vmatprep.mubr.msk.f32.mxu1 %vm2439_vm1, %v2440_v4 }
 0x2e4   :  { %2265 = vmatprep.subr.bf16.mxu1 %v2438_v0 }
 0x33c   :  { %v517_v5 = vpop.permute.xlu0 %516 }
 0x33d   :  { %519 = vst.msk [vmem:[%s2808_s10 + $0xe] sm:$0x3] %vm513_vm3, %v517_v5  ;;  %2148 = vmatmul.mubr.msk.f32.vlgmr.msra.gmra.mrb[6].mxu1 %vm42_vm0, %v517_v5 }
 0x33e   :  { %2267 = vmatpush3.bf16.msra.mxu1 %v2538_v14  ;;  %2161 = vmatprep.mubr.msk.f32.mxu1 %vm2439_vm1, %v2440_v4 }
 0x33f   :  { %2271 = vmatprep.subr.bf16.mxu1 %v2438_v0 }
 0x3b5   :  { %v590_v6 = vpop.f32.mrb[4].mxu1 }
 0x3b6   :  { %v2142_v7 = vpop.f32.mrb[5].mxu1  ;;  %v594_v26 = vadd.f32 %v590_v6, %v520_v25 }
 0x3b8   :  { %v2008_v29 = vmul.f32 -1.442695, %v594_v26 }
 0x410   :  { %v687_v9 = vpop.f32.mrb[6].mxu1 }
 0x411   :  { %692 = vrot.lane.b32.xlu1 %v687_v9, %s2441_s22  ;;  %v2149_v10 = vpop.f32.mrb[7].mxu1 }
 0x483   :  { %v693_v12 = vpop.permute.xlu1 %692 }
 0x484   :  { %v695_v13 = vadd.f32 %v693_v12, %v521_v11 }
 0x486   :  { %2326 = vtanh.f32 %v695_v13  ;;  %v2010_v16 = vmul.f32 -1.442695, %v695_v13 }
 0x488   :  { %2328 = vpow2.f32 %v2010_v16 }
 0x490   :  { %v2327_v15 = vpop.eup %2326 }
 0x491   :  { %705 = vrot.lane.b32.xlu0 %v2327_v15, %s2442_s2 }
 0x492   :  { %v2329_v17 = vpop.eup %2328 }
 0x493   :  { %v699_v18 = vadd.f32 1.0, %v2329_v17 }
 0x495   :  { %2330 = vrcp.f32 %v699_v18 }
 0x49f   :  { %v2331_v19 = vpop.eup %2330 }
 0x4a0   :  { %v703_v22 = vmul.f32 %v2331_v19, %v502_v60 }
 0x503   :  { %v706_v20 = vpop.permute.xlu0 %705 }
 0x504   :  { %v708_v21 = vmul.f32 %v2331_v19, %v706_v20 }
 0x506   :  { %710 = vrot.lane.b32.xlu1 %v708_v21, %s2443_s8 }
 0x578   :  { %v711_v23 = vpop.permute.xlu1 %710 }
 0x579   :  { %v713_v24 = vadd.f32 %v711_v23, %v703_v22 }
 0x57b   :  { %2332 = vtanh.f32 %v713_v24 }
 0x57c   :  { %2334 = vtanh.f32 %v594_v26 }
 0x57d   :  { %2336 = vpow2.f32 %v2008_v29 }
 0x585   :  { %v2333_v27 = vpop.eup %2332 }
 0x586   :  { %716 = vrot.lane.b32.xlu0 %v2333_v27, %s2444_s24  ;;  %v2335_v28 = vpop.eup %2334 }
 0x587   :  { %v2337_v30 = vpop.eup %2336 }
 0x588   :  { %v598_v31 = vadd.f32 1.0, %v2337_v30 }
 0x58a   :  { %604 = vrot.lane.b32.xlu0 %v2335_v28, %s2442_s2  ;;  %2338 = vrcp.f32 %v598_v31 }
 0x594   :  { %v2339_v34 = vpop.eup %2338 }
 0x595   :  { %v602_v38 = vmul.f32 %v2339_v34, %v2591_v56 }
 0x5f8   :  { %v717_v32 = vpop.permute.xlu0 %716 }
 0x5f9   :  { %v719_v33 = vmul.f32 %v2331_v19, %v717_v32 }
 0x5fb   :  { %726 = vrot.lane.b32.xlu1 %v719_v33, %s2443_s8 }
 0x5fc   :  { %v605_v35 = vpop.permute.xlu0 %604 }
 0x5fd   :  { %v607_v36 = vmul.f32 %v2339_v34, %v605_v35 }
 0x5ff   :  { %609 = vrot.lane.b32.xlu1 %v607_v36, %s2443_s8 }
 0x66d   :  { %v727_v37 = vpop.permute.xlu1 %726 }
 0x66e   :  { %729 = vst.msk [vmem:[%s2808_s10 + $0xc] sm:$0x3] %vm513_vm3, %v727_v37  ;;  %2162 = vmatmul.mubr.msk.f32.vlgmr.msra.gmra.mrb[8].mxu1 %vm42_vm0, %v727_v37 }
 0x66f   :  { %2273 = vmatpush3.bf16.msra.mxu1 %v2538_v14  ;;  %2175 = vmatprep.mubr.msk.f32.mxu1 %vm2439_vm1, %v2440_v4 }
 0x670   :  { %2277 = vmatprep.subr.bf16.mxu1 %v2438_v0 }
 0x671   :  { %v610_v39 = vpop.permute.xlu1 %609 }
 0x672   :  { %v612_v40 = vadd.f32 %v610_v39, %v602_v38  ;;  %v940_v39 = vld [vmem:[#allocation2 + $0x6] sm:$0x3] }
 0x674   :  { %2340 = vtanh.f32 %v612_v40 }
 0x67e   :  { %v2341_v41 = vpop.eup %2340 }
 0x67f   :  { %615 = vrot.lane.b32.xlu1 %v2341_v41, %s2444_s24 }
 0x6f1   :  { %v616_v42 = vpop.permute.xlu1 %615 }
 0x6f2   :  { %v618_v43 = vmul.f32 %v2339_v34, %v616_v42 }
 0x6f4   :  { %721 = vrot.lane.b32.xlu1 %v618_v43, %s2445_s25 }
 0x741   :  { %v897_v44 = vpop.f32.mrb[8].mxu1 }
 0x742   :  { %902 = vrot.lane.b32.xlu0 %v897_v44, %s2441_s22  ;;  %v2163_v45 = vpop.f32.mrb[9].mxu1 }
 0x766   :  { %v722_v46 = vpop.permute.xlu1 %721 }
 0x767   :  { %724 = vst.msk [vmem:[%s2807_s9 + $0x2] sm:$0x3] %vm513_vm3, %v722_v46  ;;  %2155 = vmatmul.mubr.msk.f32.vlgmr.msra.gmra.mrb[2].mxu0 %vm42_vm0, %v722_v46 }
 0x768   :  { %2270 = vmatpush3.bf16.msra.mxu0 %v2519_v8  ;;  %2168 = vmatprep.mubr.msk.f32.mxu0 %vm2439_vm1, %v2440_v4 }
 0x769   :  { %2274 = vmatprep.subr.bf16.mxu0 %v2438_v0 }
 0x7b4   :  { %v903_v48 = vpop.permute.xlu0 %902 }
 0x7b5   :  { %v905_v49 = vadd.f32 %v903_v48, %v731_v47 }
 0x7b7   :  { %2342 = vtanh.f32 %v905_v49  ;;  %v2014_v51 = vmul.f32 -1.442695, %v905_v49 }
 0x7b9   :  { %2344 = vpow2.f32 %v2014_v51 }
 0x7c1   :  { %v2343_v50 = vpop.eup %2342 }
 0x7c2   :  { %915 = vrot.lane.b32.xlu0 %v2343_v50, %s2442_s2 }
 0x7c3   :  { %v2345_v52 = vpop.eup %2344 }
 0x7c4   :  { %v909_v53 = vadd.f32 1.0, %v2345_v52 }
 0x7c6   :  { %2346 = vrcp.f32 %v909_v53 }
 0x7d0   :  { %v2347_v54 = vpop.eup %2346 }
 0x7d1   :  { %v913_v59 = vmul.f32 %v2347_v54, %v713_v24  ;;  %v941_v24 = vld [vmem:[#allocation2 + $0x8] sm:$0x3] }
 0x834   :  { %v916_v55 = vpop.permute.xlu0 %915 }
 0x835   :  { %v918_v56 = vmul.f32 %v2347_v54, %v916_v55 }
 0x837   :  { %920 = vrot.lane.b32.xlu0 %v918_v56, %s2443_s8 }
 0x83a   :  { %v800_v57 = vpop.f32.mrb[2].mxu0 }
 0x83b   :  { %v2156_v58 = vpop.f32.mrb[3].mxu0  ;;  %v804_v63 = vadd.f32 %v800_v57, %v730_v62 }
 0x83d   :  { %v2012_v3 = vmul.f32 -1.442695, %v804_v63 }
 0x8a9   :  { %v921_v60 = vpop.permute.xlu0 %920 }
 0x8aa   :  { %v923_v61 = vadd.f32 %v921_v60, %v913_v59 }
 0x8ac   :  { %2348 = vtanh.f32 %v923_v61 }
 0x8ad   :  { %2350 = vtanh.f32 %v804_v63 }
 0x8ae   :  { %2352 = vpow2.f32 %v2012_v3 }
 0x8b6   :  { %v2349_v1 = vpop.eup %2348 }
 0x8b7   :  { %926 = vrot.lane.b32.xlu1 %v2349_v1, %s2444_s24  ;;  %v2351_v2 = vpop.eup %2350 }
 0x8b8   :  { %v2353_v5 = vpop.eup %2352 }
 0x8b9   :  { %v808_v6 = vadd.f32 1.0, %v2353_v5 }
 0x8bb   :  { %814 = vrot.lane.b32.xlu1 %v2351_v2, %s2442_s2  ;;  %2354 = vrcp.f32 %v808_v6 }
 0x8c5   :  { %v2355_v10 = vpop.eup %2354 }
 0x8c6   :  { %v812_v15 = vmul.f32 %v2355_v10, %v612_v40 }
 0x929   :  { %v927_v7 = vpop.permute.xlu1 %926 }
 0x92a   :  { %v929_v9 = vmul.f32 %v2347_v54, %v927_v7 }
 0x92c   :  { %936 = vrot.lane.b32.xlu0 %v929_v9, %s2443_s8 }
 0x92d   :  { %v815_v11 = vpop.permute.xlu1 %814 }
 0x92e   :  { %v817_v12 = vmul.f32 %v2355_v10, %v815_v11 }
 0x930   :  { %819 = vrot.lane.b32.xlu0 %v817_v12, %s2443_s8 }
 0x99e   :  { %v937_v13 = vpop.permute.xlu0 %936 }
 0x99f   :  { %939 = vst.msk [vmem:[%s2808_s10 + $0xa] sm:$0x3] %vm513_vm3, %v937_v13  ;;  %2176 = vmatmul.mubr.msk.f32.vlgmr.msra.gmra.mrb[10].mxu1 %vm42_vm0, %v937_v13 }
 0x9a0   :  { %2279 = vmatpush3.bf16.msra.mxu1 %v2538_v14  ;;  %2189 = vmatprep.mubr.msk.f32.mxu1 %vm2439_vm1, %v2440_v4 }
 0x9a1   :  { %2283 = vmatprep.subr.bf16.mxu1 %v2438_v0 }
 0x9a2   :  { %v820_v16 = vpop.permute.xlu0 %819 }
 0x9a3   :  { %v822_v17 = vadd.f32 %v820_v16, %v812_v15 }
 0x9a5   :  { %2356 = vtanh.f32 %v822_v17 }
 0x9af   :  { %v2357_v18 = vpop.eup %2356 }
 0x9b0   :  { %825 = vrot.lane.b32.xlu1 %v2357_v18, %s2444_s24 }
 0xa22   :  { %v826_v19 = vpop.permute.xlu1 %825 }
 0xa23   :  { %v828_v20 = vmul.f32 %v2355_v10, %v826_v19  ;;  %v1150_v10 = vld [vmem:[#allocation2 + $0x8] sm:$0x3] }
 0xa25   :  { %931 = vrot.lane.b32.xlu1 %v828_v20, %s2445_s25 }
 0xa72   :  { %v1107_v21 = vpop.f32.mrb[10].mxu1 }
 0xa73   :  { %1112 = vrot.lane.b32.xlu0 %v1107_v21, %s2441_s22  ;;  %v2177_v22 = vpop.f32.mrb[11].mxu1 }
 0xa97   :  { %v932_v23 = vpop.permute.xlu1 %931 }
 0xa98   :  { %934 = vst.msk [vmem:[%s2807_s9 + $0x4] sm:$0x3] %vm513_vm3, %v932_v23  ;;  %2169 = vmatmul.mubr.msk.f32.vlgmr.msra.gmra.mrb[4].mxu0 %vm42_vm0, %v932_v23 }
 0xa99   :  { %2276 = vmatpush3.bf16.msra.mxu0 %v2519_v8  ;;  %2182 = vmatprep.mubr.msk.f32.mxu0 %vm2439_vm1, %v2440_v4 }
 0xa9a   :  { %2280 = vmatprep.subr.bf16.mxu0 %v2438_v0 }
 0xae5   :  { %v1113_v25 = vpop.permute.xlu0 %1112 }
 0xae6   :  { %v1115_v26 = vadd.f32 %v1113_v25, %v941_v24 }
 0xae8   :  { %2358 = vtanh.f32 %v1115_v26  ;;  %v2018_v28 = vmul.f32 -1.442695, %v1115_v26 }
 0xaea   :  { %2360 = vpow2.f32 %v2018_v28 }
 0xaf2   :  { %v2359_v27 = vpop.eup %2358 }
 0xaf3   :  { %1125 = vrot.lane.b32.xlu0 %v2359_v27, %s2442_s2 }
 0xaf4   :  { %v2361_v29 = vpop.eup %2360 }
 0xaf5   :  { %v1119_v30 = vadd.f32 1.0, %v2361_v29 }
 0xaf7   :  { %2362 = vrcp.f32 %v1119_v30 }
 0xb01   :  { %v2363_v31 = vpop.eup %2362 }
 0xb02   :  { %v1123_v36 = vmul.f32 %v2363_v31, %v923_v61  ;;  %v1151_v61 = vld [vmem:[#allocation2 + $0x6] sm:$0x3] }
 0xb65   :  { %v1126_v32 = vpop.permute.xlu0 %1125 }
 0xb66   :  { %v1128_v33 = vmul.f32 %v2363_v31, %v1126_v32 }
 0xb68   :  { %1130 = vrot.lane.b32.xlu1 %v1128_v33, %s2443_s8 }
 0xb6b   :  { %v1010_v34 = vpop.f32.mrb[4].mxu0 }
 0xb6c   :  { %v2170_v35 = vpop.f32.mrb[5].mxu0  ;;  %v1014_v40 = vadd.f32 %v1010_v34, %v940_v39 }
 0xb6e   :  { %v2016_v43 = vmul.f32 -1.442695, %v1014_v40 }
 0xbda   :  { %v1131_v37 = vpop.permute.xlu1 %1130 }
 0xbdb   :  { %v2674_v38 = vadd.f32 %v1131_v37, %v1123_v36 }
 0xbdd   :  { %2364 = vtanh.f32 %v2674_v38 }
 0xbde   :  { %2366 = vtanh.f32 %v1014_v40 }
 0xbdf   :  { %2368 = vpow2.f32 %v2016_v43 }
 0xbe7   :  { %v2365_v41 = vpop.eup %2364 }
 0xbe8   :  { %1136 = vrot.lane.b32.xlu0 %v2365_v41, %s2444_s24  ;;  %v2367_v42 = vpop.eup %2366 }
 0xbe9   :  { %v2369_v44 = vpop.eup %2368 }
 0xbea   :  { %v1018_v45 = vadd.f32 1.0, %v2369_v44 }
 0xbec   :  { %1024 = vrot.lane.b32.xlu0 %v2367_v42, %s2442_s2  ;;  %2370 = vrcp.f32 %v1018_v45  ;;  %v1360_v42 = vld [vmem:[#allocation2 + $0xa] sm:$0x3] }
 0xbf6   :  { %v2371_v48 = vpop.eup %2370 }
 0xbf7   :  { %v1022_v52 = vmul.f32 %v2371_v48, %v822_v17 }
 0xc5a   :  { %v1137_v46 = vpop.permute.xlu0 %1136 }
 0xc5b   :  { %v1139_v47 = vmul.f32 %v2363_v31, %v1137_v46 }
 0xc5d   :  { %1146 = vrot.lane.b32.xlu1 %v1139_v47, %s2443_s8 }
 0xc5e   :  { %v1025_v49 = vpop.permute.xlu0 %1024 }
 0xc5f   :  { %v1027_v50 = vmul.f32 %v2371_v48, %v1025_v49 }
 0xc61   :  { %1029 = vrot.lane.b32.xlu1 %v1027_v50, %s2443_s8 }
 0xccf   :  { %v1147_v51 = vpop.permute.xlu1 %1146 }
 0xcd0   :  { %1149 = vst.msk [vmem:[%s2808_s10 + $0x8] sm:$0x3] %vm513_vm3, %v1147_v51  ;;  %2190 = vmatmul.mubr.msk.f32.vlgmr.msra.gmra.mrb[12].mxu1 %vm42_vm0, %v1147_v51 }
 0xcd1   :  { %2285 = vmatpush3.bf16.msra.mxu1 %v2538_v14  ;;  %2203 = vmatprep.mubr.msk.f32.mxu1 %vm2439_vm1, %v2440_v4 }
 0xcd2   :  { %2289 = vmatprep.subr.bf16.mxu1 %v2438_v0 }
 0xcd3   :  { %v1030_v53 = vpop.permute.xlu1 %1029 }
 0xcd4   :  { %v1032_v54 = vadd.f32 %v1030_v53, %v1022_v52 }
 0xcd6   :  { %2372 = vtanh.f32 %v1032_v54 }
 0xce0   :  { %v2373_v55 = vpop.eup %2372 }
 0xce1   :  { %1035 = vrot.lane.b32.xlu0 %v2373_v55, %s2444_s24 }
 0xd53   :  { %v1036_v56 = vpop.permute.xlu0 %1035 }
 0xd54   :  { %v1038_v57 = vmul.f32 %v2371_v48, %v1036_v56 }
 0xd56   :  { %1141 = vrot.lane.b32.xlu1 %v1038_v57, %s2445_s25 }
 0xda3   :  { %v1317_v58 = vpop.f32.mrb[12].mxu1 }
 0xda4   :  { %1322 = vrot.lane.b32.xlu0 %v1317_v58, %s2441_s22  ;;  %v2191_v59 = vpop.f32.mrb[13].mxu1 }
 0xdc8   :  { %v1142_v60 = vpop.permute.xlu1 %1141 }
 0xdc9   :  { %1144 = vst.msk [vmem:[%s2807_s9 + $0x6] sm:$0x3] %vm513_vm3, %v1142_v60  ;;  %2183 = vmatmul.mubr.msk.f32.vlgmr.msra.gmra.mrb[6].mxu0 %vm42_vm0, %v1142_v60 }
 0xdca   :  { %2282 = vmatpush3.bf16.msra.mxu0 %v2519_v8  ;;  %2196 = vmatprep.mubr.msk.f32.mxu0 %vm2439_vm1, %v2440_v4 }
 0xdcb   :  { %2286 = vmatprep.subr.bf16.mxu0 %v2438_v0 }
 0xe16   :  { %v1323_v62 = vpop.permute.xlu0 %1322 }
 0xe17   :  { %v1325_v63 = vadd.f32 %v1323_v62, %v1151_v61 }
 0xe19   :  { %2374 = vtanh.f32 %v1325_v63  ;;  %v2022_v2 = vmul.f32 -1.442695, %v1325_v63 }
 0xe1b   :  { %2376 = vpow2.f32 %v2022_v2 }
 0xe23   :  { %v2375_v1 = vpop.eup %2374 }
 0xe24   :  { %1335 = vrot.lane.b32.xlu1 %v2375_v1, %s2442_s2 }
 0xe25   :  { %v2377_v3 = vpop.eup %2376 }
 0xe26   :  { %v1329_v5 = vadd.f32 1.0, %v2377_v3 }
 0xe28   :  { %2378 = vrcp.f32 %v1329_v5 }
 0xe32   :  { %v2379_v6 = vpop.eup %2378 }
 0xe33   :  { %v1333_v17 = vmul.f32 %v2379_v6, %v2674_v38  ;;  %v1361_v38 = vld [vmem:[#allocation2 + $0x4] sm:$0x3] }
 0xe96   :  { %v1336_v7 = vpop.permute.xlu1 %1335 }
 0xe97   :  { %v1338_v9 = vmul.f32 %v2379_v6, %v1336_v7 }
 0xe99   :  { %1340 = vrot.lane.b32.xlu0 %v1338_v9, %s2443_s8 }
 0xe9c   :  { %v1220_v11 = vpop.f32.mrb[6].mxu0 }
 0xe9d   :  { %v1224_v12 = vadd.f32 %v1220_v11, %v1150_v10  ;;  %v2184_v13 = vpop.f32.mrb[7].mxu0 }
 0xe9f   :  { %2380 = vtanh.f32 %v1224_v12  ;;  %v2020_v16 = vmul.f32 -1.442695, %v1224_v12  ;;  %v1570_v12 = vld [vmem:[#allocation2 + $0xc] sm:$0x3] }
 0xea1   :  { %2382 = vpow2.f32 %v2020_v16 }
 0xea9   :  { %v2381_v15 = vpop.eup %2380 }
 0xeaa   :  { %1234 = vrot.lane.b32.xlu0 %v2381_v15, %s2442_s2 }
 0xeab   :  { %v2383_v18 = vpop.eup %2382 }
 0xeac   :  { %v1228_v21 = vadd.f32 1.0, %v2383_v18  ;;  %v1571_v18 = vld [vmem:[#allocation2 + $0x2] sm:$0x3] }
 0xf0b   :  { %v1341_v19 = vpop.permute.xlu0 %1340 }
 0xf0c   :  { %v2706_v20 = vadd.f32 %v1341_v19, %v1333_v17 }
 0xf0e   :  { %2384 = vtanh.f32 %v2706_v20 }
 0xf0f   :  { %2386 = vrcp.f32 %v1228_v21 }
 0xf18   :  { %v2385_v22 = vpop.eup %2384 }
 0xf19   :  { %1346 = vrot.lane.b32.xlu1 %v2385_v22, %s2444_s24  ;;  %v2387_v23 = vpop.eup %2386 }
 0xf1a   :  { %v1232_v28 = vmul.f32 %v2387_v23, %v1032_v54 }
 0xf1c   :  { %v1235_v24 = vpop.permute.xlu0 %1234 }
 0xf1d   :  { %v1237_v25 = vmul.f32 %v2387_v23, %v1235_v24 }
 0xf1f   :  { %1239 = vrot.lane.b32.xlu0 %v1237_v25, %s2443_s8 }
 0xf8b   :  { %v1347_v26 = vpop.permute.xlu1 %1346 }
 0xf8c   :  { %v1349_v27 = vmul.f32 %v2379_v6, %v1347_v26 }
 0xf8e   :  { %1356 = vrot.lane.b32.xlu1 %v1349_v27, %s2443_s8 }
 0xf91   :  { %v1240_v29 = vpop.permute.xlu0 %1239 }
 0xf92   :  { %v1242_v30 = vadd.f32 %v1240_v29, %v1232_v28 }
 0xf94   :  { %2388 = vtanh.f32 %v1242_v30 }
 0xf9e   :  { %v2389_v31 = vpop.eup %2388 }
 0xf9f   :  { %1245 = vrot.lane.b32.xlu1 %v2389_v31, %s2444_s24 }
0x1000   :  { %v1357_v32 = vpop.permute.xlu1 %1356 }
0x1001   :  { %1359 = vst.msk [vmem:[%s2808_s10 + $0x6] sm:$0x3] %vm513_vm3, %v1357_v32  ;;  %2204 = vmatmul.mubr.msk.f32.vlgmr.msra.gmra.mrb[14].mxu1 %vm42_vm0, %v1357_v32 }
0x1002   :  { %2291 = vmatpush3.bf16.msra.mxu1 %v2538_v14  ;;  %2217 = vmatprep.mubr.msk.f32.mxu1 %vm2439_vm1, %v2440_v4 }
0x1003   :  { %2295 = vmatprep.subr.bf16.mxu1 %v2438_v0 }
0x1011   :  { %v1246_v33 = vpop.permute.xlu1 %1245 }
0x1012   :  { %v1248_v34 = vmul.f32 %v2387_v23, %v1246_v33 }
0x1014   :  { %1351 = vrot.lane.b32.xlu0 %v1248_v34, %s2445_s25 }
0x1086   :  { %v1352_v35 = vpop.permute.xlu0 %1351 }
0x1087   :  { %1354 = vst.msk [vmem:[%s2807_s9 + $0x8] sm:$0x3] %vm513_vm3, %v1352_v35  ;;  %2197 = vmatmul.mubr.msk.f32.vlgmr.msra.gmra.mrb[8].mxu0 %vm42_vm0, %v1352_v35 }
0x1088   :  { %2288 = vmatpush3.bf16.msra.mxu0 %v2519_v8  ;;  %2210 = vmatprep.mubr.msk.f32.mxu0 %vm2439_vm1, %v2440_v4 }
0x1089   :  { %2292 = vmatprep.subr.bf16.mxu0 %v2438_v0 }
0x10d4   :  { %v1527_v36 = vpop.f32.mrb[14].mxu1 }
0x10d5   :  { %1532 = vrot.lane.b32.xlu1 %v1527_v36, %s2441_s22  ;;  %v2205_v37 = vpop.f32.mrb[15].mxu1 }
0x1147   :  { %v1533_v39 = vpop.permute.xlu1 %1532 }
0x1148   :  { %v1535_v40 = vadd.f32 %v1533_v39, %v1361_v38 }
0x114a   :  { %2390 = vtanh.f32 %v1535_v40  ;;  %v2026_v0 = vmul.f32 -1.442695, %v1535_v40 }
0x1154   :  { %v2391_v41 = vpop.eup %2390 }
0x1155   :  { %1545 = vrot.lane.b32.xlu0 %v2391_v41, %s2442_s2 }
0x115a   :  { %v1430_v43 = vpop.f32.mrb[8].mxu0 }
0x115b   :  { %v1434_v44 = vadd.f32 %v1430_v43, %v1360_v42  ;;  %v2198_v45 = vpop.f32.mrb[9].mxu0 }
0x115d   :  { %2392 = vtanh.f32 %v1434_v44  ;;  %v2024_v49 = vmul.f32 -1.442695, %v1434_v44 }
0x115e   :  { %2394 = vpow2.f32 %v2026_v0 }
0x1167   :  { %v2393_v46 = vpop.eup %2392 }
0x1168   :  { %1444 = vrot.lane.b32.xlu0 %v2393_v46, %s2442_s2  ;;  %v2395_v47 = vpop.eup %2394  ;;  %v1780_v46 = vld [vmem:[#allocation2 + $0xe] sm:$0x3] }
0x1169   :  { %v1539_v48 = vadd.f32 1.0, %v2395_v47 }
0x116b   :  { %2396 = vrcp.f32 %v1539_v48 }
0x116c   :  { %2398 = vpow2.f32 %v2024_v49 }
0x1175   :  { %v2397_v50 = vpop.eup %2396 }
0x1176   :  { %v2399_v53 = vpop.eup %2398  ;;  %v1543_v58 = vmul.f32 %v2397_v50, %v2706_v20 }
0x1177   :  { %v1438_v54 = vadd.f32 1.0, %v2399_v53 }
0x1179   :  { %2400 = vrcp.f32 %v1438_v54 }
0x1183   :  { %v2401_v55 = vpop.eup %2400 }
0x1184   :  { %v1442_v62 = vmul.f32 %v2401_v55, %v1242_v30 }
0x11c7   :  { %v1546_v51 = vpop.permute.xlu0 %1545 }
0x11c8   :  { %v1548_v52 = vmul.f32 %v2397_v50, %v1546_v51 }
0x11ca   :  { %1550 = vrot.lane.b32.xlu1 %v1548_v52, %s2443_s8 }
0x11da   :  { %v1445_v56 = vpop.permute.xlu0 %1444 }
0x11db   :  { %v1447_v57 = vmul.f32 %v2401_v55, %v1445_v56 }
0x11dd   :  { %1449 = vrot.lane.b32.xlu0 %v1447_v57, %s2443_s8 }
0x123c   :  { %v1551_v59 = vpop.permute.xlu1 %1550 }
0x123d   :  { %v2738_v60 = vadd.f32 %v1551_v59, %v1543_v58  ;;  %v1781_v58 = vld [vmem:[#allocation2] sm:$0x3] }
0x123f   :  { %2402 = vtanh.f32 %v2738_v60 }
0x1249   :  { %v2403_v61 = vpop.eup %2402 }
0x124a   :  { %1556 = vrot.lane.b32.xlu1 %v2403_v61, %s2444_s24 }
0x124f   :  { %v1450_v63 = vpop.permute.xlu0 %1449 }
0x1250   :  { %v1452_v1 = vadd.f32 %v1450_v63, %v1442_v62 }
0x1252   :  { %2404 = vtanh.f32 %v1452_v1 }
0x125c   :  { %v2405_v2 = vpop.eup %2404 }
0x125d   :  { %1455 = vrot.lane.b32.xlu0 %v2405_v2, %s2444_s24 }
0x12bc   :  { %v1557_v3 = vpop.permute.xlu1 %1556 }
0x12bd   :  { %v1559_v5 = vmul.f32 %v2397_v50, %v1557_v3 }
0x12bf   :  { %1566 = vrot.lane.b32.xlu1 %v1559_v5, %s2443_s8 }
0x12cf   :  { %v1456_v6 = vpop.permute.xlu0 %1455 }
0x12d0   :  { %v1458_v7 = vmul.f32 %v2401_v55, %v1456_v6 }
0x12d2   :  { %1561 = vrot.lane.b32.xlu1 %v1458_v7, %s2445_s25 }
0x1331   :  { %v1567_v9 = vpop.permute.xlu1 %1566 }
0x1332   :  { %1569 = vst.msk [vmem:[%s2808_s10 + $0x4] sm:$0x3] %vm513_vm3, %v1567_v9  ;;  %2218 = vmatmul.mubr.msk.f32.vlgmr.msra.gmra.mrb[16].mxu1 %vm42_vm0, %v1567_v9 }
0x1333   :  { %2297 = vmatpush3.bf16.msra.mxu1 %v2538_v14  ;;  %2231 = vmatprep.mubr.msk.f32.mxu1 %vm2439_vm1, %v2440_v4 }
0x1344   :  { %v1562_v10 = vpop.permute.xlu1 %1561 }
0x1345   :  { %1564 = vst.msk [vmem:[%s2807_s9 + $0xa] sm:$0x3] %vm513_vm3, %v1562_v10  ;;  %2211 = vmatmul.mubr.msk.f32.vlgmr.msra.gmra.mrb[10].mxu0 %vm42_vm0, %v1562_v10 }
0x1346   :  { %2294 = vmatpush3.bf16.msra.mxu0 %v2519_v8  ;;  %2224 = vmatprep.mubr.msk.f32.mxu0 %vm2439_vm1, %v2440_v4 }
0x1405   :  { %v1737_v11 = vpop.f32.mrb[16].mxu1 }
0x1406   :  { %1742 = vrot.lane.b32.xlu0 %v1737_v11, %s2441_s22  ;;  %v2219_v14 = vpop.f32.mrb[17].mxu1 }
0x1418   :  { %v1640_v13 = vpop.f32.mrb[10].mxu0 }
0x1419   :  { %v1644_v15 = vadd.f32 %v1640_v13, %v1570_v12  ;;  %v2212_v16 = vpop.f32.mrb[11].mxu0 }
0x141b   :  { %2406 = vtanh.f32 %v1644_v15  ;;  %v2028_v20 = vmul.f32 -1.442695, %v1644_v15 }
0x1425   :  { %v2407_v17 = vpop.eup %2406 }
0x1426   :  { %1654 = vrot.lane.b32.xlu0 %v2407_v17, %s2442_s2 }
0x1478   :  { %v1743_v19 = vpop.permute.xlu0 %1742 }
0x1479   :  { %v1745_v21 = vadd.f32 %v1743_v19, %v1571_v18 }
0x147b   :  { %2408 = vtanh.f32 %v1745_v21  ;;  %v2030_v26 = vmul.f32 -1.442695, %v1745_v21 }
0x147c   :  { %2410 = vpow2.f32 %v2028_v20 }
0x1485   :  { %v2409_v8 = vpop.eup %2408 }
0x1486   :  { %1755 = vrot.lane.b32.xlu1 %v2409_v8, %s2442_s2  ;;  %v2411_v4 = vpop.eup %2410 }
0x1487   :  { %v1648_v22 = vadd.f32 1.0, %v2411_v4 }
0x1489   :  { %2412 = vrcp.f32 %v1648_v22 }
0x148a   :  { %2414 = vpow2.f32 %v2030_v26 }
0x1493   :  { %v2413_v23 = vpop.eup %2412 }
0x1494   :  { %v2415_v27 = vpop.eup %2414  ;;  %v1652_v32 = vmul.f32 %v2413_v23, %v1452_v1 }
0x1495   :  { %v1749_v28 = vadd.f32 1.0, %v2415_v27 }
0x1497   :  { %2416 = vrcp.f32 %v1749_v28 }
0x1498   :  { %v1655_v24 = vpop.permute.xlu0 %1654 }
0x1499   :  { %v1657_v25 = vmul.f32 %v2413_v23, %v1655_v24 }
0x149b   :  { %1659 = vrot.lane.b32.xlu0 %v1657_v25, %s2443_s8 }
0x14a1   :  { %v2417_v29 = vpop.eup %2416 }
0x14a2   :  { %v1753_v36 = vmul.f32 %v2417_v29, %v2738_v60 }
0x14f8   :  { %v1756_v30 = vpop.permute.xlu1 %1755 }
0x14f9   :  { %v1758_v31 = vmul.f32 %v2417_v29, %v1756_v30 }
0x14fb   :  { %1760 = vrot.lane.b32.xlu1 %v1758_v31, %s2443_s8 }
0x150d   :  { %v1660_v33 = vpop.permute.xlu0 %1659 }
0x150e   :  { %v1662_v34 = vadd.f32 %v1660_v33, %v1652_v32 }
0x1510   :  { %2418 = vtanh.f32 %v1662_v34 }
0x151a   :  { %v2419_v35 = vpop.eup %2418 }
0x151b   :  { %1665 = vrot.lane.b32.xlu0 %v2419_v35, %s2444_s24 }
0x156d   :  { %v1761_v37 = vpop.permute.xlu1 %1760 }
0x156e   :  { %v1763_v38 = vadd.f32 %v1761_v37, %v1753_v36 }
0x1570   :  { %2420 = vtanh.f32 %v1763_v38 }
0x157a   :  { %v2421_v39 = vpop.eup %2420 }
0x157b   :  { %1766 = vrot.lane.b32.xlu1 %v2421_v39, %s2444_s24 }
0x158d   :  { %v1666_v40 = vpop.permute.xlu0 %1665 }
0x158e   :  { %v1668_v41 = vmul.f32 %v2413_v23, %v1666_v40 }
0x1590   :  { %1771 = vrot.lane.b32.xlu0 %v1668_v41, %s2445_s25 }
0x15ed   :  { %v1767_v42 = vpop.permute.xlu1 %1766 }
0x15ee   :  { %v1769_v43 = vmul.f32 %v2417_v29, %v1767_v42 }
0x15f0   :  { %1776 = vrot.lane.b32.xlu1 %v1769_v43, %s2443_s8 }
0x1602   :  { %v1772_v44 = vpop.permute.xlu0 %1771 }
0x1603   :  { %1774 = vst.msk [vmem:[%s2807_s9 + $0xc] sm:$0x3] %vm513_vm3, %v1772_v44  ;;  %2225 = vmatmul.mubr.msk.f32.vlgmr.msra.gmra.mrb[12].mxu0 %vm42_vm0, %v1772_v44 }
0x1662   :  { %v1777_v45 = vpop.permute.xlu1 %1776 }
0x1663   :  { %1779 = vst.msk [vmem:[%s2808_s10 + $0x2] sm:$0x3] %vm513_vm3, %v1777_v45  ;;  %2232 = vmatmul.mubr.msk.f32.vlgmr.msra.gmra.mrb[18].mxu1 %vm42_vm0, %v1777_v45 }
0x16d6   :  { %v1850_v0 = vpop.f32.mrb[12].mxu0 }
0x16d7   :  { %v1854_v47 = vadd.f32 %v1850_v0, %v1780_v46  ;;  %v2226_v48 = vpop.f32.mrb[13].mxu0 }
0x16d9   :  { %2422 = vtanh.f32 %v1854_v47  ;;  %v2032_v51 = vmul.f32 -1.442695, %v1854_v47 }
0x16db   :  { %2424 = vpow2.f32 %v2032_v51 }
0x16e3   :  { %v2423_v49 = vpop.eup %2422 }
0x16e4   :  { %1864 = vrot.lane.b32.xlu0 %v2423_v49, %s2442_s2 }
0x16e5   :  { %v2425_v53 = vpop.eup %2424 }
0x16e6   :  { %v1858_v54 = vadd.f32 1.0, %v2425_v53 }
0x16e8   :  { %2426 = vrcp.f32 %v1858_v54 }
0x16f2   :  { %v2427_v55 = vpop.eup %2426 }
0x16f3   :  { %v1862_v62 = vmul.f32 %v2427_v55, %v1662_v34 }
0x1736   :  { %v1947_v50 = vpop.f32.mrb[18].mxu1 }
0x1737   :  { %1952 = vrot.lane.b32.xlu1 %v1947_v50, %s2441_s22  ;;  %v2233_v52 = vpop.f32.mrb[19].mxu1 }
0x1756   :  { %v1865_v56 = vpop.permute.xlu0 %1864 }
0x1757   :  { %v1867_v57 = vmul.f32 %v2427_v55, %v1865_v56 }
0x1759   :  { %1869 = vrot.lane.b32.xlu0 %v1867_v57, %s2443_s8 }
0x17a9   :  { %v1953_v59 = vpop.permute.xlu1 %1952 }
0x17aa   :  { %v1955_v60 = vadd.f32 %v1953_v59, %v1781_v58 }
0x17ac   :  { %2428 = vtanh.f32 %v1955_v60  ;;  %v2034_v3 = vmul.f32 -1.442695, %v1955_v60 }
0x17b6   :  { %v2429_v61 = vpop.eup %2428 }
0x17b7   :  { %1965 = vrot.lane.b32.xlu1 %v2429_v61, %s2442_s2 }
0x17cb   :  { %v1870_v63 = vpop.permute.xlu0 %1869 }
0x17cc   :  { %v1872_v1 = vadd.f32 %v1870_v63, %v1862_v62 }
0x17ce   :  { %2430 = vtanh.f32 %v1872_v1 }
0x17cf   :  { %2432 = vpow2.f32 %v2034_v3 }
0x17d8   :  { %v2431_v2 = vpop.eup %2430 }
0x17d9   :  { %1875 = vrot.lane.b32.xlu0 %v2431_v2, %s2444_s24  ;;  %v2433_v5 = vpop.eup %2432 }
0x17da   :  { %v1959_v6 = vadd.f32 1.0, %v2433_v5 }
0x17dc   :  { %2434 = vrcp.f32 %v1959_v6 }
0x17e6   :  { %v2435_v7 = vpop.eup %2434 }
0x17e7   :  { %v1963_v12 = vmul.f32 %v2435_v7, %v1763_v38 }
0x1829   :  { %v1966_v9 = vpop.permute.xlu1 %1965 }
0x182a   :  { %v1968_v10 = vmul.f32 %v2435_v7, %v1966_v9 }
0x182c   :  { %1970 = vrot.lane.b32.xlu1 %v1968_v10, %s2443_s8 }
0x184b   :  { %v1876_v11 = vpop.permute.xlu0 %1875 }
0x184c   :  { %v1878_v14 = vmul.f32 %v2427_v55, %v1876_v11 }
0x184e   :  { %1981 = vrot.lane.b32.xlu0 %v1878_v14, %s2445_s25 }
0x189e   :  { %v1971_v13 = vpop.permute.xlu1 %1970 }
0x189f   :  { %v1973_v15 = vadd.f32 %v1971_v13, %v1963_v12 }
0x18a1   :  { %2436 = vtanh.f32 %v1973_v15 }
0x18ab   :  { %v2437_v16 = vpop.eup %2436 }
0x18ac   :  { %1976 = vrot.lane.b32.xlu1 %v2437_v16, %s2444_s24 }
0x18c0   :  { %v1982_v17 = vpop.permute.xlu0 %1981 }
0x18c1   :  { %1984 = vst.msk [vmem:[%s2807_s9 + $0xe] sm:$0x3] %vm513_vm3, %v1982_v17 }
0x191e   :  { %v1977_v18 = vpop.permute.xlu1 %1976 }
0x191f   :  { %v1979_v19 = vmul.f32 %v2435_v7, %v1977_v18 }
0x1921   :  { %1986 = vrot.lane.b32.xlu1 %v1979_v19, %s2443_s8 }
0x1993   :  { %v1987_v20 = vpop.permute.xlu1 %1986 }
0x1994   :  { %1989 = vst.msk [vmem:[%s2808_s10] sm:$0x3] %vm513_vm3, %v1987_v20 }

// kernel: dc_lstm_forward.5
= control target key start
LH: loop header
LB: loop body
LE: loop exit
PB: predicated region body
PF: predicated region fallthrough
CT: control target
= control target key end

     0   :  { %s3324_s0 = inlined_call_operand.vmem [shape: f32[16,16], index: 0, kind: input, shape index: {}]   ;;  %s3325_s1 = inlined_call_operand.vmem [shape: f32[16,16], index: 1, kind: input, shape index: {}]   ;;  %s3326_s2 = inlined_call_operand.vmem [shape: f32[16,16], index: 2, kind: input, shape index: {}]   ;;  %s3327_s3 = inlined_call_operand.vmem [shape: f32[16,16], index: 3, kind: input, shape index: {}]   ;;  %s3328_s4 = inlined_call_operand.vmem [shape: f32[16,32], index: 4, kind: input, shape index: {}]   ;;  %s3329_s5 = inlined_call_operand.vmem [shape: f32[16,128], index: 5, kind: input, shape index: {}]   ;;  %s3330_s6 = inlined_call_operand.vmem [shape: f32[16,128], index: 6, kind: input, shape index: {}]   ;;  %s3331_s7 = inlined_call_operand.vmem [shape: f32[16,128], index: 7, kind: input, shape index: {}]   ;;  %s3332_s8 = inlined_call_operand.vmem [shape: f32[16,128], index: 8, kind: input, shape index: {}]   ;;  %s3333_s9 = inlined_call_operand.vmem [shape: f32[32,128], index: 9, kind: input, shape index: {}]   ;;  %s3334_s10 = inlined_call_operand.vmem [shape: f32[16,64], index: 10, kind: input, shape index: {}]   ;;  %s3335_s11 = inlined_call_operand.vmem [shape: f32[16,64], index: 11, kind: input, shape index: {}]   ;;  %s3336_s12 = inlined_call_operand.vmem [shape: f32[1,128], index: 12, kind: input, shape index: {}]   ;;  %s3337_s13 = inlined_call_operand.vmem [shape: f32[16,3], index: 13, kind: input, shape index: {}]   ;;  %s3338_s14 = inlined_call_operand.vmem [shape: f32[16,3], index: 14, kind: input, shape index: {}]   ;;  %s3339_s15 = inlined_call_operand.vmem [shape: f32[1,3], index: 15, kind: input, shape index: {}]   ;;  %s3340_s16 = inlined_call_operand.hbm [shape: f32[2,3], index: 16, kind: output, shape index: {}]  }
   0x1   :  { %3342 = sst [smem:[#allocation6_spill]] %s3324_s0 }
   0x2   :  { %v60_v0 = vld [vmem:[%s3330_s6] sm:$0xff]  ;;  %v61_v1 = vld [vmem:[%s3330_s6 + $0x8] sm:$0xff]  ;;  %v2865_v3 = vmov 0.0|0.0   ;;  %vm2866_vm0 = vmmov 0   ;;  %v2867_v6 = vmov 0.0   ;;  %vm62_vm1 = vcmask 130048  }
   0x3   :  { %v500_v2 = vld [vmem:[%s3334_s10] sm:$0xff]  ;;  %2642 = vmatprep.subr.bf16.mxu1 %v2865_v3  ;;  %v2618_v4 = vpack.c.bf16 %v61_v1, %v60_v0  ;;  %v501_v5 = vld [vmem:[%s3334_s10 + $0x8] sm:$0xff]  ;;  %2496 = vmatprep.mubr.msk.f32.mxu1 %vm2866_vm0, %v2867_v6  ;;  %s3343_s28 = sld [smem:[#allocation6_spill]] }
   0x4   :  { %v58_v7 = vld [vmem:[%s3325_s1] sm:$0xff]  ;;  %v2977_v8 = vpack.c.bf16 %v501_v5, %v500_v2  ;;  %v503_v10 = vld [vmem:[%s3335_s11 + $0x8] sm:$0xff] }
   0x5   :  { %2457 = vmatprep.mubr.msk.f32.mxu0 %vm62_vm1, %v58_v7  ;;  %v502_v9 = vld [vmem:[%s3335_s11] sm:$0xff]  ;;  %2619 = vmatprep.subr.bf16.mxu0 %v2618_v4  ;;  %v57_v12 = vld [vmem:[%s3329_s5 + $0x8] sm:$0xff] }
   0x6   :  { %v56_v11 = vld [vmem:[%s3329_s5] sm:$0xff]  ;;  %2644 = vmatpush3.bf16.msra.mxu1 %v2977_v8  ;;  %2621 = vmatpush3.bf16.msra.mxu0 %v2618_v4  ;;  %v59_v13 = vld [vmem:[%s3325_s1 + $0x8] sm:$0xff]  ;;  %v2996_v14 = vpack.c.bf16 %v503_v10, %v502_v9 }
   0x7   :  { %v2622_v15 = vpack.c.bf16 %v57_v12, %v56_v11  ;;  %v227_v16 = vld [vmem:[%s3331_s7] sm:$0xff]  ;;  %v228_v17 = vld [vmem:[%s3331_s7 + $0x8] sm:$0xff]  ;;  %2645 = vmatprep.subr.bf16.mxu1 %v2865_v3 }
   0x8   :  { %v2626_v19 = vpack.c.bf16 %v228_v17, %v227_v16 }
   0x9   :  { %2623 = vmatprep.subr.bf16.mxu0 %v2622_v15  ;;  %v54_v18 = vld [vmem:[%s3343_s28] sm:$0xff]  ;;  %2497 = vmatmul.mubr.f32.vlgmr.msra.gmra.mrb[0].mxu1 %v2867_v6 }
   0xa   :  { %2458 = vmatmul.mubr.msk.f32.vlgmr.msra.gmra.mrb[0].mxu0 %vm62_vm1, %v59_v13  ;;  %2647 = vmatpush3.bf16.msra.mxu1 %v2996_v14 }
   0xb   :  { %2503 = vmatprep.mubr.msk.f32.mxu1 %vm2866_vm0, %v2867_v6 }
   0xc   :  { %21 = vsyncpa [#allocation4], 0  ;;  %2625 = vmatpush3.bf16.msra.mxu0 %v2622_v15  ;;  %2464 = vmatprep.mubr.msk.f32.mxu0 %vm62_vm1, %v54_v18  ;;  %v314_v20 = vld [vmem:[%s3332_s8] sm:$0xff]  ;;  %v315_v21 = vld [vmem:[%s3332_s8 + $0x8] sm:$0xff]  ;;  %vm405_vm2 = vcmask 261120   ;;  %s2871_s6 = smov 32  }
   0xd   :  { %2627 = vmatprep.subr.bf16.mxu0 %v2626_v19  ;;  %2648 = vmatprep.subr.bf16.mxu1 %v2865_v3  ;;  %v55_v22 = vld [vmem:[%s3343_s28 + $0x8] sm:$0xff]  ;;  %v225_v23 = vld [vmem:[%s3326_s2] sm:$0xff]  ;;  %v2630_v24 = vpack.c.bf16 %v315_v21, %v314_v20  ;;  %v403_v30 = vld [vmem:[%s3333_s9 + $0x10] sm:$0xff]  ;;  %s2872_s0 = smov 80   ;;  %s2873_s23 = smov [#allocation3]   ;;  %vm2317_vm3 = vcmask 17408  }
   0xe   :  { %2504 = vmatmul.mubr.f32.vlgmr.msra.gmra.mrb[2].mxu1 %v2867_v6  ;;  %v401_v25 = vld [vmem:[%s3333_s9] sm:$0xff]  ;;  %v402_v26 = vld [vmem:[%s3333_s9 + $0x8] sm:$0xff]  ;;  %v404_v31 = vld [vmem:[%s3333_s9 + $0x18] sm:$0xff]  ;;  %s2325_s11 = sshll.u32 %s2873_s23, 4  ;;  %s2326_s11 = int_to_ptr.vmem [resolvable:$true] %s2325_s11 }
   0xf   :  { %2650 = vmatpush3.bf16.msra.mxu1 %v2977_v8  ;;  %2510 = vmatprep.mubr.msk.f32.mxu1 %vm2866_vm0, %v2867_v6  ;;  %v226_v27 = vld [vmem:[%s3326_s2 + $0x8] sm:$0xff]  ;;  %v312_v28 = vld [vmem:[%s3327_s3] sm:$0xff]  ;;  %v2634_v29 = vpack.c.bf16 %v402_v26, %v401_v25  ;;  %v2638_v33 = vpack.c.bf16 %v404_v31, %v403_v30  ;;  %s2841_s24 = scalar_lea.vmem %s2326_s11, 32  ;;  %p2846_p1 = scmp.lt.s32.totalorder %s2326_s11, %s2326_s11 }
  0x10   :  { %2651 = vmatprep.subr.bf16.mxu1 %v2865_v3  ;;  %v313_v32 = vld [vmem:[%s3327_s3 + $0x8] sm:$0xff]  ;;  %v399_v34 = vld [vmem:[%s3328_s4] sm:$0xff]  ;;  %s2868_s3 = smov 64   ;;  %p2842_p0 = scmp.ne.s32.totalorder %s2326_s11, %s2841_s24 }
  0x11   :  { %v400_v35 = vld [vmem:[%s3328_s4 + $0x8] sm:$0xff]  ;;  %v2343_v40 = vld [vmem:[%s3336_s12] ss:$0 sm:$0xff]  ;;  %s2869_s4 = smov 96   ;;  %s2870_s12 = smov 16  }
  0x12   :  { %2465 = vmatmul.mubr.msk.f32.vlgmr.msra.gmra.mrb[0].mxu0 %vm62_vm1, %v55_v22  ;;  %p2847_p2 = scmp.lt.s32.totalorder %s2841_s24, %s2841_s24 }
  0x13   :  { %2629 = vmatpush3.bf16.msra.mxu0 %v2626_v19  ;;  %2471 = vmatprep.mubr.msk.f32.mxu0 %vm62_vm1, %v225_v23 }
  0x14   :  { %2631 = vmatprep.subr.bf16.mxu0 %v2630_v24  ;;  %p2848_p3 = por %p2847_p2, %p2846_p1 }
  0x16   :  { %p2849_p4 = pnand %p2848_p3, %p2842_p0 }
  0x1a   :  { %2472 = vmatmul.mubr.msk.f32.vlgmr.msra.gmra.mrb[0].mxu0 %vm62_vm1, %v226_v27 }
  0x1b   :  { %2633 = vmatpush3.bf16.msra.mxu0 %v2630_v24  ;;  %2478 = vmatprep.mubr.msk.f32.mxu0 %vm62_vm1, %v312_v28 }
  0x1c   :  { %2635 = vmatprep.subr.bf16.mxu0 %v2634_v29 }
  0x22   :  { %2479 = vmatmul.mubr.msk.f32.vlgmr.msra.gmra.mrb[0].mxu0 %vm62_vm1, %v313_v32 }
  0x23   :  { %2637 = vmatpush3.bf16.msra.mxu0 %v2634_v29  ;;  %2489 = vmatprep.mubr.msk.f32.mxu0 %vm405_vm2, %v399_v34 }
  0x24   :  { %2639 = vmatprep.subr.bf16.mxu0 %v2638_v33 }
  0x27   :  { %2641 = vmatpush3.bf16.msra.mxu0 %v2638_v33 }
  0x28   :  { %2660 = vmatprep.subr.bf16.mxu0 %v2865_v3 }
  0x2a   :  { %2490 = vmatmul.mubr.msk.f32.vlgmr.msra.gmra.mrb[0].mxu0 %vm405_vm2, %v400_v35 }
  0x2b   :  { %2662 = vmatpush3.bf16.msra.mxu0 %v2977_v8  ;;  %2538 = vmatprep.mubr.msk.f32.mxu0 %vm2866_vm0, %v2867_v6 }
  0x2c   :  { %2666 = vmatprep.subr.bf16.mxu0 %v2865_v3 }
  0xdc   :  { %v575_v36 = vpop.f32.mrb[0].mxu1 }
  0xdd   :  { %v2498_v37 = vpop.f32.mrb[1].mxu1 }
  0xe1   :  { %v670_v38 = vpop.f32.mrb[2].mxu1 }
  0xe2   :  { %675 = vrot.lane.b32.xlu0 %v670_v38, %s2868_s3  ;;  %v2505_v39 = vpop.f32.mrb[3].mxu1 }
  0xfd   :  { %v2491_v41 = vpop.f32.mrb[0].mxu0 }
  0xfe   :  { %v497_v42 = vadd.f32 %v2491_v41, %v2343_v40  ;;  %v478_v43 = vpop.f32.mrb[1].mxu0 }
  0xff   :  { %v496_v44 = vadd.f32 %v2343_v40, %v478_v43 }
 0x100   :  { %499 = vst [vmem:[#allocation2 + $0x8] sm:$0xff] %v497_v42 }
 0x101   :  { %498 = vst [vmem:[#allocation2] sm:$0xff] %v496_v44 }
 0x107   :  { %v3077_v49 = vld [vmem:[#allocation2 + $0xe] sm:$0x3]  ;;  %v3112_v31 = vld [vmem:[#allocation2 + $0xc] sm:$0x3] }
 0x108   :  { %v3073_v45 = vld [vmem:[#allocation2] sm:$0x3]  ;;  %v3106_v18 = vld [vmem:[#allocation2 + $0x2] sm:$0x3] }
 0x109   :  { %v579_v46 = vadd.f32 %v575_v36, %v3073_v45 }
 0x10b   :  { %2713 = vtanh.f32 %v579_v46  ;;  %v2344_v52 = vmul.f32 -1.442695, %v579_v46 }
 0x115   :  { %v2714_v47 = vpop.eup %2713 }
 0x116   :  { %589 = vrot.lane.b32.xlu0 %v2714_v47, %s2869_s4 }
 0x154   :  { %v676_v48 = vpop.permute.xlu0 %675 }
 0x155   :  { %v678_v50 = vadd.f32 %v676_v48, %v3077_v49 }
 0x157   :  { %2715 = vtanh.f32 %v678_v50  ;;  %v2345_v58 = vmul.f32 -1.442695, %v678_v50 }
 0x158   :  { %2717 = vpow2.f32 %v2344_v52 }
 0x161   :  { %v2716_v51 = vpop.eup %2715 }
 0x162   :  { %688 = vrot.lane.b32.xlu1 %v2716_v51, %s2869_s4  ;;  %v2718_v53 = vpop.eup %2717 }
 0x163   :  { %v583_v54 = vadd.f32 1.0, %v2718_v53 }
 0x165   :  { %2719 = vrcp.f32 %v583_v54 }
 0x166   :  { %2721 = vpow2.f32 %v2345_v58 }
 0x16f   :  { %v2720_v55 = vpop.eup %2719 }
 0x170   :  { %v2722_v59 = vpop.eup %2721  ;;  %v587_v0 = vmul.f32 0.0, %v2720_v55 }
 0x171   :  { %v682_v60 = vadd.f32 1.0, %v2722_v59 }
 0x173   :  { %2723 = vrcp.f32 %v682_v60 }
 0x17d   :  { %v2724_v61 = vpop.eup %2723 }
 0x17e   :  { %v686_v5 = vmul.f32 0.0, %v2724_v61 }
 0x188   :  { %v590_v56 = vpop.permute.xlu0 %589 }
 0x189   :  { %v592_v57 = vmul.f32 %v2720_v55, %v590_v56 }
 0x18b   :  { %594 = vrot.lane.b32.xlu1 %v592_v57, %s2870_s12 }
 0x1d4   :  { %v689_v62 = vpop.permute.xlu1 %688 }
 0x1d5   :  { %v691_v63 = vmul.f32 %v2724_v61, %v689_v62 }
 0x1d7   :  { %693 = vrot.lane.b32.xlu0 %v691_v63, %s2870_s12 }
 0x1fd   :  { %v595_v1 = vpop.permute.xlu1 %594 }
 0x1fe   :  { %v597_v2 = vadd.f32 %v595_v1, %v587_v0 }
 0x200   :  { %2725 = vtanh.f32 %v597_v2 }
 0x20a   :  { %v2726_v4 = vpop.eup %2725 }
 0x20b   :  { %600 = vrot.lane.b32.xlu1 %v2726_v4, %s2871_s6 }
 0x249   :  { %v694_v7 = vpop.permute.xlu0 %693 }
 0x24a   :  { %v3084_v9 = vadd.f32 %v694_v7, %v686_v5 }
 0x24c   :  { %2727 = vtanh.f32 %v3084_v9 }
 0x256   :  { %v2728_v10 = vpop.eup %2727 }
 0x257   :  { %699 = vrot.lane.b32.xlu0 %v2728_v10, %s2871_s6 }
 0x27d   :  { %v601_v11 = vpop.permute.xlu1 %600 }
 0x27e   :  { %v3088_v12 = vmul.f32 %v2720_v55, %v601_v11 }
 0x280   :  { %708 = vrot.lane.b32.xlu1 %v3088_v12, %s2872_s0 }
 0x2c9   :  { %v700_v13 = vpop.permute.xlu0 %699 }
 0x2ca   :  { %v3092_v15 = vmul.f32 %v2724_v61, %v700_v13  ;;  %v3139_v61 = vld [vmem:[#allocation2 + $0xa] sm:$0x3] }
 0x2cc   :  { %808 = vrot.lane.b32.xlu0 %v3092_v15, %s2870_s12 }
 0x2f2   :  { %v709_v16 = vpop.permute.xlu1 %708 }
 0x2f3   :  { %2511 = vmatmul.mubr.msk.f32.vlgmr.msra.gmra.mrb[4].mxu1 %vm62_vm1, %v709_v16  ;;  %v3146_v16 = vld [vmem:[#allocation2 + $0x4] sm:$0x3] }
 0x2f4   :  { %2653 = vmatpush3.bf16.msra.mxu1 %v2996_v14  ;;  %2517 = vmatprep.mubr.msk.f32.mxu1 %vm2866_vm0, %v2867_v6 }
 0x2f5   :  { %2654 = vmatprep.subr.bf16.mxu1 %v2865_v3 }
 0x33e   :  { %v809_v17 = vpop.permute.xlu0 %808 }
 0x33f   :  { %2518 = vmatmul.mubr.msk.f32.vlgmr.msra.gmra.mrb[6].mxu1 %vm62_vm1, %v809_v17 }
 0x340   :  { %2656 = vmatpush3.bf16.msra.mxu1 %v2977_v8  ;;  %2524 = vmatprep.mubr.msk.f32.mxu1 %vm2866_vm0, %v2867_v6 }
 0x341   :  { %2657 = vmatprep.subr.bf16.mxu1 %v2865_v3 }
 0x3c6   :  { %v778_v19 = vpop.f32.mrb[4].mxu1 }
 0x3c7   :  { %v782_v20 = vadd.f32 %v778_v19, %v3106_v18  ;;  %v2512_v21 = vpop.f32.mrb[5].mxu1 }
 0x3c9   :  { %2729 = vtanh.f32 %v782_v20  ;;  %v2347_v25 = vmul.f32 -1.442695, %v782_v20 }
 0x3cb   :  { %2731 = vpow2.f32 %v2347_v25 }
 0x3d3   :  { %v2730_v22 = vpop.eup %2729 }
 0x3d4   :  { %792 = vrot.lane.b32.xlu0 %v2730_v22, %s2869_s4 }
 0x3d5   :  { %v2732_v26 = vpop.eup %2731 }
 0x3d6   :  { %v786_v27 = vadd.f32 1.0, %v2732_v26 }
 0x3d8   :  { %2733 = vrcp.f32 %v786_v27 }
 0x3e2   :  { %v2734_v28 = vpop.eup %2733 }
 0x3e3   :  { %v790_v35 = vmul.f32 %v2734_v28, %v597_v2 }
 0x412   :  { %v878_v23 = vpop.f32.mrb[6].mxu1 }
 0x413   :  { %883 = vrot.lane.b32.xlu1 %v878_v23, %s2868_s3  ;;  %v2519_v24 = vpop.f32.mrb[7].mxu1 }
 0x446   :  { %v793_v29 = vpop.permute.xlu0 %792 }
 0x447   :  { %v795_v30 = vmul.f32 %v2734_v28, %v793_v29 }
 0x449   :  { %797 = vrot.lane.b32.xlu0 %v795_v30, %s2870_s12 }
 0x485   :  { %v884_v32 = vpop.permute.xlu1 %883 }
 0x486   :  { %v886_v33 = vadd.f32 %v884_v32, %v3112_v31 }
 0x488   :  { %2735 = vtanh.f32 %v886_v33  ;;  %v2349_v39 = vmul.f32 -1.442695, %v886_v33 }
 0x492   :  { %v2736_v34 = vpop.eup %2735 }
 0x493   :  { %896 = vrot.lane.b32.xlu1 %v2736_v34, %s2869_s4 }
 0x4bb   :  { %v798_v36 = vpop.permute.xlu0 %797 }
 0x4bc   :  { %v3116_v37 = vadd.f32 %v798_v36, %v790_v35 }
 0x4be   :  { %2737 = vtanh.f32 %v3116_v37 }
 0x4bf   :  { %2739 = vpow2.f32 %v2349_v39 }
 0x4c8   :  { %v2738_v38 = vpop.eup %2737 }
 0x4c9   :  { %803 = vrot.lane.b32.xlu0 %v2738_v38, %s2871_s6  ;;  %v2740_v40 = vpop.eup %2739 }
 0x4ca   :  { %v890_v41 = vadd.f32 1.0, %v2740_v40 }
 0x4cc   :  { %2741 = vrcp.f32 %v890_v41 }
 0x4d6   :  { %v2742_v42 = vpop.eup %2741 }
 0x4d7   :  { %v894_v48 = vmul.f32 %v2742_v42, %v3084_v9 }
 0x505   :  { %v897_v43 = vpop.permute.xlu1 %896 }
 0x506   :  { %v899_v44 = vmul.f32 %v2742_v42, %v897_v43 }
 0x508   :  { %901 = vrot.lane.b32.xlu1 %v899_v44, %s2870_s12 }
 0x53b   :  { %v804_v46 = vpop.permute.xlu0 %803 }
 0x53c   :  { %v3121_v47 = vmul.f32 %v2734_v28, %v804_v46 }
 0x53e   :  { %916 = vrot.lane.b32.xlu0 %v3121_v47, %s2872_s0  ;;  %v911_v38 = vadd.f32 %v3121_v47, %v3088_v12  ;;  %v3175_v12 = vld [vmem:[#allocation2 + $0x8] sm:$0x3] }
 0x57a   :  { %v902_v50 = vpop.permute.xlu1 %901 }
 0x57b   :  { %v904_v51 = vadd.f32 %v902_v50, %v894_v48 }
 0x57d   :  { %2743 = vtanh.f32 %v904_v51 }
 0x587   :  { %v2744_v52 = vpop.eup %2743 }
 0x588   :  { %907 = vrot.lane.b32.xlu1 %v2744_v52, %s2871_s6 }
 0x5b0   :  { %v917_v53 = vpop.permute.xlu0 %916 }
 0x5b1   :  { %2525 = vmatmul.mubr.msk.f32.vlgmr.msra.gmra.mrb[8].mxu1 %vm62_vm1, %v917_v53 }
 0x5b2   :  { %2659 = vmatpush3.bf16.msra.mxu1 %v2996_v14  ;;  %2531 = vmatprep.mubr.msk.f32.mxu1 %vm2866_vm0, %v2867_v6 }
 0x5b3   :  { %2663 = vmatprep.subr.bf16.mxu1 %v2865_v3 }
 0x5fa   :  { %v908_v54 = vpop.permute.xlu1 %907 }
 0x5fb   :  { %v910_v55 = vmul.f32 %v2742_v42, %v908_v54 }
 0x5fd   :  { %1016 = vrot.lane.b32.xlu1 %v910_v55, %s2870_s12  ;;  %v912_v25 = vadd.f32 %v910_v55, %v3092_v15 }
 0x66f   :  { %v1017_v56 = vpop.permute.xlu1 %1016 }
 0x670   :  { %2532 = vmatmul.mubr.msk.f32.vlgmr.msra.gmra.mrb[10].mxu1 %vm62_vm1, %v1017_v56 }
 0x671   :  { %2665 = vmatpush3.bf16.msra.mxu1 %v2996_v14  ;;  %2545 = vmatprep.mubr.msk.f32.mxu1 %vm2866_vm0, %v2867_v6 }
 0x672   :  { %2669 = vmatprep.subr.bf16.mxu1 %v2865_v3 }
 0x684   :  { %v986_v57 = vpop.f32.mrb[8].mxu1 }
 0x685   :  { %v2526_v58 = vpop.f32.mrb[9].mxu1  ;;  %v990_v17 = vadd.f32 %v986_v57, %v3146_v16 }
 0x687   :  { %v2351_v21 = vmul.f32 -1.442695, %v990_v17 }
 0x743   :  { %v1086_v59 = vpop.f32.mrb[10].mxu1 }
 0x744   :  { %1091 = vrot.lane.b32.xlu0 %v1086_v59, %s2868_s3  ;;  %v2533_v60 = vpop.f32.mrb[11].mxu1  ;;  %v1121_v59 = vld [vmem:[#allocation2 + $0x6] sm:$0x3] }
 0x7b6   :  { %v1092_v62 = vpop.permute.xlu0 %1091 }
 0x7b7   :  { %v1094_v63 = vadd.f32 %v1092_v62, %v3139_v61 }
 0x7b9   :  { %2745 = vtanh.f32 %v1094_v63  ;;  %v2353_v1 = vmul.f32 -1.442695, %v1094_v63 }
 0x7bb   :  { %2747 = vpow2.f32 %v2353_v1 }
 0x7c3   :  { %v2746_v0 = vpop.eup %2745 }
 0x7c4   :  { %1104 = vrot.lane.b32.xlu1 %v2746_v0, %s2869_s4 }
 0x7c5   :  { %v2748_v2 = vpop.eup %2747 }
 0x7c6   :  { %v1098_v4 = vadd.f32 1.0, %v2748_v2 }
 0x7c8   :  { %2749 = vrcp.f32 %v1098_v4 }
 0x7d2   :  { %v2750_v5 = vpop.eup %2749 }
 0x7d3   :  { %v1102_v10 = vmul.f32 %v2750_v5, %v904_v51 }
 0x836   :  { %v1105_v7 = vpop.permute.xlu1 %1104 }
 0x837   :  { %v1107_v9 = vmul.f32 %v2750_v5, %v1105_v7 }
 0x839   :  { %1109 = vrot.lane.b32.xlu0 %v1107_v9, %s2870_s12 }
 0x8ab   :  { %v1110_v11 = vpop.permute.xlu0 %1109 }
 0x8ac   :  { %v3144_v13 = vadd.f32 %v1110_v11, %v1102_v10 }
 0x8ae   :  { %2751 = vtanh.f32 %v3144_v13 }
 0x8af   :  { %2753 = vtanh.f32 %v990_v17 }
 0x8b0   :  { %2755 = vpow2.f32 %v2351_v21 }
 0x8b8   :  { %v2752_v19 = vpop.eup %2751 }
 0x8b9   :  { %1115 = vrot.lane.b32.xlu1 %v2752_v19, %s2871_s6  ;;  %v2754_v20 = vpop.eup %2753 }
 0x8ba   :  { %v2756_v22 = vpop.eup %2755 }
 0x8bb   :  { %v994_v23 = vadd.f32 1.0, %v2756_v22 }
 0x8bd   :  { %1000 = vrot.lane.b32.xlu1 %v2754_v20, %s2869_s4  ;;  %2757 = vrcp.f32 %v994_v23 }
 0x8c7   :  { %v2758_v28 = vpop.eup %2757 }
 0x8c8   :  { %v998_v15 = vmul.f32 %v2758_v28, %v3116_v37 }
 0x92b   :  { %v1116_v24 = vpop.permute.xlu1 %1115 }
 0x92c   :  { %v1118_v26 = vmul.f32 %v2750_v5, %v1116_v24 }
 0x92e   :  { %v3153_v27 = vadd.f32 %v1118_v26, %v912_v25  ;;  %1224 = vrot.lane.b32.xlu0 %v1118_v26, %s2870_s12 }
 0x92f   :  { %v1001_v29 = vpop.permute.xlu1 %1000 }
 0x930   :  { %v1003_v30 = vmul.f32 %v2758_v28, %v1001_v29 }
 0x932   :  { %1005 = vrot.lane.b32.xlu0 %v1003_v30, %s2870_s12 }
 0x9a0   :  { %v1225_v32 = vpop.permute.xlu0 %1224 }
 0x9a1   :  { %2546 = vmatmul.mubr.msk.f32.vlgmr.msra.gmra.mrb[12].mxu1 %vm62_vm1, %v1225_v32 }
 0x9a2   :  { %2671 = vmatpush3.bf16.msra.mxu1 %v2996_v14  ;;  %2559 = vmatprep.mubr.msk.f32.mxu1 %vm2866_vm0, %v2867_v6 }
 0x9a3   :  { %2675 = vmatprep.subr.bf16.mxu1 %v2865_v3 }
 0x9a4   :  { %v1006_v33 = vpop.permute.xlu0 %1005 }
 0x9a5   :  { %v1008_v34 = vadd.f32 %v1006_v33, %v998_v15 }
 0x9a7   :  { %2759 = vtanh.f32 %v1008_v34 }
 0x9b1   :  { %v2760_v35 = vpop.eup %2759 }
 0x9b2   :  { %1011 = vrot.lane.b32.xlu1 %v2760_v35, %s2871_s6 }
 0xa24   :  { %v1012_v36 = vpop.permute.xlu1 %1011 }
 0xa25   :  { %v1014_v39 = vmul.f32 %v2758_v28, %v1012_v36 }
 0xa27   :  { %v3166_v40 = vadd.f32 %v1014_v39, %v911_v38  ;;  %1124 = vrot.lane.b32.xlu1 %v1014_v39, %s2872_s0 }
 0xa74   :  { %v1294_v41 = vpop.f32.mrb[12].mxu1 }
 0xa75   :  { %1299 = vrot.lane.b32.xlu0 %v1294_v41, %s2868_s3  ;;  %v2547_v37 = vpop.f32.mrb[13].mxu1 }
 0xa99   :  { %v1125_v42 = vpop.permute.xlu1 %1124 }
 0xa9a   :  { %2539 = vmatmul.mubr.msk.f32.vlgmr.msra.gmra.mrb[2].mxu0 %vm62_vm1, %v1125_v42 }
 0xa9b   :  { %2668 = vmatpush3.bf16.msra.mxu0 %v2977_v8  ;;  %2552 = vmatprep.mubr.msk.f32.mxu0 %vm2866_vm0, %v2867_v6 }
 0xa9c   :  { %2672 = vmatprep.subr.bf16.mxu0 %v2865_v3 }
 0xae7   :  { %v1300_v43 = vpop.permute.xlu0 %1299 }
 0xae8   :  { %v1302_v44 = vadd.f32 %v1300_v43, %v3175_v12 }
 0xaea   :  { %2761 = vtanh.f32 %v1302_v44  ;;  %v2357_v47 = vmul.f32 -1.442695, %v1302_v44 }
 0xaec   :  { %2763 = vpow2.f32 %v2357_v47 }
 0xaf4   :  { %v2762_v46 = vpop.eup %2761 }
 0xaf5   :  { %1312 = vrot.lane.b32.xlu0 %v2762_v46, %s2869_s4 }
 0xaf6   :  { %v2764_v48 = vpop.eup %2763 }
 0xaf7   :  { %v1306_v50 = vadd.f32 1.0, %v2764_v48 }
 0xaf9   :  { %2765 = vrcp.f32 %v1306_v50 }
 0xb03   :  { %v2766_v51 = vpop.eup %2765 }
 0xb04   :  { %v1310_v56 = vmul.f32 %v2766_v51, %v3144_v13 }
 0xb67   :  { %v1313_v52 = vpop.permute.xlu0 %1312 }
 0xb68   :  { %v1315_v53 = vmul.f32 %v2766_v51, %v1313_v52 }
 0xb6a   :  { %1317 = vrot.lane.b32.xlu1 %v1315_v53, %s2870_s12 }
 0xb6d   :  { %v1194_v54 = vpop.f32.mrb[2].mxu0 }
 0xb6e   :  { %v2540_v55 = vpop.f32.mrb[3].mxu0  ;;  %v1198_v60 = vadd.f32 %v1194_v54, %v1121_v59 }
 0xb70   :  { %v2355_v0 = vmul.f32 -1.442695, %v1198_v60 }
 0xbdc   :  { %v1318_v57 = vpop.permute.xlu1 %1317 }
 0xbdd   :  { %v3181_v58 = vadd.f32 %v1318_v57, %v1310_v56 }
 0xbdf   :  { %2767 = vtanh.f32 %v3181_v58 }
 0xbe0   :  { %2769 = vtanh.f32 %v1198_v60 }
 0xbe1   :  { %2771 = vpow2.f32 %v2355_v0 }
 0xbe9   :  { %v2768_v62 = vpop.eup %2767 }
 0xbea   :  { %1323 = vrot.lane.b32.xlu0 %v2768_v62, %s2871_s6  ;;  %v2770_v63 = vpop.eup %2769 }
 0xbeb   :  { %v2772_v1 = vpop.eup %2771 }
 0xbec   :  { %v1202_v2 = vadd.f32 1.0, %v2772_v1 }
 0xbee   :  { %1208 = vrot.lane.b32.xlu0 %v2770_v63, %s2869_s4  ;;  %2773 = vrcp.f32 %v1202_v2 }
 0xbf8   :  { %v2774_v9 = vpop.eup %2773 }
 0xbf9   :  { %v1206_v17 = vmul.f32 %v2774_v9, %v1008_v34 }
 0xc5c   :  { %v1324_v4 = vpop.permute.xlu0 %1323 }
 0xc5d   :  { %v1326_v5 = vmul.f32 %v2766_v51, %v1324_v4 }
 0xc5f   :  { %v3187_v7 = vadd.f32 %v1326_v5, %v3153_v27  ;;  %1430 = vrot.lane.b32.xlu1 %v1326_v5, %s2870_s12 }
 0xc60   :  { %v1209_v10 = vpop.permute.xlu0 %1208 }
 0xc61   :  { %v1211_v11 = vmul.f32 %v2774_v9, %v1209_v10 }
 0xc63   :  { %1213 = vrot.lane.b32.xlu1 %v1211_v11, %s2870_s12 }
 0xcd1   :  { %v1431_v13 = vpop.permute.xlu1 %1430 }
 0xcd2   :  { %2560 = vmatmul.mubr.msk.f32.vlgmr.msra.gmra.mrb[14].mxu1 %vm62_vm1, %v1431_v13 }
 0xcd3   :  { %2677 = vmatpush3.bf16.msra.mxu1 %v2996_v14  ;;  %2573 = vmatprep.mubr.msk.f32.mxu1 %vm2866_vm0, %v2867_v6 }
 0xcd4   :  { %2681 = vmatprep.subr.bf16.mxu1 %v2865_v3 }
 0xcd5   :  { %v1214_v19 = vpop.permute.xlu1 %1213 }
 0xcd6   :  { %v1216_v20 = vadd.f32 %v1214_v19, %v1206_v17 }
 0xcd8   :  { %2775 = vtanh.f32 %v1216_v20 }
 0xce2   :  { %v2776_v21 = vpop.eup %2775 }
 0xce3   :  { %1219 = vrot.lane.b32.xlu0 %v2776_v21, %s2871_s6 }
 0xd55   :  { %v1220_v22 = vpop.permute.xlu0 %1219 }
 0xd56   :  { %v1222_v23 = vmul.f32 %v2774_v9, %v1220_v22 }
 0xd58   :  { %v1327_v24 = vadd.f32 %v1222_v23, %v3166_v40  ;;  %1330 = vrot.lane.b32.xlu1 %v1222_v23, %s2872_s0 }
 0xda5   :  { %v1500_v25 = vpop.f32.mrb[14].mxu1 }
 0xda6   :  { %1505 = vrot.lane.b32.xlu0 %v1500_v25, %s2868_s3  ;;  %v2561_v26 = vpop.f32.mrb[15].mxu1 }
 0xdca   :  { %v1331_v27 = vpop.permute.xlu1 %1330 }
 0xdcb   :  { %2553 = vmatmul.mubr.msk.f32.vlgmr.msra.gmra.mrb[4].mxu0 %vm62_vm1, %v1331_v27 }
 0xdcc   :  { %2674 = vmatpush3.bf16.msra.mxu0 %v2977_v8  ;;  %2566 = vmatprep.mubr.msk.f32.mxu0 %vm2866_vm0, %v2867_v6 }
 0xdcd   :  { %2678 = vmatprep.subr.bf16.mxu0 %v2865_v3 }
 0xe18   :  { %v1506_v28 = vpop.permute.xlu0 %1505 }
 0xe19   :  { %v1508_v29 = vadd.f32 %v1506_v28, %v1121_v59 }
 0xe1b   :  { %2777 = vtanh.f32 %v1508_v29  ;;  %v2361_v32 = vmul.f32 -1.442695, %v1508_v29 }
 0xe1d   :  { %2779 = vpow2.f32 %v2361_v32 }
 0xe25   :  { %v2778_v30 = vpop.eup %2777 }
 0xe26   :  { %1518 = vrot.lane.b32.xlu1 %v2778_v30, %s2869_s4 }
 0xe27   :  { %v2780_v15 = vpop.eup %2779 }
 0xe28   :  { %v1512_v33 = vadd.f32 1.0, %v2780_v15 }
 0xe2a   :  { %2781 = vrcp.f32 %v1512_v33 }
 0xe34   :  { %v2782_v34 = vpop.eup %2781 }
 0xe35   :  { %v1516_v42 = vmul.f32 %v2782_v34, %v3181_v58 }
 0xe98   :  { %v1519_v35 = vpop.permute.xlu1 %1518 }
 0xe99   :  { %v1521_v36 = vmul.f32 %v2782_v34, %v1519_v35 }
 0xe9b   :  { %1523 = vrot.lane.b32.xlu0 %v1521_v36, %s2870_s12 }
 0xe9e   :  { %v1400_v38 = vpop.f32.mrb[4].mxu0 }
 0xe9f   :  { %v1404_v39 = vadd.f32 %v1400_v38, %v3175_v12  ;;  %v2554_v40 = vpop.f32.mrb[5].mxu0 }
 0xea1   :  { %2783 = vtanh.f32 %v1404_v39  ;;  %v2359_v37 = vmul.f32 -1.442695, %v1404_v39 }
 0xea3   :  { %2785 = vpow2.f32 %v2359_v37 }
 0xeab   :  { %v2784_v41 = vpop.eup %2783 }
 0xeac   :  { %1414 = vrot.lane.b32.xlu0 %v2784_v41, %s2869_s4 }
 0xead   :  { %v2786_v43 = vpop.eup %2785 }
 0xeae   :  { %v1408_v47 = vadd.f32 1.0, %v2786_v43 }
 0xf0d   :  { %v1524_v44 = vpop.permute.xlu0 %1523 }
 0xf0e   :  { %v3210_v46 = vadd.f32 %v1524_v44, %v1516_v42 }
 0xf10   :  { %2787 = vtanh.f32 %v3210_v46 }
 0xf11   :  { %2789 = vrcp.f32 %v1408_v47 }
 0xf1a   :  { %v2788_v48 = vpop.eup %2787 }
 0xf1b   :  { %1529 = vrot.lane.b32.xlu1 %v2788_v48, %s2871_s6  ;;  %v2790_v12 = vpop.eup %2789 }
 0xf1c   :  { %v1412_v55 = vmul.f32 %v2790_v12, %v1216_v20 }
 0xf1e   :  { %v1415_v50 = vpop.permute.xlu0 %1414 }
 0xf1f   :  { %v1417_v51 = vmul.f32 %v2790_v12, %v1415_v50 }
 0xf21   :  { %1419 = vrot.lane.b32.xlu0 %v1417_v51, %s2870_s12 }
 0xf8d   :  { %v1530_v52 = vpop.permute.xlu1 %1529 }
 0xf8e   :  { %v1532_v53 = vmul.f32 %v2782_v34, %v1530_v52 }
 0xf90   :  { %v3216_v54 = vadd.f32 %v1532_v53, %v3187_v7  ;;  %1636 = vrot.lane.b32.xlu1 %v1532_v53, %s2870_s12 }
 0xf93   :  { %v1420_v56 = vpop.permute.xlu0 %1419 }
 0xf94   :  { %v1422_v57 = vadd.f32 %v1420_v56, %v1412_v55 }
 0xf96   :  { %2791 = vtanh.f32 %v1422_v57 }
 0xfa0   :  { %v2792_v58 = vpop.eup %2791 }
 0xfa1   :  { %1425 = vrot.lane.b32.xlu1 %v2792_v58, %s2871_s6 }
0x1002   :  { %v1637_v59 = vpop.permute.xlu1 %1636 }
0x1003   :  { %2574 = vmatmul.mubr.msk.f32.vlgmr.msra.gmra.mrb[16].mxu1 %vm62_vm1, %v1637_v59 }
0x1004   :  { %2683 = vmatpush3.bf16.msra.mxu1 %v2996_v14  ;;  %2587 = vmatprep.mubr.msk.f32.mxu1 %vm2866_vm0, %v2867_v6 }
0x1005   :  { %2687 = vmatprep.subr.bf16.mxu1 %v2865_v3 }
0x1013   :  { %v1426_v60 = vpop.permute.xlu1 %1425 }
0x1014   :  { %v1428_v62 = vmul.f32 %v2790_v12, %v1426_v60 }
0x1016   :  { %v1533_v63 = vadd.f32 %v1428_v62, %v1327_v24  ;;  %1536 = vrot.lane.b32.xlu0 %v1428_v62, %s2872_s0 }
0x1088   :  { %v1537_v0 = vpop.permute.xlu0 %1536 }
0x1089   :  { %2567 = vmatmul.mubr.msk.f32.vlgmr.msra.gmra.mrb[6].mxu0 %vm62_vm1, %v1537_v0 }
0x108a   :  { %2680 = vmatpush3.bf16.msra.mxu0 %v2977_v8  ;;  %2580 = vmatprep.mubr.msk.f32.mxu0 %vm2866_vm0, %v2867_v6 }
0x108b   :  { %2684 = vmatprep.subr.bf16.mxu0 %v2865_v3 }
0x10d6   :  { %v1706_v1 = vpop.f32.mrb[16].mxu1 }
0x10d7   :  { %1711 = vrot.lane.b32.xlu1 %v1706_v1, %s2868_s3  ;;  %v2575_v2 = vpop.f32.mrb[17].mxu1 }
0x1149   :  { %v1712_v4 = vpop.permute.xlu1 %1711 }
0x114a   :  { %v1714_v5 = vadd.f32 %v1712_v4, %v3146_v16 }
0x114c   :  { %2793 = vtanh.f32 %v1714_v5  ;;  %v2365_v17 = vmul.f32 -1.442695, %v1714_v5 }
0x1156   :  { %v2794_v7 = vpop.eup %2793 }
0x1157   :  { %1724 = vrot.lane.b32.xlu0 %v2794_v7, %s2869_s4 }
0x115c   :  { %v1606_v9 = vpop.f32.mrb[6].mxu0 }
0x115d   :  { %v1610_v10 = vadd.f32 %v1606_v9, %v3139_v61  ;;  %v2568_v11 = vpop.f32.mrb[7].mxu0 }
0x115f   :  { %2795 = vtanh.f32 %v1610_v10  ;;  %v2363_v21 = vmul.f32 -1.442695, %v1610_v10 }
0x1160   :  { %2797 = vpow2.f32 %v2365_v17 }
0x1169   :  { %v2796_v13 = vpop.eup %2795 }
0x116a   :  { %1620 = vrot.lane.b32.xlu0 %v2796_v13, %s2869_s4  ;;  %v2798_v19 = vpop.eup %2797 }
0x116b   :  { %v1718_v20 = vadd.f32 1.0, %v2798_v19 }
0x116d   :  { %2799 = vrcp.f32 %v1718_v20 }
0x116e   :  { %2801 = vpow2.f32 %v2363_v21 }
0x1177   :  { %v2800_v16 = vpop.eup %2799 }
0x1178   :  { %v2802_v24 = vpop.eup %2801  ;;  %v1722_v28 = vmul.f32 %v2800_v16, %v3210_v46 }
0x1179   :  { %v1614_v25 = vadd.f32 1.0, %v2802_v24 }
0x117b   :  { %2803 = vrcp.f32 %v1614_v25 }
0x1185   :  { %v2804_v61 = vpop.eup %2803 }
0x1186   :  { %v1618_v15 = vmul.f32 %v2804_v61, %v1422_v57 }
0x11c9   :  { %v1725_v22 = vpop.permute.xlu0 %1724 }
0x11ca   :  { %v1727_v23 = vmul.f32 %v2800_v16, %v1725_v22 }
0x11cc   :  { %1729 = vrot.lane.b32.xlu1 %v1727_v23, %s2870_s12 }
0x11dc   :  { %v1621_v26 = vpop.permute.xlu0 %1620 }
0x11dd   :  { %v1623_v27 = vmul.f32 %v2804_v61, %v1621_v26 }
0x11df   :  { %1625 = vrot.lane.b32.xlu0 %v1623_v27, %s2870_s12 }
0x123e   :  { %v1730_v29 = vpop.permute.xlu1 %1729 }
0x123f   :  { %v3239_v30 = vadd.f32 %v1730_v29, %v1722_v28 }
0x1241   :  { %2805 = vtanh.f32 %v3239_v30 }
0x124b   :  { %v2806_v32 = vpop.eup %2805 }
0x124c   :  { %1735 = vrot.lane.b32.xlu1 %v2806_v32, %s2871_s6 }
0x1251   :  { %v1626_v33 = vpop.permute.xlu0 %1625 }
0x1252   :  { %v1628_v34 = vadd.f32 %v1626_v33, %v1618_v15 }
0x1254   :  { %2807 = vtanh.f32 %v1628_v34 }
0x125e   :  { %v2808_v35 = vpop.eup %2807 }
0x125f   :  { %1631 = vrot.lane.b32.xlu0 %v2808_v35, %s2871_s6 }
0x12be   :  { %v1736_v36 = vpop.permute.xlu1 %1735 }
0x12bf   :  { %v1738_v38 = vmul.f32 %v2800_v16, %v1736_v36 }
0x12c1   :  { %v3245_v39 = vadd.f32 %v1738_v38, %v3216_v54  ;;  %1842 = vrot.lane.b32.xlu1 %v1738_v38, %s2870_s12 }
0x12d1   :  { %v1632_v40 = vpop.permute.xlu0 %1631 }
0x12d2   :  { %v1634_v41 = vmul.f32 %v2804_v61, %v1632_v40 }
0x12d4   :  { %v1739_v37 = vadd.f32 %v1634_v41, %v1533_v63  ;;  %1742 = vrot.lane.b32.xlu1 %v1634_v41, %s2872_s0 }
0x1333   :  { %v1843_v42 = vpop.permute.xlu1 %1842 }
0x1334   :  { %2588 = vmatmul.mubr.msk.f32.vlgmr.msra.gmra.mrb[18].mxu1 %vm62_vm1, %v1843_v42 }
0x1335   :  { %2689 = vmatpush3.bf16.msra.mxu1 %v2996_v14  ;;  %2601 = vmatprep.mubr.msk.f32.mxu1 %vm2866_vm0, %v2867_v6 }
0x1336   :  { %2693 = vmatprep.subr.bf16.mxu1 %v2865_v3 }
0x1346   :  { %v1743_v43 = vpop.permute.xlu1 %1742 }
0x1347   :  { %2581 = vmatmul.mubr.msk.f32.vlgmr.msra.gmra.mrb[8].mxu0 %vm62_vm1, %v1743_v43  ;;  %v2154_v43 = vld [vmem:[%s3337_s13] sm:$0xff] }
0x1348   :  { %2686 = vmatpush3.bf16.msra.mxu0 %v2977_v8  ;;  %2594 = vmatprep.mubr.msk.f32.mxu0 %vm2866_vm0, %v2867_v6 }
0x1349   :  { %2690 = vmatprep.subr.bf16.mxu0 %v2865_v3 }
0x1407   :  { %v1912_v44 = vpop.f32.mrb[18].mxu1 }
0x1408   :  { %1917 = vrot.lane.b32.xlu0 %v1912_v44, %s2868_s3  ;;  %v2589_v46 = vpop.f32.mrb[19].mxu1  ;;  %v2155_v44 = vld [vmem:[%s3337_s13 + $0x8] sm:$0xff] }
0x141a   :  { %v1812_v14 = vpop.f32.mrb[8].mxu0 }
0x141b   :  { %v1816_v47 = vadd.f32 %v1812_v14, %v3112_v31  ;;  %v2582_v48 = vpop.f32.mrb[9].mxu0  ;;  %v2694_v14 = vpack.c.bf16 %v2155_v44, %v2154_v43 }
0x141d   :  { %2809 = vtanh.f32 %v1816_v47  ;;  %v2367_v51 = vmul.f32 -1.442695, %v1816_v47 }
0x1427   :  { %v2810_v12 = vpop.eup %2809 }
0x1428   :  { %1826 = vrot.lane.b32.xlu0 %v2810_v12, %s2869_s4  ;;  %v2157_v12 = vld [vmem:[%s3338_s14] sm:$0xff] }
0x147a   :  { %v1918_v50 = vpop.permute.xlu0 %1917 }
0x147b   :  { %v1920_v8 = vadd.f32 %v1918_v50, %v3106_v18  ;;  %v2158_v50 = vld [vmem:[%s3338_s14 + $0x8] sm:$0xff] }
0x147d   :  { %2811 = vtanh.f32 %v1920_v8  ;;  %v2369_v56 = vmul.f32 -1.442695, %v1920_v8  ;;  %v2691_v8 = vpack.c.bf16 %v2158_v50, %v2157_v12 }
0x147e   :  { %2813 = vpow2.f32 %v2367_v51 }
0x1487   :  { %v2812_v52 = vpop.eup %2811 }
0x1488   :  { %1930 = vrot.lane.b32.xlu1 %v2812_v52, %s2869_s4  ;;  %v2814_v3 = vpop.eup %2813 }
0x1489   :  { %v1820_v53 = vadd.f32 1.0, %v2814_v3 }
0x148b   :  { %2815 = vrcp.f32 %v1820_v53 }
0x148c   :  { %2817 = vpow2.f32 %v2369_v56 }
0x1495   :  { %v2816_v54 = vpop.eup %2815 }
0x1496   :  { %v2818_v57 = vpop.eup %2817  ;;  %v1824_v62 = vmul.f32 %v2816_v54, %v1628_v34 }
0x1497   :  { %v1924_v58 = vadd.f32 1.0, %v2818_v57 }
0x1499   :  { %2819 = vrcp.f32 %v1924_v58 }
0x149a   :  { %v1827_v55 = vpop.permute.xlu0 %1826 }
0x149b   :  { %v1829_v31 = vmul.f32 %v2816_v54, %v1827_v55 }
0x149d   :  { %1831 = vrot.lane.b32.xlu0 %v1829_v31, %s2870_s12 }
0x14a3   :  { %v2820_v59 = vpop.eup %2819 }
0x14a4   :  { %v1928_v2 = vmul.f32 %v2820_v59, %v3239_v30 }
0x14fa   :  { %v1931_v18 = vpop.permute.xlu1 %1930 }
0x14fb   :  { %v1933_v60 = vmul.f32 %v2820_v59, %v1931_v18 }
0x14fd   :  { %1935 = vrot.lane.b32.xlu1 %v1933_v60, %s2870_s12 }
0x150f   :  { %v1832_v63 = vpop.permute.xlu0 %1831 }
0x1510   :  { %v1834_v0 = vadd.f32 %v1832_v63, %v1824_v62  ;;  %v2376_v62 = vld [vmem:[%s3339_s15] ss:$0 sm:$0xff] }
0x1512   :  { %2821 = vtanh.f32 %v1834_v0 }
0x151c   :  { %v2822_v1 = vpop.eup %2821 }
0x151d   :  { %1837 = vrot.lane.b32.xlu0 %v2822_v1, %s2871_s6 }
0x156f   :  { %v1936_v4 = vpop.permute.xlu1 %1935 }
0x1570   :  { %v1938_v5 = vadd.f32 %v1936_v4, %v1928_v2 }
0x1572   :  { %2823 = vtanh.f32 %v1938_v5 }
0x157c   :  { %v2824_v7 = vpop.eup %2823 }
0x157d   :  { %1941 = vrot.lane.b32.xlu1 %v2824_v7, %s2871_s6 }
0x158f   :  { %v1838_v9 = vpop.permute.xlu0 %1837 }
0x1590   :  { %v1840_v10 = vmul.f32 %v2816_v54, %v1838_v9 }
0x1592   :  { %v3269_v11 = vadd.f32 %v1840_v10, %v1739_v37  ;;  %1948 = vrot.lane.b32.xlu0 %v1840_v10, %s2872_s0 }
0x15ef   :  { %v1942_v13 = vpop.permute.xlu1 %1941 }
0x15f0   :  { %v1944_v17 = vmul.f32 %v2820_v59, %v1942_v13 }
0x15f2   :  { %v3273_v19 = vadd.f32 %v1944_v17, %v3245_v39  ;;  %2048 = vrot.lane.b32.xlu1 %v1944_v17, %s2870_s12 }
0x1604   :  { %v1949_v20 = vpop.permute.xlu0 %1948 }
0x1605   :  { %2595 = vmatmul.mubr.msk.f32.vlgmr.msra.gmra.mrb[10].mxu0 %vm62_vm1, %v1949_v20 }
0x1606   :  { %2608 = vmatprep.mubr.msk.f32.mxu0 %vm2866_vm0, %v2867_v6  ;;  %2692 = vmatpush3.bf16.msra.mxu0 %v2691_v8 }
0x1664   :  { %v2049_v21 = vpop.permute.xlu1 %2048 }
0x1665   :  { %2602 = vmatmul.mubr.msk.f32.vlgmr.msra.gmra.mrb[20].mxu1 %vm62_vm1, %v2049_v21 }
0x1666   :  { %2615 = vmatprep.mubr.msk.f32.mxu1 %vm2866_vm0, %v2867_v6  ;;  %2695 = vmatpush3.bf16.msra.mxu1 %v2694_v14 }
0x16d8   :  { %v2018_v16 = vpop.f32.mrb[10].mxu0 }
0x16d9   :  { %v2022_v22 = vadd.f32 %v2018_v16, %v3077_v49  ;;  %v2596_v23 = vpop.f32.mrb[11].mxu0 }
0x16db   :  { %2825 = vtanh.f32 %v2022_v22  ;;  %v2371_v61 = vmul.f32 -1.442695, %v2022_v22 }
0x16dd   :  { %2827 = vpow2.f32 %v2371_v61 }
0x16e5   :  { %v2826_v24 = vpop.eup %2825 }
0x16e6   :  { %2032 = vrot.lane.b32.xlu0 %v2826_v24, %s2869_s4 }
0x16e7   :  { %v2828_v27 = vpop.eup %2827 }
0x16e8   :  { %v2026_v28 = vadd.f32 1.0, %v2828_v27 }
0x16ea   :  { %2829 = vrcp.f32 %v2026_v28 }
0x16f4   :  { %v2830_v29 = vpop.eup %2829 }
0x16f5   :  { %v2030_v33 = vmul.f32 %v2830_v29, %v1834_v0 }
0x1738   :  { %v2118_v25 = vpop.f32.mrb[20].mxu1 }
0x1739   :  { %2123 = vrot.lane.b32.xlu1 %v2118_v25, %s2868_s3  ;;  %v2603_v26 = vpop.f32.mrb[21].mxu1 }
0x1758   :  { %v2033_v30 = vpop.permute.xlu0 %2032 }
0x1759   :  { %v2035_v6 = vmul.f32 %v2830_v29, %v2033_v30 }
0x175b   :  { %2037 = vrot.lane.b32.xlu0 %v2035_v6, %s2870_s12 }
0x17ab   :  { %v2124_v49 = vpop.permute.xlu1 %2123 }
0x17ac   :  { %v2126_v32 = vadd.f32 %v2124_v49, %v3073_v45 }
0x17ae   :  { %2831 = vtanh.f32 %v2126_v32  ;;  %v2373_v38 = vmul.f32 -1.442695, %v2126_v32 }
0x17b8   :  { %v2832_v15 = vpop.eup %2831 }
0x17b9   :  { %2136 = vrot.lane.b32.xlu1 %v2832_v15, %s2869_s4 }
0x17cd   :  { %v2038_v34 = vpop.permute.xlu0 %2037 }
0x17ce   :  { %v2040_v35 = vadd.f32 %v2038_v34, %v2030_v33 }
0x17d0   :  { %2833 = vtanh.f32 %v2040_v35 }
0x17d1   :  { %2835 = vpow2.f32 %v2373_v38 }
0x17da   :  { %v2834_v36 = vpop.eup %2833 }
0x17db   :  { %2043 = vrot.lane.b32.xlu0 %v2834_v36, %s2871_s6  ;;  %v2836_v39 = vpop.eup %2835 }
0x17dc   :  { %v2130_v40 = vadd.f32 1.0, %v2836_v39 }
0x17de   :  { %2837 = vrcp.f32 %v2130_v40 }
0x17e8   :  { %v2838_v41 = vpop.eup %2837 }
0x17e9   :  { %v2134_v45 = vmul.f32 %v2838_v41, %v1938_v5 }
0x182b   :  { %v2137_v37 = vpop.permute.xlu1 %2136 }
0x182c   :  { %v2139_v42 = vmul.f32 %v2838_v41, %v2137_v37 }
0x182e   :  { %2141 = vrot.lane.b32.xlu1 %v2139_v42, %s2870_s12 }
0x184d   :  { %v2044_v48 = vpop.permute.xlu0 %2043 }
0x184e   :  { %v2046_v51 = vmul.f32 %v2830_v29, %v2044_v48 }
0x1850   :  { %v2151_v52 = vadd.f32 %v2046_v51, %v3269_v11 }
0x1852   :  { %v2153_v53 = vmul.f32 0.125, %v2151_v52 }
0x18a0   :  { %v2142_v46 = vpop.permute.xlu1 %2141 }
0x18a1   :  { %v2144_v47 = vadd.f32 %v2142_v46, %v2134_v45 }
0x18a3   :  { %2839 = vtanh.f32 %v2144_v47 }
0x18ad   :  { %v2840_v3 = vpop.eup %2839 }
0x18ae   :  { %2147 = vrot.lane.b32.xlu1 %v2840_v3, %s2871_s6 }
0x18b2   :  { %2235 = vrot.lane.b32.xlu1 %v2153_v53, %s2872_s0 }
0x1920   :  { %v2148_v54 = vpop.permute.xlu1 %2147 }
0x1921   :  { %v2150_v55 = vmul.f32 %v2838_v41, %v2148_v54 }
0x1923   :  { %v2152_v31 = vadd.f32 %v2150_v55, %v3273_v19 }
0x1924   :  { %v2236_v56 = vpop.permute.xlu1 %2235 }
0x1925   :  { %v2156_v57 = vmul.f32 0.125, %v2152_v31  ;;  %2616 = vmatmul.mubr.msk.f32.vlgmr.msra.gmra.mrb[22].mxu1 %vm62_vm1, %v2236_v56 }
0x1927   :  { %2160 = vrot.lane.b32.xlu0 %v2156_v57, %s2870_s12 }
0x1999   :  { %v2161_v58 = vpop.permute.xlu0 %2160 }
0x199a   :  { %2609 = vmatmul.mubr.msk.f32.vlgmr.msra.gmra.mrb[12].mxu0 %vm62_vm1, %v2161_v58 }
0x19f8   :  { %v2305_v59 = vpop.f32.mrb[22].mxu1 }
0x19f9   :  { %v2617_v18 = vpop.f32.mrb[23].mxu1 }
0x1a6d   :  { %v2230_v60 = vpop.f32.mrb[12].mxu0 }
0x1a6e   :  { %v2306_v63 = vadd.f32 %v2305_v59, %v2230_v60  ;;  %v2610_v0 = vpop.f32.mrb[13].mxu0 }
0x1a70   :  { %v2316_v1 = vadd.f32 %v2376_v62, %v2306_v63 }
0x1a72   :  { %2318 = vst.msk [vmem:[#allocation3] sm:$0x3] %vm2317_vm3, %v2316_v1 }
0x1a73   :  { %2852 = shalt.err (!%p2849_p4)
}
0x1a74   :  { %s2853_s5 = scalar_lea.hbm %s3340_s16, 32 }
0x1a75   :  { %p2854_p5 = scmp.ne.s32.totalorder %s3340_s16, %s2853_s5  ;;  %p2857_p6 = scmp.lt.u32.totalorder %s2853_s5, %s3340_s16 }
0x1a77   :  { %p2859_p7 = pnand %p2857_p6, %p2854_p5 }
0x1a79   :  { %2862 = shalt.err (!%p2859_p7)
}
0x1a7a   :  { %2328 = dma.vmem_to_hbm [thread:$0]  %s2326_s11, 32, %s3340_s16, [#allocation4]  }
0x1a7b   :  { %2863 = dma.done.wait [#allocation4], 32  }
0x1a7c   :  { %2864 = vsyncadd [#allocation4], 4294967264 }
0x1a7d   :  { %2332 = vsyncpa [#allocation4], 1 }

</bundles_post_ra>
